<compile_context>
chip_gen: v5e
topology: v5e:2x2
jax: 0.10.0
libtpu: 0.0.40
codegen_flags: <defaults>
</compile_context>

<pallas_src>
import functools
import math

import jax
import jax.numpy as jnp
from jax.experimental import pallas as pl
from jax.experimental.pallas import tpu as pltpu


# ----------------------------------------------------------------------------
# shared math helpers (used by both the Pallas kernel and the pure-JAX ref)
# ----------------------------------------------------------------------------
def _gelu(y):
    # tanh approximation of GELU (EUP-friendly on TPU)
    c0 = 0.7978845608028654  # sqrt(2/pi)
    return 0.5 * y * (1.0 + jnp.tanh(c0 * (y + 0.044715 * y * y * y)))


# ----------------------------------------------------------------------------
# fused all-layers kernel: grid = (batch_tiles, nlayers)
# ----------------------------------------------------------------------------
def _s4net_kernel(x_ref, kconv_ref, dskip_ref, gamma_ref, beta_ref,
                  wout_ref, bout_ref, o_ref, h_ref, zpad_ref, acc_ref,
                  *, prenorm: bool):
    layer = pl.program_id(1)
    tb, L, D = h_ref.shape

    @pl.when(layer == 0)
    def _():
        # Load this batch tile once; it stays resident in VMEM for all layers.
        h_ref[...] = x_ref[...].astype(jnp.float32)
        # Zero only the causal-pad half once per batch tile (it stays zero).
        zpad_ref[:, pl.ds(0, L), :] = jnp.zeros((tb, L, D), jnp.float32)

    x0 = h_ref[...]                                       # (tb, L, D) f32

    gamma = gamma_ref[...]                                # (1, 1, D)
    beta = beta_ref[...]                                  # (1, 1, D)

    def layer_norm(v):
        mu = jnp.mean(v, axis=-1, keepdims=True)
        c = v - mu
        var = jnp.mean(c * c, axis=-1, keepdims=True)
        return c * jax.lax.rsqrt(var + 1e-5) * gamma + beta

    z = layer_norm(x0) if prenorm else x0

    # --- causal depthwise SSM conv along time --------------------------------
    # y[b, l, d] = sum_s k[s, d] * z[b, l-s, d]
    # Shifted windows are REF reads of a zero-padded VMEM scratch at static
    # offsets (shifted loads, no slab copies); accumulator lives in VMEM so the
    # unrolled tap loop cannot blow register allocation.
    zpad_ref[:, pl.ds(L, L), :] = z
    acc_ref[...] = z * dskip_ref[...]                     # D*u skip term
    GROUP = 4                                             # taps fused per acc RMW
    for s0 in range(0, L, GROUP):
        upd = None
        for s in range(s0, min(s0 + GROUP, L)):
            tap = kconv_ref[:, pl.ds(s, 1), :]            # (1, 1, D) ref read
            term = tap * zpad_ref[:, pl.ds(L - s, L), :]  # shifted window ref read
            upd = term if upd is None else upd + term
        acc_ref[...] += upd

    y = _gelu(acc_ref[...])

    # --- position-wise output linear + GLU (bf16 on MXU, f32 accumulate) -----
    y2 = y.reshape(tb * L, D).astype(jnp.bfloat16)
    h = jnp.dot(y2, wout_ref[0], preferred_element_type=jnp.float32)
    h = h + bout_ref[0]                                   # (tb*L, 2D)
    gated = h[:, :D] * jax.nn.sigmoid(h[:, D:])

    out = gated.reshape(tb, L, D) + x0                    # residual
    if not prenorm:
        out = layer_norm(out)

    h_ref[...] = out                                      # carry to next layer

    @pl.when(layer == pl.num_programs(1) - 1)
    def _():
        o_ref[...] = out.astype(o_ref.dtype)


def _s4net_fused(h, p, *, prenorm: bool):
    """h: (B, L, D) float32; runs all layers in one pallas_call."""
    B, L, D = h.shape
    nlayers = p["kconv"].shape[0]

    # Honest VMEM accounting per batch row: in/out pipeline buffers (2x f32
    # blocks each), carried activation, 2L zero-padded conv scratch, conv
    # accumulator, plus ~5-6 slab-equivalents of body temporaries (z, gelu out,
    # (., 2D) matmul result, gated, out)  ->  ~14 (L, D) f32 slabs.
    slab = L * D * 4
    LIVE_SLABS = 14
    ACT_BUDGET = 24 * 2**20          # conservative: fits v7x (64 MiB/TC) and v5e/v6e
    tb = max(1, min(B, ACT_BUDGET // (LIVE_SLABS * slab)))
    # >= 4 batch-tile grid steps when possible: keeps the BlockSpec pipeline
    # prefetching and gives both v7x TensorCores work on the "parallel" axis.
    tb = max(1, min(tb, -(-B // 4)))
    nb = -(-B // tb)
    grid = (nb, nlayers)

    weight_block = (L * D * 4          # kconv (f32)
                    + 3 * D * 4        # dskip, gamma, beta (f32)
                    + D * 2 * D * 2    # wout (bf16)
                    + 2 * D * 4)       # bout (f32)
    vmem_limit = LIVE_SLABS * tb * slab + 2 * weight_block + 2 * 2**20
    vmem_limit = int(min(32 * 2**20, max(16 * 2**20, vmem_limit)))

    kernel = functools.partial(_s4net_kernel, prenorm=prenorm)
    return pl.pallas_call(
        kernel,
        out_shape=jax.ShapeDtypeStruct((B, L, D), h.dtype),
        grid=grid,
        in_specs=[
            pl.BlockSpec((tb, L, D), lambda i, l: (i, 0, 0)),     # activations (constant in l -> fetched once per tile)
            pl.BlockSpec((1, L, D), lambda i, l: (l, 0, 0)),      # SSM conv kernel, per layer
            pl.BlockSpec((1, 1, D), lambda i, l: (l, 0, 0)),      # D skip
            pl.BlockSpec((1, 1, D), lambda i, l: (l, 0, 0)),      # LN gamma
            pl.BlockSpec((1, 1, D), lambda i, l: (l, 0, 0)),      # LN beta
            pl.BlockSpec((1, D, 2 * D), lambda i, l: (l, 0, 0)),  # GLU weight (bf16)
            pl.BlockSpec((1, 1, 2 * D), lambda i, l: (l, 0, 0)),  # GLU bias
        ],
        out_specs=pl.BlockSpec((tb, L, D), lambda i, l: (i, 0, 0)),
        scratch_shapes=[
            pltpu.VMEM((tb, L, D), jnp.float32),       # activation carried across layers
            pltpu.VMEM((tb, 2 * L, D), jnp.float32),   # zero-padded conv input
            pltpu.VMEM((tb, L, D), jnp.float32),       # conv accumulator
        ],
        compiler_params=pltpu.CompilerParams(
            dimension_semantics=("parallel", "arbitrary"),
            vmem_limit_bytes=vmem_limit,
        ),
    )(h, p["kconv"], p["dskip"], p["gamma"], p["beta"], p["wout"], p["bout"])


def s4net_forward(x, params, *, prenorm: bool):
    """x: (B, model_dim, L) -- the layout the PyTorch module transposes at entry/exit."""
    # TODO(synk): fold these two transposes into the first/last layer step
    #             (in-kernel XLU transpose) to remove two full HBM passes.
    h = jnp.swapaxes(x, -1, -2)                    # (B, L, D)
    out = _s4net_fused(h, params, prenorm=prenorm)
    return jnp.swapaxes(out, -1, -2)               # back to (B, model_dim, L)


# ----------------------------------------------------------------------------
# parameter construction (deterministic, plain JAX -- not part of the kernel)
# ----------------------------------------------------------------------------
def make_s4d_conv_kernel(key, d_model, seq_len, d_state=64,
                         dt_min=1e-3, dt_max=1e-1):
    """S4D-Lin style SSM convolution kernel, returned as (L, d_model)."""
    k_dt, k_c = jax.random.split(key)
    log_dt = (jax.random.uniform(k_dt, (d_model,))
              * (math.log(dt_max) - math.log(dt_min)) + math.log(dt_min))
    dt = jnp.exp(log_dt)                                           # (D,)
    n = d_state // 2
    A = -0.5 + 1j * jnp.pi * jnp.arange(n, dtype=jnp.float32)      # (N,)
    C = jax.random.normal(k_c, (d_model, n, 2), jnp.float32)
    C = (C[..., 0] + 1j * C[..., 1]) * (0.5 ** 0.5)                # (D, N)
    dtA = dt[:, None] * A[None, :]                                 # (D, N)
    B_disc = (jnp.exp(dtA) - 1.0) / A[None, :]
    steps = jnp.arange(seq_len, dtype=jnp.float32)
    E = jnp.exp(dtA[:, :, None] * steps[None, None, :])            # (D, N, L)
    K = 2.0 * jnp.real(jnp.sum((C * B_disc)[:, :, None] * E, axis=1))  # (D, L)
    return jnp.asarray(K.T, jnp.float32)                           # (L, D)


def init_s4net_params(key, d_model, seq_len, nlayers, d_state=64):
    kconv, dskip, wout, bout, gamma, beta = [], [], [], [], [], []
    for _ in range(nlayers):
        key, k1, k2, k3 = jax.random.split(key, 4)
        kconv.append(make_s4d_conv_kernel(k1, d_model, seq_len, d_state))
        dskip.append(jax.random.normal(k2, (1, d_model), jnp.float32))
        wout.append(jax.random.normal(k3, (d_model, 2 * d_model), jnp.float32)
                    / math.sqrt(d_model))
        bout.append(jnp.zeros((1, 2 * d_model), jnp.float32))
        gamma.append(jnp.ones((1, d_model), jnp.float32))
        beta.append(jnp.zeros((1, d_model), jnp.float32))
    return dict(
        kconv=jnp.stack(kconv),                        # (nl, L, D)  f32
        dskip=jnp.stack(dskip),                        # (nl, 1, D)  f32
        gamma=jnp.stack(gamma),                        # (nl, 1, D)  f32
        beta=jnp.stack(beta),                          # (nl, 1, D)  f32
        wout=jnp.stack(wout).astype(jnp.bfloat16),     # (nl, D, 2D) bf16 (MXU)
        bout=jnp.stack(bout),                          # (nl, 1, 2D) f32
    )


# ----------------------------------------------------------------------------
# pure-JAX reference (identical math) for correctness checking
# ----------------------------------------------------------------------------
def _s4_layer_ref(x, kconv, dskip, gamma, beta, wout, bout, prenorm):
    B, L, D = x.shape

    def ln(v):
        mu = jnp.mean(v, -1, keepdims=True)
        c = v - mu
        var = jnp.mean(c * c, -1, keepdims=True)
        return c * jax.lax.rsqrt(var + 1e-5) * gamma + beta

    z = ln(x) if prenorm else x
    zp = jnp.pad(z, ((0, 0), (L, 0), (0, 0)))
    acc = z * dskip
    for s in range(L):
        acc = acc + kconv[s][None, None, :] * zp[:, L - s:2 * L - s, :]
    y = _gelu(acc)
    h = jnp.dot(y.reshape(B * L, D).astype(jnp.bfloat16), wout,
                preferred_element_type=jnp.float32) + bout
    out = (h[:, :D] * jax.nn.sigmoid(h[:, D:])).reshape(B, L, D) + x
    if not prenorm:
        out = ln(out)
    return out


def s4net_reference(x, params, *, prenorm):
    h = jnp.swapaxes(x, -1, -2)
    nlayers = params["kconv"].shape[0]
    for li in range(nlayers):
        h = _s4_layer_ref(h, params["kconv"][li], params["dskip"][li],
                          params["gamma"][li], params["beta"][li],
                          params["wout"][li], params["bout"][li], prenorm)
    return jnp.swapaxes(h, -1, -2)


# ----------------------------------------------------------------------------
if __name__ == "__main__":
    B, D, L, NLAYERS = 8, 128, 32, 2          # small but lane/sublane-dense shapes
    key = jax.random.PRNGKey(0)
    kx, kp = jax.random.split(key)
    x = jax.random.normal(kx, (B, D, L), jnp.float32)   # module input: (B, model_dim, L)
    params = init_s4net_params(kp, d_model=D, seq_len=L, nlayers=NLAYERS)

    for prenorm in (True, False):
        fwd = jax.jit(functools.partial(s4net_forward, prenorm=prenorm))
        out = jax.block_until_ready(fwd(x, params))
        ref = jax.block_until_ready(s4net_reference(x, params, prenorm=prenorm))
        assert out.shape == x.shape
        assert bool(jnp.isfinite(out).all())
        err = float(jnp.max(jnp.abs(out - ref)))
        assert jnp.allclose(out, ref, atol=2e-2, rtol=2e-2), f"max abs err: {err}"

    print("KERNEL_OK")
</pallas_src>

<mosaic_0001>
module attributes {stable_mosaic.version = 11 : i64} {
  func.func @_s4net_kernel(%arg0: i32, %arg1: i32, %arg2: memref<2x32x128xf32, #tpu.memory_space<vmem>>, %arg3: memref<1x32x128xf32, #tpu.memory_space<vmem>>, %arg4: memref<1x1x128xf32, #tpu.memory_space<vmem>>, %arg5: memref<1x1x128xf32, #tpu.memory_space<vmem>>, %arg6: memref<1x1x128xf32, #tpu.memory_space<vmem>>, %arg7: memref<1x128x256xbf16, #tpu.memory_space<vmem>>, %arg8: memref<1x1x256xf32, #tpu.memory_space<vmem>>, %arg9: memref<2x32x128xf32, #tpu.memory_space<vmem>>, %arg10: memref<2x32x128xf32, #tpu.memory_space<vmem>>, %arg11: memref<2x64x128xf32, #tpu.memory_space<vmem>>, %arg12: memref<2x32x128xf32, #tpu.memory_space<vmem>>) attributes {dimension_semantics = [#tpu.dimension_semantics<parallel>, #tpu.dimension_semantics<arbitrary>], iteration_bounds = array<i64: 4, 2>, scalar_prefetch = 0 : i64, scratch_operands = 3 : i64, tpu.core_type = #tpu.core_type<tc>, window_params = [{transform_indices = @transform_0, window_bounds = array<i64: 2, 32, 128>}, {transform_indices = @transform_1, window_bounds = array<i64: 1, 32, 128>}, {transform_indices = @transform_2, window_bounds = array<i64: 1, 1, 128>}, {transform_indices = @transform_3, window_bounds = array<i64: 1, 1, 128>}, {transform_indices = @transform_4, window_bounds = array<i64: 1, 1, 128>}, {transform_indices = @transform_5, window_bounds = array<i64: 1, 128, 256>}, {transform_indices = @transform_6, window_bounds = array<i64: 1, 1, 256>}, {transform_indices = @transform_7, window_bounds = array<i64: 2, 32, 128>}]} {
    %c0_i32 = arith.constant 0 : i32
    %0 = arith.cmpi eq, %arg1, %c0_i32 : i32
    %1 = arith.extui %0 : i1 to i32
    %c0_i32_0 = arith.constant 0 : i32
    %2 = arith.cmpi ne, %1, %c0_i32_0 : i32
    scf.if %2 {
      %c0_249 = arith.constant 0 : index
      %c0_250 = arith.constant 0 : index
      %c0_251 = arith.constant 0 : index
      %244 = vector.load %arg2[%c0_249, %c0_250, %c0_251] : memref<2x32x128xf32, #tpu.memory_space<vmem>>, vector<2x32x128xf32>
      %c0_252 = arith.constant 0 : index
      %c0_253 = arith.constant 0 : index
      %c0_254 = arith.constant 0 : index
      %245 = vector.load %arg10[%c0_252, %c0_253, %c0_254] : memref<2x32x128xf32, #tpu.memory_space<vmem>>, vector<2x32x128xf32>
      tpu.vector_store %arg10[%c0_252, %c0_253, %c0_254], %244 {strides = array<i32>} : memref<2x32x128xf32, #tpu.memory_space<vmem>>, vector<2x32x128xf32>,
      %cst_255 = arith.constant 0.000000e+00 : f32
      %246 = vector.broadcast %cst_255 : f32 to vector<2x32x128xf32>
      %c0_256 = arith.constant 0 : index
      %c0_257 = arith.constant 0 : index
      %c0_258 = arith.constant 0 : index
      %247 = vector.load %arg11[%c0_256, %c0_257, %c0_258] : memref<2x64x128xf32, #tpu.memory_space<vmem>>, vector<2x32x128xf32>
      tpu.vector_store %arg11[%c0_256, %c0_257, %c0_258], %246 {strides = array<i32>} : memref<2x64x128xf32, #tpu.memory_space<vmem>>, vector<2x32x128xf32>,
    } else {
    }
    %c0 = arith.constant 0 : index
    %c0_1 = arith.constant 0 : index
    %c0_2 = arith.constant 0 : index
    %3 = vector.load %arg10[%c0, %c0_1, %c0_2] : memref<2x32x128xf32, #tpu.memory_space<vmem>>, vector<2x32x128xf32>
    %c0_3 = arith.constant 0 : index
    %c0_4 = arith.constant 0 : index
    %c0_5 = arith.constant 0 : index
    %4 = vector.load %arg5[%c0_3, %c0_4, %c0_5] : memref<1x1x128xf32, #tpu.memory_space<vmem>>, vector<1x1x128xf32>
    %c0_6 = arith.constant 0 : index
    %c0_7 = arith.constant 0 : index
    %c0_8 = arith.constant 0 : index
    %5 = vector.load %arg6[%c0_6, %c0_7, %c0_8] : memref<1x1x128xf32, #tpu.memory_space<vmem>>, vector<1x1x128xf32>
    %cst = arith.constant dense<0.000000e+00> : vector<2x32xf32>
    %6 = vector.multi_reduction <add>, %3, %cst [2] : vector<2x32x128xf32> to vector<2x32xf32>
    %7 = vector.shape_cast %6 : vector<2x32xf32> to vector<2x32x1xf32>
    %cst_9 = arith.constant 1.280000e+02 : f32
    %8 = vector.broadcast %cst_9 : f32 to vector<2x32x1xf32>
    %9 = arith.divf %7, %8 : vector<2x32x1xf32>
    %10 = vector.broadcast %9 : vector<2x32x1xf32> to vector<2x32x128xf32>
    %11 = arith.subf %3, %10 : vector<2x32x128xf32>
    %12 = arith.mulf %11, %11 : vector<2x32x128xf32>
    %cst_10 = arith.constant dense<0.000000e+00> : vector<2x32xf32>
    %13 = vector.multi_reduction <add>, %12, %cst_10 [2] : vector<2x32x128xf32> to vector<2x32xf32>
    %14 = vector.shape_cast %13 : vector<2x32xf32> to vector<2x32x1xf32>
    %cst_11 = arith.constant 1.280000e+02 : f32
    %15 = vector.broadcast %cst_11 : f32 to vector<2x32x1xf32>
    %16 = arith.divf %14, %15 : vector<2x32x1xf32>
    %cst_12 = arith.constant 9.99999974E-6 : f32
    %17 = vector.broadcast %cst_12 : f32 to vector<2x32x1xf32>
    %18 = arith.addf %16, %17 : vector<2x32x1xf32>
    %19 = math.rsqrt %18 : vector<2x32x1xf32>
    %20 = vector.broadcast %19 : vector<2x32x1xf32> to vector<2x32x128xf32>
    %21 = arith.mulf %11, %20 : vector<2x32x128xf32>
    %22 = vector.broadcast %4 : vector<1x1x128xf32> to vector<2x32x128xf32>
    %23 = arith.mulf %21, %22 : vector<2x32x128xf32>
    %24 = vector.broadcast %5 : vector<1x1x128xf32> to vector<2x32x128xf32>
    %25 = arith.addf %23, %24 : vector<2x32x128xf32>
    %c0_13 = arith.constant 0 : index
    %c32 = arith.constant 32 : index
    %c0_14 = arith.constant 0 : index
    %26 = vector.load %arg11[%c0_13, %c32, %c0_14] : memref<2x64x128xf32, #tpu.memory_space<vmem>>, vector<2x32x128xf32>
    tpu.vector_store %arg11[%c0_13, %c32, %c0_14], %25 {strides = array<i32>} : memref<2x64x128xf32, #tpu.memory_space<vmem>>, vector<2x32x128xf32>,
    %c0_15 = arith.constant 0 : index
    %c0_16 = arith.constant 0 : index
    %c0_17 = arith.constant 0 : index
    %27 = vector.load %arg4[%c0_15, %c0_16, %c0_17] : memref<1x1x128xf32, #tpu.memory_space<vmem>>, vector<1x1x128xf32>
    %28 = vector.broadcast %27 : vector<1x1x128xf32> to vector<2x32x128xf32>
    %29 = arith.mulf %25, %28 : vector<2x32x128xf32>
    %c0_18 = arith.constant 0 : index
    %c0_19 = arith.constant 0 : index
    %c0_20 = arith.constant 0 : index
    %30 = vector.load %arg12[%c0_18, %c0_19, %c0_20] : memref<2x32x128xf32, #tpu.memory_space<vmem>>, vector<2x32x128xf32>
    tpu.vector_store %arg12[%c0_18, %c0_19, %c0_20], %29 {strides = array<i32>} : memref<2x32x128xf32, #tpu.memory_space<vmem>>, vector<2x32x128xf32>,
    %c0_21 = arith.constant 0 : index
    %c0_22 = arith.constant 0 : index
    %c0_23 = arith.constant 0 : index
    %31 = vector.load %arg3[%c0_21, %c0_22, %c0_23] : memref<1x32x128xf32, #tpu.memory_space<vmem>>, vector<1x1x128xf32>
    %c0_24 = arith.constant 0 : index
    %c32_25 = arith.constant 32 : index
    %c0_26 = arith.constant 0 : index
    %32 = vector.load %arg11[%c0_24, %c32_25, %c0_26] : memref<2x64x128xf32, #tpu.memory_space<vmem>>, vector<2x32x128xf32>
    %33 = vector.broadcast %31 : vector<1x1x128xf32> to vector<2x32x128xf32>
    %34 = arith.mulf %33, %32 : vector<2x32x128xf32>
    %c0_27 = arith.constant 0 : index
    %c1 = arith.constant 1 : index
    %c0_28 = arith.constant 0 : index
    %35 = vector.load %arg3[%c0_27, %c1, %c0_28] : memref<1x32x128xf32, #tpu.memory_space<vmem>>, vector<1x1x128xf32>
    %c0_29 = arith.constant 0 : index
    %c31 = arith.constant 31 : index
    %c0_30 = arith.constant 0 : index
    %36 = vector.load %arg11[%c0_29, %c31, %c0_30] : memref<2x64x128xf32, #tpu.memory_space<vmem>>, vector<2x32x128xf32>
    %37 = vector.broadcast %35 : vector<1x1x128xf32> to vector<2x32x128xf32>
    %38 = arith.mulf %37, %36 : vector<2x32x128xf32>
    %39 = arith.addf %34, %38 : vector<2x32x128xf32>
    %c0_31 = arith.constant 0 : index
    %c2 = arith.constant 2 : index
    %c0_32 = arith.constant 0 : index
    %40 = vector.load %arg3[%c0_31, %c2, %c0_32] : memref<1x32x128xf32, #tpu.memory_space<vmem>>, vector<1x1x128xf32>
    %c0_33 = arith.constant 0 : index
    %c30 = arith.constant 30 : index
    %c0_34 = arith.constant 0 : index
    %41 = vector.load %arg11[%c0_33, %c30, %c0_34] : memref<2x64x128xf32, #tpu.memory_space<vmem>>, vector<2x32x128xf32>
    %42 = vector.broadcast %40 : vector<1x1x128xf32> to vector<2x32x128xf32>
    %43 = arith.mulf %42, %41 : vector<2x32x128xf32>
    %44 = arith.addf %39, %43 : vector<2x32x128xf32>
    %c0_35 = arith.constant 0 : index
    %c3 = arith.constant 3 : index
    %c0_36 = arith.constant 0 : index
    %45 = vector.load %arg3[%c0_35, %c3, %c0_36] : memref<1x32x128xf32, #tpu.memory_space<vmem>>, vector<1x1x128xf32>
    %c0_37 = arith.constant 0 : index
    %c29 = arith.constant 29 : index
    %c0_38 = arith.constant 0 : index
    %46 = vector.load %arg11[%c0_37, %c29, %c0_38] : memref<2x64x128xf32, #tpu.memory_space<vmem>>, vector<2x32x128xf32>
    %47 = vector.broadcast %45 : vector<1x1x128xf32> to vector<2x32x128xf32>
    %48 = arith.mulf %47, %46 : vector<2x32x128xf32>
    %49 = arith.addf %44, %48 : vector<2x32x128xf32>
    %c0_39 = arith.constant 0 : index
    %c0_40 = arith.constant 0 : index
    %c0_41 = arith.constant 0 : index
    %50 = vector.load %arg12[%c0_39, %c0_40, %c0_41] : memref<2x32x128xf32, #tpu.memory_space<vmem>>, vector<2x32x128xf32>
    %51 = arith.addf %50, %49 : vector<2x32x128xf32>
    %c0_42 = arith.constant 0 : index
    %c0_43 = arith.constant 0 : index
    %c0_44 = arith.constant 0 : index
    %52 = vector.load %arg12[%c0_42, %c0_43, %c0_44] : memref<2x32x128xf32, #tpu.memory_space<vmem>>, vector<2x32x128xf32>
    tpu.vector_store %arg12[%c0_42, %c0_43, %c0_44], %51 {strides = array<i32>} : memref<2x32x128xf32, #tpu.memory_space<vmem>>, vector<2x32x128xf32>,
    %c0_45 = arith.constant 0 : index
    %c4 = arith.constant 4 : index
    %c0_46 = arith.constant 0 : index
    %53 = vector.load %arg3[%c0_45, %c4, %c0_46] : memref<1x32x128xf32, #tpu.memory_space<vmem>>, vector<1x1x128xf32>
    %c0_47 = arith.constant 0 : index
    %c28 = arith.constant 28 : index
    %c0_48 = arith.constant 0 : index
    %54 = vector.load %arg11[%c0_47, %c28, %c0_48] : memref<2x64x128xf32, #tpu.memory_space<vmem>>, vector<2x32x128xf32>
    %55 = vector.broadcast %53 : vector<1x1x128xf32> to vector<2x32x128xf32>
    %56 = arith.mulf %55, %54 : vector<2x32x128xf32>
    %c0_49 = arith.constant 0 : index
    %c5 = arith.constant 5 : index
    %c0_50 = arith.constant 0 : index
    %57 = vector.load %arg3[%c0_49, %c5, %c0_50] : memref<1x32x128xf32, #tpu.memory_space<vmem>>, vector<1x1x128xf32>
    %c0_51 = arith.constant 0 : index
    %c27 = arith.constant 27 : index
    %c0_52 = arith.constant 0 : index
    %58 = vector.load %arg11[%c0_51, %c27, %c0_52] : memref<2x64x128xf32, #tpu.memory_space<vmem>>, vector<2x32x128xf32>
    %59 = vector.broadcast %57 : vector<1x1x128xf32> to vector<2x32x128xf32>
    %60 = arith.mulf %59, %58 : vector<2x32x128xf32>
    %61 = arith.addf %56, %60 : vector<2x32x128xf32>
    %c0_53 = arith.constant 0 : index
    %c6 = arith.constant 6 : index
    %c0_54 = arith.constant 0 : index
    %62 = vector.load %arg3[%c0_53, %c6, %c0_54] : memref<1x32x128xf32, #tpu.memory_space<vmem>>, vector<1x1x128xf32>
    %c0_55 = arith.constant 0 : index
    %c26 = arith.constant 26 : index
    %c0_56 = arith.constant 0 : index
    %63 = vector.load %arg11[%c0_55, %c26, %c0_56] : memref<2x64x128xf32, #tpu.memory_space<vmem>>, vector<2x32x128xf32>
    %64 = vector.broadcast %62 : vector<1x1x128xf32> to vector<2x32x128xf32>
    %65 = arith.mulf %64, %63 : vector<2x32x128xf32>
    %66 = arith.addf %61, %65 : vector<2x32x128xf32>
    %c0_57 = arith.constant 0 : index
    %c7 = arith.constant 7 : index
    %c0_58 = arith.constant 0 : index
    %67 = vector.load %arg3[%c0_57, %c7, %c0_58] : memref<1x32x128xf32, #tpu.memory_space<vmem>>, vector<1x1x128xf32>
    %c0_59 = arith.constant 0 : index
    %c25 = arith.constant 25 : index
    %c0_60 = arith.constant 0 : index
    %68 = vector.load %arg11[%c0_59, %c25, %c0_60] : memref<2x64x128xf32, #tpu.memory_space<vmem>>, vector<2x32x128xf32>
    %69 = vector.broadcast %67 : vector<1x1x128xf32> to vector<2x32x128xf32>
    %70 = arith.mulf %69, %68 : vector<2x32x128xf32>
    %71 = arith.addf %66, %70 : vector<2x32x128xf32>
    %c0_61 = arith.constant 0 : index
    %c0_62 = arith.constant 0 : index
    %c0_63 = arith.constant 0 : index
    %72 = vector.load %arg12[%c0_61, %c0_62, %c0_63] : memref<2x32x128xf32, #tpu.memory_space<vmem>>, vector<2x32x128xf32>
    %73 = arith.addf %72, %71 : vector<2x32x128xf32>
    %c0_64 = arith.constant 0 : index
    %c0_65 = arith.constant 0 : index
    %c0_66 = arith.constant 0 : index
    %74 = vector.load %arg12[%c0_64, %c0_65, %c0_66] : memref<2x32x128xf32, #tpu.memory_space<vmem>>, vector<2x32x128xf32>
    tpu.vector_store %arg12[%c0_64, %c0_65, %c0_66], %73 {strides = array<i32>} : memref<2x32x128xf32, #tpu.memory_space<vmem>>, vector<2x32x128xf32>,
    %c0_67 = arith.constant 0 : index
    %c8 = arith.constant 8 : index
    %c0_68 = arith.constant 0 : index
    %75 = vector.load %arg3[%c0_67, %c8, %c0_68] : memref<1x32x128xf32, #tpu.memory_space<vmem>>, vector<1x1x128xf32>
    %c0_69 = arith.constant 0 : index
    %c24 = arith.constant 24 : index
    %c0_70 = arith.constant 0 : index
    %76 = vector.load %arg11[%c0_69, %c24, %c0_70] : memref<2x64x128xf32, #tpu.memory_space<vmem>>, vector<2x32x128xf32>
    %77 = vector.broadcast %75 : vector<1x1x128xf32> to vector<2x32x128xf32>
    %78 = arith.mulf %77, %76 : vector<2x32x128xf32>
    %c0_71 = arith.constant 0 : index
    %c9 = arith.constant 9 : index
    %c0_72 = arith.constant 0 : index
    %79 = vector.load %arg3[%c0_71, %c9, %c0_72] : memref<1x32x128xf32, #tpu.memory_space<vmem>>, vector<1x1x128xf32>
    %c0_73 = arith.constant 0 : index
    %c23 = arith.constant 23 : index
    %c0_74 = arith.constant 0 : index
    %80 = vector.load %arg11[%c0_73, %c23, %c0_74] : memref<2x64x128xf32, #tpu.memory_space<vmem>>, vector<2x32x128xf32>
    %81 = vector.broadcast %79 : vector<1x1x128xf32> to vector<2x32x128xf32>
    %82 = arith.mulf %81, %80 : vector<2x32x128xf32>
    %83 = arith.addf %78, %82 : vector<2x32x128xf32>
    %c0_75 = arith.constant 0 : index
    %c10 = arith.constant 10 : index
    %c0_76 = arith.constant 0 : index
    %84 = vector.load %arg3[%c0_75, %c10, %c0_76] : memref<1x32x128xf32, #tpu.memory_space<vmem>>, vector<1x1x128xf32>
    %c0_77 = arith.constant 0 : index
    %c22 = arith.constant 22 : index
    %c0_78 = arith.constant 0 : index
    %85 = vector.load %arg11[%c0_77, %c22, %c0_78] : memref<2x64x128xf32, #tpu.memory_space<vmem>>, vector<2x32x128xf32>
    %86 = vector.broadcast %84 : vector<1x1x128xf32> to vector<2x32x128xf32>
    %87 = arith.mulf %86, %85 : vector<2x32x128xf32>
    %88 = arith.addf %83, %87 : vector<2x32x128xf32>
    %c0_79 = arith.constant 0 : index
    %c11 = arith.constant 11 : index
    %c0_80 = arith.constant 0 : index
    %89 = vector.load %arg3[%c0_79, %c11, %c0_80] : memref<1x32x128xf32, #tpu.memory_space<vmem>>, vector<1x1x128xf32>
    %c0_81 = arith.constant 0 : index
    %c21 = arith.constant 21 : index
    %c0_82 = arith.constant 0 : index
    %90 = vector.load %arg11[%c0_81, %c21, %c0_82] : memref<2x64x128xf32, #tpu.memory_space<vmem>>, vector<2x32x128xf32>
    %91 = vector.broadcast %89 : vector<1x1x128xf32> to vector<2x32x128xf32>
    %92 = arith.mulf %91, %90 : vector<2x32x128xf32>
    %93 = arith.addf %88, %92 : vector<2x32x128xf32>
    %c0_83 = arith.constant 0 : index
    %c0_84 = arith.constant 0 : index
    %c0_85 = arith.constant 0 : index
    %94 = vector.load %arg12[%c0_83, %c0_84, %c0_85] : memref<2x32x128xf32, #tpu.memory_space<vmem>>, vector<2x32x128xf32>
    %95 = arith.addf %94, %93 : vector<2x32x128xf32>
    %c0_86 = arith.constant 0 : index
    %c0_87 = arith.constant 0 : index
    %c0_88 = arith.constant 0 : index
    %96 = vector.load %arg12[%c0_86, %c0_87, %c0_88] : memref<2x32x128xf32, #tpu.memory_space<vmem>>, vector<2x32x128xf32>
    tpu.vector_store %arg12[%c0_86, %c0_87, %c0_88], %95 {strides = array<i32>} : memref<2x32x128xf32, #tpu.memory_space<vmem>>, vector<2x32x128xf32>,
    %c0_89 = arith.constant 0 : index
    %c12 = arith.constant 12 : index
    %c0_90 = arith.constant 0 : index
    %97 = vector.load %arg3[%c0_89, %c12, %c0_90] : memref<1x32x128xf32, #tpu.memory_space<vmem>>, vector<1x1x128xf32>
    %c0_91 = arith.constant 0 : index
    %c20 = arith.constant 20 : index
    %c0_92 = arith.constant 0 : index
    %98 = vector.load %arg11[%c0_91, %c20, %c0_92] : memref<2x64x128xf32, #tpu.memory_space<vmem>>, vector<2x32x128xf32>
    %99 = vector.broadcast %97 : vector<1x1x128xf32> to vector<2x32x128xf32>
    %100 = arith.mulf %99, %98 : vector<2x32x128xf32>
    %c0_93 = arith.constant 0 : index
    %c13 = arith.constant 13 : index
    %c0_94 = arith.constant 0 : index
    %101 = vector.load %arg3[%c0_93, %c13, %c0_94] : memref<1x32x128xf32, #tpu.memory_space<vmem>>, vector<1x1x128xf32>
    %c0_95 = arith.constant 0 : index
    %c19 = arith.constant 19 : index
    %c0_96 = arith.constant 0 : index
    %102 = vector.load %arg11[%c0_95, %c19, %c0_96] : memref<2x64x128xf32, #tpu.memory_space<vmem>>, vector<2x32x128xf32>
    %103 = vector.broadcast %101 : vector<1x1x128xf32> to vector<2x32x128xf32>
    %104 = arith.mulf %103, %102 : vector<2x32x128xf32>
    %105 = arith.addf %100, %104 : vector<2x32x128xf32>
    %c0_97 = arith.constant 0 : index
    %c14 = arith.constant 14 : index
    %c0_98 = arith.constant 0 : index
    %106 = vector.load %arg3[%c0_97, %c14, %c0_98] : memref<1x32x128xf32, #tpu.memory_space<vmem>>, vector<1x1x128xf32>
    %c0_99 = arith.constant 0 : index
    %c18 = arith.constant 18 : index
    %c0_100 = arith.constant 0 : index
    %107 = vector.load %arg11[%c0_99, %c18, %c0_100] : memref<2x64x128xf32, #tpu.memory_space<vmem>>, vector<2x32x128xf32>
    %108 = vector.broadcast %106 : vector<1x1x128xf32> to vector<2x32x128xf32>
    %109 = arith.mulf %108, %107 : vector<2x32x128xf32>
    %110 = arith.addf %105, %109 : vector<2x32x128xf32>
    %c0_101 = arith.constant 0 : index
    %c15 = arith.constant 15 : index
    %c0_102 = arith.constant 0 : index
    %111 = vector.load %arg3[%c0_101, %c15, %c0_102] : memref<1x32x128xf32, #tpu.memory_space<vmem>>, vector<1x1x128xf32>
    %c0_103 = arith.constant 0 : index
    %c17 = arith.constant 17 : index
    %c0_104 = arith.constant 0 : index
    %112 = vector.load %arg11[%c0_103, %c17, %c0_104] : memref<2x64x128xf32, #tpu.memory_space<vmem>>, vector<2x32x128xf32>
    %113 = vector.broadcast %111 : vector<1x1x128xf32> to vector<2x32x128xf32>
    %114 = arith.mulf %113, %112 : vector<2x32x128xf32>
    %115 = arith.addf %110, %114 : vector<2x32x128xf32>
    %c0_105 = arith.constant 0 : index
    %c0_106 = arith.constant 0 : index
    %c0_107 = arith.constant 0 : index
    %116 = vector.load %arg12[%c0_105, %c0_106, %c0_107] : memref<2x32x128xf32, #tpu.memory_space<vmem>>, vector<2x32x128xf32>
    %117 = arith.addf %116, %115 : vector<2x32x128xf32>
    %c0_108 = arith.constant 0 : index
    %c0_109 = arith.constant 0 : index
    %c0_110 = arith.constant 0 : index
    %118 = vector.load %arg12[%c0_108, %c0_109, %c0_110] : memref<2x32x128xf32, #tpu.memory_space<vmem>>, vector<2x32x128xf32>
    tpu.vector_store %arg12[%c0_108, %c0_109, %c0_110], %117 {strides = array<i32>} : memref<2x32x128xf32, #tpu.memory_space<vmem>>, vector<2x32x128xf32>,
    %c0_111 = arith.constant 0 : index
    %c16 = arith.constant 16 : index
    %c0_112 = arith.constant 0 : index
    %119 = vector.load %arg3[%c0_111, %c16, %c0_112] : memref<1x32x128xf32, #tpu.memory_space<vmem>>, vector<1x1x128xf32>
    %c0_113 = arith.constant 0 : index
    %c16_114 = arith.constant 16 : index
    %c0_115 = arith.constant 0 : index
    %120 = vector.load %arg11[%c0_113, %c16_114, %c0_115] : memref<2x64x128xf32, #tpu.memory_space<vmem>>, vector<2x32x128xf32>
    %121 = vector.broadcast %119 : vector<1x1x128xf32> to vector<2x32x128xf32>
    %122 = arith.mulf %121, %120 : vector<2x32x128xf32>
    %c0_116 = arith.constant 0 : index
    %c17_117 = arith.constant 17 : index
    %c0_118 = arith.constant 0 : index
    %123 = vector.load %arg3[%c0_116, %c17_117, %c0_118] : memref<1x32x128xf32, #tpu.memory_space<vmem>>, vector<1x1x128xf32>
    %c0_119 = arith.constant 0 : index
    %c15_120 = arith.constant 15 : index
    %c0_121 = arith.constant 0 : index
    %124 = vector.load %arg11[%c0_119, %c15_120, %c0_121] : memref<2x64x128xf32, #tpu.memory_space<vmem>>, vector<2x32x128xf32>
    %125 = vector.broadcast %123 : vector<1x1x128xf32> to vector<2x32x128xf32>
    %126 = arith.mulf %125, %124 : vector<2x32x128xf32>
    %127 = arith.addf %122, %126 : vector<2x32x128xf32>
    %c0_122 = arith.constant 0 : index
    %c18_123 = arith.constant 18 : index
    %c0_124 = arith.constant 0 : index
    %128 = vector.load %arg3[%c0_122, %c18_123, %c0_124] : memref<1x32x128xf32, #tpu.memory_space<vmem>>, vector<1x1x128xf32>
    %c0_125 = arith.constant 0 : index
    %c14_126 = arith.constant 14 : index
    %c0_127 = arith.constant 0 : index
    %129 = vector.load %arg11[%c0_125, %c14_126, %c0_127] : memref<2x64x128xf32, #tpu.memory_space<vmem>>, vector<2x32x128xf32>
    %130 = vector.broadcast %128 : vector<1x1x128xf32> to vector<2x32x128xf32>
    %131 = arith.mulf %130, %129 : vector<2x32x128xf32>
    %132 = arith.addf %127, %131 : vector<2x32x128xf32>
    %c0_128 = arith.constant 0 : index
    %c19_129 = arith.constant 19 : index
    %c0_130 = arith.constant 0 : index
    %133 = vector.load %arg3[%c0_128, %c19_129, %c0_130] : memref<1x32x128xf32, #tpu.memory_space<vmem>>, vector<1x1x128xf32>
    %c0_131 = arith.constant 0 : index
    %c13_132 = arith.constant 13 : index
    %c0_133 = arith.constant 0 : index
    %134 = vector.load %arg11[%c0_131, %c13_132, %c0_133] : memref<2x64x128xf32, #tpu.memory_space<vmem>>, vector<2x32x128xf32>
    %135 = vector.broadcast %133 : vector<1x1x128xf32> to vector<2x32x128xf32>
    %136 = arith.mulf %135, %134 : vector<2x32x128xf32>
    %137 = arith.addf %132, %136 : vector<2x32x128xf32>
    %c0_134 = arith.constant 0 : index
    %c0_135 = arith.constant 0 : index
    %c0_136 = arith.constant 0 : index
    %138 = vector.load %arg12[%c0_134, %c0_135, %c0_136] : memref<2x32x128xf32, #tpu.memory_space<vmem>>, vector<2x32x128xf32>
    %139 = arith.addf %138, %137 : vector<2x32x128xf32>
    %c0_137 = arith.constant 0 : index
    %c0_138 = arith.constant 0 : index
    %c0_139 = arith.constant 0 : index
    %140 = vector.load %arg12[%c0_137, %c0_138, %c0_139] : memref<2x32x128xf32, #tpu.memory_space<vmem>>, vector<2x32x128xf32>
    tpu.vector_store %arg12[%c0_137, %c0_138, %c0_139], %139 {strides = array<i32>} : memref<2x32x128xf32, #tpu.memory_space<vmem>>, vector<2x32x128xf32>,
    %c0_140 = arith.constant 0 : index
    %c20_141 = arith.constant 20 : index
    %c0_142 = arith.constant 0 : index
    %141 = vector.load %arg3[%c0_140, %c20_141, %c0_142] : memref<1x32x128xf32, #tpu.memory_space<vmem>>, vector<1x1x128xf32>
    %c0_143 = arith.constant 0 : index
    %c12_144 = arith.constant 12 : index
    %c0_145 = arith.constant 0 : index
    %142 = vector.load %arg11[%c0_143, %c12_144, %c0_145] : memref<2x64x128xf32, #tpu.memory_space<vmem>>, vector<2x32x128xf32>
    %143 = vector.broadcast %141 : vector<1x1x128xf32> to vector<2x32x128xf32>
    %144 = arith.mulf %143, %142 : vector<2x32x128xf32>
    %c0_146 = arith.constant 0 : index
    %c21_147 = arith.constant 21 : index
    %c0_148 = arith.constant 0 : index
    %145 = vector.load %arg3[%c0_146, %c21_147, %c0_148] : memref<1x32x128xf32, #tpu.memory_space<vmem>>, vector<1x1x128xf32>
    %c0_149 = arith.constant 0 : index
    %c11_150 = arith.constant 11 : index
    %c0_151 = arith.constant 0 : index
    %146 = vector.load %arg11[%c0_149, %c11_150, %c0_151] : memref<2x64x128xf32, #tpu.memory_space<vmem>>, vector<2x32x128xf32>
    %147 = vector.broadcast %145 : vector<1x1x128xf32> to vector<2x32x128xf32>
    %148 = arith.mulf %147, %146 : vector<2x32x128xf32>
    %149 = arith.addf %144, %148 : vector<2x32x128xf32>
    %c0_152 = arith.constant 0 : index
    %c22_153 = arith.constant 22 : index
    %c0_154 = arith.constant 0 : index
    %150 = vector.load %arg3[%c0_152, %c22_153, %c0_154] : memref<1x32x128xf32, #tpu.memory_space<vmem>>, vector<1x1x128xf32>
    %c0_155 = arith.constant 0 : index
    %c10_156 = arith.constant 10 : index
    %c0_157 = arith.constant 0 : index
    %151 = vector.load %arg11[%c0_155, %c10_156, %c0_157] : memref<2x64x128xf32, #tpu.memory_space<vmem>>, vector<2x32x128xf32>
    %152 = vector.broadcast %150 : vector<1x1x128xf32> to vector<2x32x128xf32>
    %153 = arith.mulf %152, %151 : vector<2x32x128xf32>
    %154 = arith.addf %149, %153 : vector<2x32x128xf32>
    %c0_158 = arith.constant 0 : index
    %c23_159 = arith.constant 23 : index
    %c0_160 = arith.constant 0 : index
    %155 = vector.load %arg3[%c0_158, %c23_159, %c0_160] : memref<1x32x128xf32, #tpu.memory_space<vmem>>, vector<1x1x128xf32>
    %c0_161 = arith.constant 0 : index
    %c9_162 = arith.constant 9 : index
    %c0_163 = arith.constant 0 : index
    %156 = vector.load %arg11[%c0_161, %c9_162, %c0_163] : memref<2x64x128xf32, #tpu.memory_space<vmem>>, vector<2x32x128xf32>
    %157 = vector.broadcast %155 : vector<1x1x128xf32> to vector<2x32x128xf32>
    %158 = arith.mulf %157, %156 : vector<2x32x128xf32>
    %159 = arith.addf %154, %158 : vector<2x32x128xf32>
    %c0_164 = arith.constant 0 : index
    %c0_165 = arith.constant 0 : index
    %c0_166 = arith.constant 0 : index
    %160 = vector.load %arg12[%c0_164, %c0_165, %c0_166] : memref<2x32x128xf32, #tpu.memory_space<vmem>>, vector<2x32x128xf32>
    %161 = arith.addf %160, %159 : vector<2x32x128xf32>
    %c0_167 = arith.constant 0 : index
    %c0_168 = arith.constant 0 : index
    %c0_169 = arith.constant 0 : index
    %162 = vector.load %arg12[%c0_167, %c0_168, %c0_169] : memref<2x32x128xf32, #tpu.memory_space<vmem>>, vector<2x32x128xf32>
    tpu.vector_store %arg12[%c0_167, %c0_168, %c0_169], %161 {strides = array<i32>} : memref<2x32x128xf32, #tpu.memory_space<vmem>>, vector<2x32x128xf32>,
    %c0_170 = arith.constant 0 : index
    %c24_171 = arith.constant 24 : index
    %c0_172 = arith.constant 0 : index
    %163 = vector.load %arg3[%c0_170, %c24_171, %c0_172] : memref<1x32x128xf32, #tpu.memory_space<vmem>>, vector<1x1x128xf32>
    %c0_173 = arith.constant 0 : index
    %c8_174 = arith.constant 8 : index
    %c0_175 = arith.constant 0 : index
    %164 = vector.load %arg11[%c0_173, %c8_174, %c0_175] : memref<2x64x128xf32, #tpu.memory_space<vmem>>, vector<2x32x128xf32>
    %165 = vector.broadcast %163 : vector<1x1x128xf32> to vector<2x32x128xf32>
    %166 = arith.mulf %165, %164 : vector<2x32x128xf32>
    %c0_176 = arith.constant 0 : index
    %c25_177 = arith.constant 25 : index
    %c0_178 = arith.constant 0 : index
    %167 = vector.load %arg3[%c0_176, %c25_177, %c0_178] : memref<1x32x128xf32, #tpu.memory_space<vmem>>, vector<1x1x128xf32>
    %c0_179 = arith.constant 0 : index
    %c7_180 = arith.constant 7 : index
    %c0_181 = arith.constant 0 : index
    %168 = vector.load %arg11[%c0_179, %c7_180, %c0_181] : memref<2x64x128xf32, #tpu.memory_space<vmem>>, vector<2x32x128xf32>
    %169 = vector.broadcast %167 : vector<1x1x128xf32> to vector<2x32x128xf32>
    %170 = arith.mulf %169, %168 : vector<2x32x128xf32>
    %171 = arith.addf %166, %170 : vector<2x32x128xf32>
    %c0_182 = arith.constant 0 : index
    %c26_183 = arith.constant 26 : index
    %c0_184 = arith.constant 0 : index
    %172 = vector.load %arg3[%c0_182, %c26_183, %c0_184] : memref<1x32x128xf32, #tpu.memory_space<vmem>>, vector<1x1x128xf32>
    %c0_185 = arith.constant 0 : index
    %c6_186 = arith.constant 6 : index
    %c0_187 = arith.constant 0 : index
    %173 = vector.load %arg11[%c0_185, %c6_186, %c0_187] : memref<2x64x128xf32, #tpu.memory_space<vmem>>, vector<2x32x128xf32>
    %174 = vector.broadcast %172 : vector<1x1x128xf32> to vector<2x32x128xf32>
    %175 = arith.mulf %174, %173 : vector<2x32x128xf32>
    %176 = arith.addf %171, %175 : vector<2x32x128xf32>
    %c0_188 = arith.constant 0 : index
    %c27_189 = arith.constant 27 : index
    %c0_190 = arith.constant 0 : index
    %177 = vector.load %arg3[%c0_188, %c27_189, %c0_190] : memref<1x32x128xf32, #tpu.memory_space<vmem>>, vector<1x1x128xf32>
    %c0_191 = arith.constant 0 : index
    %c5_192 = arith.constant 5 : index
    %c0_193 = arith.constant 0 : index
    %178 = vector.load %arg11[%c0_191, %c5_192, %c0_193] : memref<2x64x128xf32, #tpu.memory_space<vmem>>, vector<2x32x128xf32>
    %179 = vector.broadcast %177 : vector<1x1x128xf32> to vector<2x32x128xf32>
    %180 = arith.mulf %179, %178 : vector<2x32x128xf32>
    %181 = arith.addf %176, %180 : vector<2x32x128xf32>
    %c0_194 = arith.constant 0 : index
    %c0_195 = arith.constant 0 : index
    %c0_196 = arith.constant 0 : index
    %182 = vector.load %arg12[%c0_194, %c0_195, %c0_196] : memref<2x32x128xf32, #tpu.memory_space<vmem>>, vector<2x32x128xf32>
    %183 = arith.addf %182, %181 : vector<2x32x128xf32>
    %c0_197 = arith.constant 0 : index
    %c0_198 = arith.constant 0 : index
    %c0_199 = arith.constant 0 : index
    %184 = vector.load %arg12[%c0_197, %c0_198, %c0_199] : memref<2x32x128xf32, #tpu.memory_space<vmem>>, vector<2x32x128xf32>
    tpu.vector_store %arg12[%c0_197, %c0_198, %c0_199], %183 {strides = array<i32>} : memref<2x32x128xf32, #tpu.memory_space<vmem>>, vector<2x32x128xf32>,
    %c0_200 = arith.constant 0 : index
    %c28_201 = arith.constant 28 : index
    %c0_202 = arith.constant 0 : index
    %185 = vector.load %arg3[%c0_200, %c28_201, %c0_202] : memref<1x32x128xf32, #tpu.memory_space<vmem>>, vector<1x1x128xf32>
    %c0_203 = arith.constant 0 : index
    %c4_204 = arith.constant 4 : index
    %c0_205 = arith.constant 0 : index
    %186 = vector.load %arg11[%c0_203, %c4_204, %c0_205] : memref<2x64x128xf32, #tpu.memory_space<vmem>>, vector<2x32x128xf32>
    %187 = vector.broadcast %185 : vector<1x1x128xf32> to vector<2x32x128xf32>
    %188 = arith.mulf %187, %186 : vector<2x32x128xf32>
    %c0_206 = arith.constant 0 : index
    %c29_207 = arith.constant 29 : index
    %c0_208 = arith.constant 0 : index
    %189 = vector.load %arg3[%c0_206, %c29_207, %c0_208] : memref<1x32x128xf32, #tpu.memory_space<vmem>>, vector<1x1x128xf32>
    %c0_209 = arith.constant 0 : index
    %c3_210 = arith.constant 3 : index
    %c0_211 = arith.constant 0 : index
    %190 = vector.load %arg11[%c0_209, %c3_210, %c0_211] : memref<2x64x128xf32, #tpu.memory_space<vmem>>, vector<2x32x128xf32>
    %191 = vector.broadcast %189 : vector<1x1x128xf32> to vector<2x32x128xf32>
    %192 = arith.mulf %191, %190 : vector<2x32x128xf32>
    %193 = arith.addf %188, %192 : vector<2x32x128xf32>
    %c0_212 = arith.constant 0 : index
    %c30_213 = arith.constant 30 : index
    %c0_214 = arith.constant 0 : index
    %194 = vector.load %arg3[%c0_212, %c30_213, %c0_214] : memref<1x32x128xf32, #tpu.memory_space<vmem>>, vector<1x1x128xf32>
    %c0_215 = arith.constant 0 : index
    %c2_216 = arith.constant 2 : index
    %c0_217 = arith.constant 0 : index
    %195 = vector.load %arg11[%c0_215, %c2_216, %c0_217] : memref<2x64x128xf32, #tpu.memory_space<vmem>>, vector<2x32x128xf32>
    %196 = vector.broadcast %194 : vector<1x1x128xf32> to vector<2x32x128xf32>
    %197 = arith.mulf %196, %195 : vector<2x32x128xf32>
    %198 = arith.addf %193, %197 : vector<2x32x128xf32>
    %c0_218 = arith.constant 0 : index
    %c31_219 = arith.constant 31 : index
    %c0_220 = arith.constant 0 : index
    %199 = vector.load %arg3[%c0_218, %c31_219, %c0_220] : memref<1x32x128xf32, #tpu.memory_space<vmem>>, vector<1x1x128xf32>
    %c0_221 = arith.constant 0 : index
    %c1_222 = arith.constant 1 : index
    %c0_223 = arith.constant 0 : index
    %200 = vector.load %arg11[%c0_221, %c1_222, %c0_223] : memref<2x64x128xf32, #tpu.memory_space<vmem>>, vector<2x32x128xf32>
    %201 = vector.broadcast %199 : vector<1x1x128xf32> to vector<2x32x128xf32>
    %202 = arith.mulf %201, %200 : vector<2x32x128xf32>
    %203 = arith.addf %198, %202 : vector<2x32x128xf32>
    %c0_224 = arith.constant 0 : index
    %c0_225 = arith.constant 0 : index
    %c0_226 = arith.constant 0 : index
    %204 = vector.load %arg12[%c0_224, %c0_225, %c0_226] : memref<2x32x128xf32, #tpu.memory_space<vmem>>, vector<2x32x128xf32>
    %205 = arith.addf %204, %203 : vector<2x32x128xf32>
    %c0_227 = arith.constant 0 : index
    %c0_228 = arith.constant 0 : index
    %c0_229 = arith.constant 0 : index
    %206 = vector.load %arg12[%c0_227, %c0_228, %c0_229] : memref<2x32x128xf32, #tpu.memory_space<vmem>>, vector<2x32x128xf32>
    tpu.vector_store %arg12[%c0_227, %c0_228, %c0_229], %205 {strides = array<i32>} : memref<2x32x128xf32, #tpu.memory_space<vmem>>, vector<2x32x128xf32>,
    %c0_230 = arith.constant 0 : index
    %c0_231 = arith.constant 0 : index
    %c0_232 = arith.constant 0 : index
    %207 = vector.load %arg12[%c0_230, %c0_231, %c0_232] : memref<2x32x128xf32, #tpu.memory_space<vmem>>, vector<2x32x128xf32>
    %cst_233 = arith.constant 5.000000e-01 : f32
    %208 = vector.broadcast %cst_233 : f32 to vector<2x32x128xf32>
    %209 = arith.mulf %208, %207 : vector<2x32x128xf32>
    %cst_234 = arith.constant 4.471500e-02 : f32
    %210 = vector.broadcast %cst_234 : f32 to vector<2x32x128xf32>
    %211 = arith.mulf %210, %207 : vector<2x32x128xf32>
    %212 = arith.mulf %211, %207 : vector<2x32x128xf32>
    %213 = arith.mulf %212, %207 : vector<2x32x128xf32>
    %214 = arith.addf %207, %213 : vector<2x32x128xf32>
    %cst_235 = arith.constant 0.797884583 : f32
    %215 = vector.broadcast %cst_235 : f32 to vector<2x32x128xf32>
    %216 = arith.mulf %215, %214 : vector<2x32x128xf32>
    %217 = math.tanh %216 : vector<2x32x128xf32>
    %cst_236 = arith.constant 1.000000e+00 : f32
    %218 = vector.broadcast %cst_236 : f32 to vector<2x32x128xf32>
    %219 = arith.addf %218, %217 : vector<2x32x128xf32>
    %220 = arith.mulf %209, %219 : vector<2x32x128xf32>
    %221 = vector.shape_cast %220 : vector<2x32x128xf32> to vector<64x128xf32>
    %222 = arith.truncf %221 : vector<64x128xf32> to vector<64x128xbf16>
    %c0_237 = arith.constant 0 : index
    %c0_238 = arith.constant 0 : index
    %c0_239 = arith.constant 0 : index
    %223 = vector.load %arg7[%c0_237, %c0_238, %c0_239] : memref<1x128x256xbf16, #tpu.memory_space<vmem>>, vector<1x128x256xbf16>
    %224 = vector.shape_cast %223 : vector<1x128x256xbf16> to vector<128x256xbf16>
    %cst_240 = arith.constant dense<0.000000e+00> : vector<64x256xf32>
    %225 = tpu.matmul %222, %224, %cst_240 {dimension_numbers = #tpu.dot_dimension_numbers<[1], [0], [0], [1], [0, 0, 1, 1], [], []>} : vector<64x128xbf16>, vector<128x256xbf16>, vector<64x256xf32> -> vector<64x256xf32>
    %c0_241 = arith.constant 0 : index
    %c0_242 = arith.constant 0 : index
    %c0_243 = arith.constant 0 : index
    %226 = vector.load %arg8[%c0_241, %c0_242, %c0_243] : memref<1x1x256xf32, #tpu.memory_space<vmem>>, vector<1x1x256xf32>
    %227 = vector.shape_cast %226 : vector<1x1x256xf32> to vector<1x256xf32>
    %228 = vector.broadcast %227 : vector<1x256xf32> to vector<64x256xf32>
    %229 = arith.addf %225, %228 : vector<64x256xf32>
    %230 = vector.extract_strided_slice %229 {offsets = [0, 0], sizes = [64, 128], strides = [1, 1]} : vector<64x256xf32> to vector<64x128xf32>
    %231 = vector.extract_strided_slice %229 {offsets = [0, 128], sizes = [64, 128], strides = [1, 1]} : vector<64x256xf32> to vector<64x128xf32>
    %232 = arith.negf %231 : vector<64x128xf32>
    %233 = math.exp %232 : vector<64x128xf32>
    %cst_244 = arith.constant 1.000000e+00 : f32
    %234 = vector.broadcast %cst_244 : f32 to vector<64x128xf32>
    %235 = arith.addf %234, %233 : vector<64x128xf32>
    %236 = arith.divf %234, %235 : vector<64x128xf32>
    %237 = arith.mulf %230, %236 : vector<64x128xf32>
    %238 = vector.shape_cast %237 : vector<64x128xf32> to vector<2x32x128xf32>
    %239 = arith.addf %238, %3 : vector<2x32x128xf32>
    %c0_245 = arith.constant 0 : index
    %c0_246 = arith.constant 0 : index
    %c0_247 = arith.constant 0 : index
    %240 = vector.load %arg10[%c0_245, %c0_246, %c0_247] : memref<2x32x128xf32, #tpu.memory_space<vmem>>, vector<2x32x128xf32>
    tpu.vector_store %arg10[%c0_245, %c0_246, %c0_247], %239 {strides = array<i32>} : memref<2x32x128xf32, #tpu.memory_space<vmem>>, vector<2x32x128xf32>,
    %c1_i32 = arith.constant 1 : i32
    %241 = arith.cmpi eq, %arg1, %c1_i32 : i32
    %242 = arith.extui %241 : i1 to i32
    %c0_i32_248 = arith.constant 0 : i32
    %243 = arith.cmpi ne, %242, %c0_i32_248 : i32
    scf.if %243 {
      %c0_249 = arith.constant 0 : index
      %c0_250 = arith.constant 0 : index
      %c0_251 = arith.constant 0 : index
      %244 = vector.load %arg9[%c0_249, %c0_250, %c0_251] : memref<2x32x128xf32, #tpu.memory_space<vmem>>, vector<2x32x128xf32>
      tpu.vector_store %arg9[%c0_249, %c0_250, %c0_251], %239 {strides = array<i32>} : memref<2x32x128xf32, #tpu.memory_space<vmem>>, vector<2x32x128xf32>,
    } else {
    }
    return
  }
  func.func @transform_0(%arg0: i32, %arg1: i32) -> (i32, i32, i32) {
    %c0_i32 = arith.constant 0 : i32
    %c0_i32_0 = arith.constant 0 : i32
    %c0_i32_1 = arith.constant 0 : i32
    return %arg0, %c0_i32, %c0_i32_0 : i32, i32, i32
  }
  func.func @transform_1(%arg0: i32, %arg1: i32) -> (i32, i32, i32) {
    %c0_i32 = arith.constant 0 : i32
    %c0_i32_0 = arith.constant 0 : i32
    %c0_i32_1 = arith.constant 0 : i32
    return %arg1, %c0_i32, %c0_i32_0 : i32, i32, i32
  }
  func.func @transform_2(%arg0: i32, %arg1: i32) -> (i32, i32, i32) {
    %c0_i32 = arith.constant 0 : i32
    %c0_i32_0 = arith.constant 0 : i32
    %c0_i32_1 = arith.constant 0 : i32
    return %arg1, %c0_i32, %c0_i32_0 : i32, i32, i32
  }
  func.func @transform_3(%arg0: i32, %arg1: i32) -> (i32, i32, i32) {
    %c0_i32 = arith.constant 0 : i32
    %c0_i32_0 = arith.constant 0 : i32
    %c0_i32_1 = arith.constant 0 : i32
    return %arg1, %c0_i32, %c0_i32_0 : i32, i32, i32
  }
  func.func @transform_4(%arg0: i32, %arg1: i32) -> (i32, i32, i32) {
    %c0_i32 = arith.constant 0 : i32
    %c0_i32_0 = arith.constant 0 : i32
    %c0_i32_1 = arith.constant 0 : i32
    return %arg1, %c0_i32, %c0_i32_0 : i32, i32, i32
  }
  func.func @transform_5(%arg0: i32, %arg1: i32) -> (i32, i32, i32) {
    %c0_i32 = arith.constant 0 : i32
    %c0_i32_0 = arith.constant 0 : i32
    %c0_i32_1 = arith.constant 0 : i32
    return %arg1, %c0_i32, %c0_i32_0 : i32, i32, i32
  }
  func.func @transform_6(%arg0: i32, %arg1: i32) -> (i32, i32, i32) {
    %c0_i32 = arith.constant 0 : i32
    %c0_i32_0 = arith.constant 0 : i32
    %c0_i32_1 = arith.constant 0 : i32
    return %arg1, %c0_i32, %c0_i32_0 : i32, i32, i32
  }
  func.func @transform_7(%arg0: i32, %arg1: i32) -> (i32, i32, i32) {
    %c0_i32 = arith.constant 0 : i32
    %c0_i32_0 = arith.constant 0 : i32
    %c0_i32_1 = arith.constant 0 : i32
    return %arg0, %c0_i32, %c0_i32_0 : i32, i32, i32
  }
}

</mosaic_0001>

<bundles_post_ra>
// kernel: s4net_forward.1
= control target key start
LH: loop header
LB: loop body
LE: loop exit
PB: predicated region body
PF: predicated region fallthrough
CT: control target
= control target key end

     0   :  { %s4397_s0 = inlined_call_operand.hbm [shape: f32[8,32,128], index: 0, kind: input, shape index: {}]   ;;  %s4398_s1 = inlined_call_operand.hbm [shape: f32[2,32,128], index: 1, kind: input, shape index: {}]   ;;  %s4399_s2 = inlined_call_operand.vmem [shape: f32[2,1,128], index: 2, kind: input, shape index: {}]   ;;  %s4400_s3 = inlined_call_operand.vmem [shape: f32[2,1,128], index: 3, kind: input, shape index: {}]   ;;  %s4401_s4 = inlined_call_operand.hbm [shape: f32[2,1,128], index: 4, kind: input, shape index: {}]   ;;  %s4402_s5 = inlined_call_operand.hbm [shape: bf16[2,128,256], index: 5, kind: input, shape index: {}]   ;;  %s4403_s6 = inlined_call_operand.hbm [shape: f32[2,1,256], index: 6, kind: input, shape index: {}]   ;;  %s4404_s7 = inlined_call_operand.hbm [shape: f32[8,32,128], index: 7, kind: output, shape index: {}]  }
   0x1   :  { %4452 = sst [smem:[#allocation52_spill]] %s4397_s0 }
   0x2   :  { %4453 = sst [smem:[#allocation53_spill]] %s4398_s1 }
   0x3   :  { %4454 = sst [smem:[#allocation54_spill]] %s4399_s2 }
   0x4   :  { %4455 = sst [smem:[#allocation55_spill]] %s4400_s3 }
   0x5   :  { %4456 = sst [smem:[#allocation56_spill]] %s4401_s4 }
   0x6   :  { %4457 = sst [smem:[#allocation57_spill]] %s4402_s5 }
   0x7   :  { %4458 = sst [smem:[#allocation58_spill]] %s4404_s7 }
   0x8   :  { %12 = vsyncpa [#allocation6], 0 }
   0x9   :  { %14 = vsyncpa [#allocation6 + $0x1], 0 }
   0xa   :  { %15 = vsyncpa [#allocation9], 0 }
   0xb   :  { %17 = vsyncpa [#allocation9 + $0x1], 0 }
   0xc   :  { %18 = vsyncpa [#allocation12], 0 }
   0xd   :  { %20 = vsyncpa [#allocation12 + $0x1], 0 }
   0xe   :  { %21 = vsyncpa [#allocation7], 0 }
   0xf   :  { %23 = vsyncpa [#allocation7 + $0x1], 0  ;;  %s3067_s24 = smov 0   ;;  %s3069_s25 = smov 0  }
  0x10   :  { %s3071_s26 = smov 0   ;;  %s3073_s27 = smov 0  }
  0x11   :  { %s3075_s28 = smov 0   ;;  %s3077_s29 = smov 0  }
  0x12   :  { %s3079_s30 = smov 0   ;;  %s3081_s8 = smov 0  }
  0x13   :  { %s3083_s9 = smov 0   ;;  %s3085_s10 = smov 0  }
  0x14   :  { %s3087_s11 = smov 0  }
  0x15 LB: > { %4459 = sst [smem:[#allocation19_spill]] %s2987_s26  ;;  %s38_s12 = sadd.s32 1, %s3011_s9  ;;  %s3019_s11 = sphi %s3087_s11, %s29_s11   ;;  %s3015_s10 = sphi %s3085_s10, %s4575_s10   ;;  %s3011_s9 = sphi %s3083_s9, %s4581_s9   ;;  %s3007_s8 = sphi %s3081_s8, %s4573_s8   ;;  %s3003_s30 = sphi %s3079_s30, %s4580_s30   ;;  %s2999_s29 = sphi %s3077_s29, %s4572_s29   ;;  %s2995_s28 = sphi %s3075_s28, %s4579_s28   ;;  %s2991_s27 = sphi %s3073_s27, %s4578_s27   ;;  %s2987_s26 = sphi %s3071_s26, %s4570_s26   ;;  %s2983_s25 = sphi %s3069_s25, %s4577_s25   ;;  %s2979_s24 = sphi %s3067_s24, %s4576_s24  }
  0x16   : > { %4460 = sst [smem:[#allocation20_spill]] %s2991_s27  ;;  %p56_p0 = scmp.eq.s32.totalorder %s3019_s11, 0 }
  0x17   : > { %4461 = sst [smem:[#allocation21_spill]] %s2999_s29  ;;  %p3124_p1 = scmp.ge.s32.totalorder %s38_s12, 2 }
  0x18   : > { %4462 = sst [smem:[#allocation22_spill]] %s3003_s30  ;;  %s74_s14 = sadd.s32 1, %s2987_s26 }
  0x19   : > { %4463 = sst [smem:[#allocation23_spill]] %s3007_s8  ;;  %p81_p2 = scmp.ne.s32.totalorder %s2987_s26, %s2983_s25 }
  0x1a   : > { %4464 = sst [smem:[#allocation24_spill]] %s3015_s10  ;;  %p87_p3 = scmp.ne.s32.totalorder %s2983_s25, %s2979_s24 }
  0x1b   : > { %s4583_s12 = smov (%p3124_p1, %s38_s12), 0  ;;  %p3139_p4 = por %p81_p2, %p56_p0 }
  0x1c   : > { %4466 = sst [smem:[#allocation25_spill]] %s4583_s12  ;;  %s71_s16 = ssub.s32 %s3011_s9, %s4583_s12 }
  0x1d   : > { %p2514_p5 = scmp.lt.s32.totalorder %s3019_s11, 8  ;;  %p72_p6 = scmp.eq.s32.totalorder %s71_s16, 0 }
  0x1e   : > { %s290_s17 = sand.u32 1, %s3019_s11   ;;  %s3151_s19 = sand.u32 1, %s2987_s26  }
  0x1f   : > { %s3148_s18 = scalar_select %p72_p6, %s2987_s26, %s74_s14  }
  0x20   : > { %s2350_s20 = sshll.u32 %s3151_s19, 5  ;;  %s2446_s21 = sshll.u32 %s3011_s9, 5 }
  0x21   : > { %4468 = sst [smem:[#allocation26_spill]] %s3148_s18  ;;  %s294_s3 = scalar_lea.vmem [#allocation8], %s2350_s20 }
  0x22   : > { %s4469_s1 = sld [smem:[#allocation53_spill]]  ;;  %s302_s12 = sshll.u32 %s294_s3, 4  ;;  %s303_s12 = int_to_ptr.vmem [resolvable:$true] %s302_s12 }
  0x23   : > { %p3162_p7 = pnand %p2514_p5, %p3139_p4  ;;  %p2358_p8 = scmp.ge.s32.totalorder %s3019_s11, 1 }
  0x24   : > { %p380_p9 = scmp.lt.s32.totalorder %s3019_s11, 9  ;;  %s2353_s16 = sshll.u32 %s3151_s19, 7 }
  0x25   : > { %s3169_s22 = scalar_lea.sflag [#allocation9], %s290_s17  ;;  %s4408_s3 = smov 128  }
  0x26   : > { %p3177_p10 = pnand %p2358_p8, %p380_p9  ;;  %s2447_s20 = sshll.u32 %s3011_s9, 7 }
  0x27   : > { %s4472_s5 = sld [smem:[#allocation57_spill]]  ;;  %s48_s18 = sadd.s32 1, %s2999_s29 }
  0x28   : > { %s299_s7 = scalar_lea.hbm %s4469_s1, %s2446_s21  ;;  %s345_s21 = scalar_lea.vmem [#allocation11], %s2353_s16 }
  0x29   : > { %s300_s8 = sshll.u32 %s299_s7, 4  ;;  %s4409_s7 = smov 8   ;;  %s301_s8 = int_to_ptr.hbm [resolvable:$true] %s300_s8 }
  0x2a   : > { %2500 = dma.hbm_to_vmem [thread:$0]  (!%p3162_p7), %s301_s8, 512, %s303_s12, %s3169_s22, %s4408_s3, %s4408_s3, %s4409_s7  }
  0x2b   : > { %s353_s23 = sshll.u32 %s345_s21, 4  ;;  %s3185_s8 = scalar_lea.sflag [#allocation12], %s290_s17  ;;  %s354_s23 = int_to_ptr.vmem [resolvable:$true] %s353_s23 }
  0x2c   : > { %s3194_s12 = sadd.s32 4294967295, %s3019_s11   ;;  %s2343_s1 = sadd.s32 4294967294, %s3019_s11  }
  0x2d   : > { %s350_s26 = scalar_lea.hbm %s4472_s5, %s2447_s20  ;;  %p55_p11 = scmp.ne.s32.totalorder %s2999_s29, %s2995_s28 }
  0x2e   : > { %s351_s2 = sshll.u32 %s350_s26, 4  ;;  %s41_s26 = sadd.s32 1, %s3015_s10  ;;  %s352_s2 = int_to_ptr.hbm [resolvable:$true] %s351_s2 }
  0x2f   : > { %2506 = dma.hbm_to_vmem [thread:$0]  (!%p3162_p7), %s352_s2, 2048, %s354_s23, %s3185_s8, %s4408_s3, %s4408_s3, %s4409_s7  }
  0x30   : > { %s4585_s26 = smov (!%p3124_p1, %s41_s26), %s3015_s10  ;;  %p61_p12 = scmp.ne.s32.totalorder %s2995_s28, %s2991_s27 }
  0x31   : > { %p43_p13 = scmp.ge.s32.totalorder %s4585_s26, 4  ;;  %p62_p2 = scmp.eq.s32.totalorder %s3194_s12, 0 }
  0x32   : > { %p3209_p4 = por %p56_p0, %p55_p11  ;;  %p241_p6 = scmp.eq.s32.totalorder %s3194_s12, 7 }
  0x33   : > { %s4587_s26 = smov (%p43_p13, %s4585_s26), 0  ;;  %p3219_p8 = por %p62_p2, %p61_p12 }
  0x34   : > { %4474 = sst [smem:[#allocation27_spill]] %s4587_s26  ;;  %p3226_p1 = por %p87_p3, %p62_p2 }
  0x35   : > { %s45_s16 = ssub.s32 %s3015_s10, %s4587_s26  ;;  %p3232_p0 = por %p241_p6, %p55_p11 }
  0x36   : > { %p46_p9 = scmp.eq.s32.totalorder %s45_s16, 0  ;;  %p247_p13 = scmp.eq.s32.totalorder %s2343_s1, 7 }
  0x37   : > { %s267_s21 = sand.u32 1, %s2999_s29   ;;  %s2445_s23 = sshll.u32 %s3015_s10, 6 }
  0x38   : > { %s3239_s3 = scalar_select %p46_p9, %s2999_s29, %s48_s18  }
  0x39   : > { %p3244_p3 = por %p247_p13, %p61_p12  ;;  %s2346_s7 = sshll.u32 %s267_s21, 6 }
  0x3a   : > { %4478 = sst [smem:[#allocation28_spill]] %s3239_s3  ;;  %s271_s1 = scalar_lea.vmem [#allocation5], %s2346_s7 }
  0x3b   : > { %s4479_s24 = scalar_select %p3244_p3, 1, 0 }
  0x3c   : > { %s4481_s0 = sld [smem:[#allocation52_spill]]  ;;  %s280_s10 = sshll.u32 %s271_s1, 4  ;;  %s281_s10 = int_to_ptr.vmem [resolvable:$true] %s280_s10 }
  0x3d   : > { %4480 = sst [smem:[#allocation29_spill]] %s4479_s24  ;;  %p2495_p11 = pnand %p2514_p5, %p3209_p4 }
  0x3e   : > { %s4482_s4 = sld [smem:[#allocation56_spill]]  ;;  %s268_s5 = scalar_lea.sflag [#allocation6], %s267_s21 }
  0x3f   : > { %s4483_s26 = smov 8   ;;  %s2356_s1 = sshll.u32 %s3151_s19, 1 }
  0x40   : > { %s2357_s2 = sshll.u32 %s3011_s9, 1 }
  0x41   : > { %s371_s3 = scalar_lea.hbm %s4403_s6, %s2357_s2 }
  0x42   : > { %s277_s30 = scalar_lea.hbm %s4481_s0, %s2445_s23  ;;  %s4484_s23 = smov 128  }
  0x43   : > { %s278_s16 = sshll.u32 %s277_s30, 4  ;;  %s327_s30 = scalar_lea.vmem [#allocation10], %s3151_s19  ;;  %s279_s16 = int_to_ptr.hbm [resolvable:$true] %s278_s16 }
  0x44   : > { %s330_s29 = scalar_lea.hbm %s4482_s4, %s3011_s9  ;;  %s334_s7 = sshll.u32 %s327_s30, 4  ;;  %s335_s7 = int_to_ptr.vmem [resolvable:$true] %s334_s7 }
  0x45   : > { %s332_s24 = sshll.u32 %s330_s29, 4  ;;  %s367_s29 = scalar_lea.vmem [#allocation13], %s2356_s1  ;;  %s333_s24 = int_to_ptr.hbm [resolvable:$true] %s332_s24 }
  0x46   : > { %2497 = dma.hbm_to_vmem [thread:$0]  (!%p2495_p11), %s279_s16, 1024, %s281_s10, %s268_s5, %s4484_s23, %s4484_s23, %s4483_s26  }
  0x47   : > { %2503 = dma.hbm_to_vmem [thread:$0]  (!%p3162_p7), %s333_s24, 16, %s335_s7, %s3169_s22  }
  0x48   : > { %s375_s18 = sshll.u32 %s367_s29, 4  ;;  %s373_s4 = sshll.u32 %s371_s3, 4  ;;  %s376_s18 = int_to_ptr.vmem [resolvable:$true] %s375_s18  ;;  %s374_s4 = int_to_ptr.hbm [resolvable:$true] %s373_s4 }
  0x49   : > { %2509 = dma.hbm_to_vmem [thread:$0]  (!%p3162_p7), %s374_s4, 32, %s376_s18, %s3185_s8  }
  0x4a   : > { %384 = sbr.rel (%p3177_p10) target bundleno = 791 (0x317), region = 48 }
  0x4f   : > { %s3277_s10 = sand.u32 1, %s2995_s28  }
  0x50   : > { %s2359_s19 = sshll.u32 %s3277_s10, 6  ;;  %s387_s22 = scalar_lea.sflag [#allocation6], %s3277_s10 }
  0x51   : > { %s3281_s0 = scalar_lea.vmem [#allocation5], %s2359_s19 }
  0x52   : > { %2962 = dma.done.wait (%p3219_p8), %s387_s22, 1024  }
  0x53   : > { %2964 = vsyncadd (%p3219_p8), %s387_s22, 4294966272  ;;  %s396_s4 = sand.u32 1, %s3194_s12   ;;  %s3289_s27 = sand.u32 1, %s2983_s25  }
  0x54   : > { %s2360_s14 = sshll.u32 %s3289_s27, 5  ;;  %s397_s15 = scalar_lea.sflag [#allocation9], %s396_s4 }
  0x55   : > { %s3292_s8 = scalar_lea.vmem [#allocation8], %s2360_s14 }
  0x56   : > { %2966 = dma.done.wait (%p3226_p1), %s397_s15, 528  }
  0x57   : > { %2968 = vsyncadd (%p3226_p1), %s397_s15, 4294966768  ;;  %s2361_s13 = sshll.u32 %s3289_s27, 7  ;;  %s409_s21 = scalar_lea.vmem [#allocation10], %s3289_s27 }
  0x58   : > { %s416_s24 = scalar_lea.sflag [#allocation12], %s396_s4  ;;  %s3300_s16 = scalar_lea.vmem [#allocation11], %s2361_s13 }
  0x59   : > { %2970 = dma.done.wait (%p3226_p1), %s416_s24, 2080  }
  0x5a   : > { %2972 = vsyncadd (%p3226_p1), %s416_s24, 4294965216  ;;  %s4485_s12 = sld [smem:[#allocation22_spill]]  ;;  %s2362_s5 = sshll.u32 %s3289_s27, 1 }
  0x5b   : > { %s4486_s7 = sld [smem:[#allocation54_spill]]  ;;  %s3319_s22 = scalar_lea.vmem [#allocation13], %s2362_s5 }
  0x5c   : > { %s4487_s29 = sld [smem:[#allocation55_spill]]  ;;  %s3321_s17 = scalar_lea.vmem [#allocation14], %s2359_s19 }
  0x60   : > { %p487_p5 = scmp.lt.s32.totalorder %s4485_s12, 1  ;;  %p2364_p7 = scmp.ne.s32.totalorder %s4485_s12, 0 }
  0x62   : > { %s3309_s26 = scalar_select %p487_p5, %s4485_s12, 1 }
  0x63   : > { %497 = sbr.rel (%p2364_p7) target bundleno = 121 (0x79), region = 72 }
  0x64   : > { %s489_s1 = scalar_lea.vmem %s4486_s7, %s3309_s26  ;;  %s492_s18 = scalar_lea.vmem %s4487_s29, %s3309_s26 }
  0x68   : > { %v498_v0 = vld [vmem:[%s3281_s0] sm:$0xff]  ;;  %v499_v1 = vld [vmem:[%s3281_s0 + $0x8] sm:$0xff]  ;;  %v500_v2 = vld [vmem:[%s3281_s0 + $0x10] sm:$0xff]  ;;  %v3023_v8 = vmov 0.0  }
  0x69   : > { %506 = vst [vmem:[#allocation2 + $0x30] sm:$0xff] %v498_v0  ;;  %v501_v3 = vld [vmem:[%s3281_s0 + $0x18] sm:$0xff]  ;;  %v502_v4 = vld [vmem:[%s3281_s0 + $0x20] sm:$0xff]  ;;  %v503_v5 = vld [vmem:[%s3281_s0 + $0x28] sm:$0xff] }
  0x6a   : > { %507 = vst [vmem:[#allocation2] sm:$0xff] %v499_v1  ;;  %v504_v6 = vld [vmem:[%s3281_s0 + $0x30] sm:$0xff]  ;;  %v505_v7 = vld [vmem:[%s3281_s0 + $0x38] sm:$0xff] }
  0x6b   : > { %508 = vst [vmem:[#allocation2 + $0x18] sm:$0xff] %v500_v2 }
  0x6c   : > { %509 = vst [vmem:[#allocation2 + $0x10] sm:$0xff] %v501_v3 }
  0x6d   : > { %510 = vst [vmem:[#allocation2 + $0x8] sm:$0xff] %v502_v4 }
  0x6e   : > { %511 = vst [vmem:[#allocation2 + $0x20] sm:$0xff] %v503_v5 }
  0x6f   : > { %512 = vst [vmem:[#allocation2 + $0x28] sm:$0xff] %v504_v6 }
  0x70   : > { %513 = vst [vmem:[#allocation2 + $0x38] sm:$0xff] %v505_v7 }
  0x71   : > { %514 = vst [vmem:[#allocation3] sm:$0xff] %v3023_v8 }
  0x72   : > { %515 = vst [vmem:[#allocation3 + $0x8] sm:$0xff] %v3023_v8 }
  0x73   : > { %516 = vst [vmem:[#allocation3 + $0x10] sm:$0xff] %v3023_v8 }
  0x74   : > { %517 = vst [vmem:[#allocation3 + $0x18] sm:$0xff] %v3023_v8 }
  0x75   : > { %518 = vst [vmem:[#allocation3 + $0x40] sm:$0xff] %v3023_v8 }
  0x76   : > { %519 = vst [vmem:[#allocation3 + $0x48] sm:$0xff] %v3023_v8 }
  0x77   : > { %520 = vst [vmem:[#allocation3 + $0x50] sm:$0xff] %v3023_v8 }
  0x78   : > { %521 = vst [vmem:[#allocation3 + $0x58] sm:$0xff] %v3023_v8 }
  0x79 PF: > { %v528_v9 = vld [vmem:[#allocation2 + $0x28] sm:$0xff]  ;;  %v522_v11 = vld [vmem:[#allocation2 + $0x30] sm:$0xff]  ;;  %v529_v12 = vld [vmem:[#allocation2 + $0x38] sm:$0xff]  ;;  %v3024_v17 = vmov 128.0  }
  0x7a   : > { %v526_v10 = vld [vmem:[#allocation2 + $0x8] sm:$0xff]  ;;  %544 = vadd.xlane.f32.xlu2 %v528_v9  ;;  %532 = vadd.xlane.f32.xlu1 %v522_v11  ;;  %v527_v13 = vld [vmem:[#allocation2 + $0x20] sm:$0xff]  ;;  %v524_v15 = vld [vmem:[#allocation2 + $0x18] sm:$0xff]  ;;  %2645 = vrcp.f32 %v3024_v17 }
  0x7b   : > { %540 = vadd.xlane.f32.xlu0 %v526_v10  ;;  %v523_v14 = vld [vmem:[#allocation2] sm:$0xff]  ;;  %v525_v16 = vld [vmem:[#allocation2 + $0x10] sm:$0xff]  ;;  %v3383_v1 = vld [vmem:[%s3292_s8 + $0x8] ss:$0 sm:$0xff] }
  0x7c   : > { %4492 = vst [vmem:[#allocation34_spill] sm:$0xff] %v3383_v1  ;;  %v3386_v2 = vld [vmem:[%s3292_s8 + $0x9] ss:$0 sm:$0xff] }
  0x7f   : > { %v994_v62 = vld [vmem:[#allocation3 + $0x58] sm:$0xff] }
  0x80   : > { %v2646_v18 = vpop.eup %2645  ;;  %v1012_v63 = vld [vmem:[#allocation3 + $0x57] sm:$0xff]  ;;  %v1003_v8 = vmul.f32 %v3383_v1, %v994_v62 }
  0x81   : > { %v549_v19 = vmul.f32 128.0, %v2646_v18  ;;  %vm553_vm0 = vweird.f32 %v2646_v18  ;;  %v1038_v5 = vld [vmem:[#allocation3 + $0x56] sm:$0xff] }
  0x82   : > { %546 = vadd.xlane.f32.xlu2 %v529_v12  ;;  %534 = vadd.xlane.f32.xlu1 %v523_v14  ;;  %v1132_v17 = vld [vmem:[#allocation3 + $0x53] sm:$0xff] }
  0x83   : > { %542 = vadd.xlane.f32.xlu0 %v527_v13  ;;  %v550_v20 = vsub.f32 1.0, %v549_v19 }
  0x85   : > { %v551_v21 = vmul.f32 %v2646_v18, %v550_v20 }
  0x87   : > { %v552_v22 = vadd.f32 %v2646_v18, %v551_v21  ;;  %v3410_v21 = vld [vmem:[%s3292_s8 + $0xc] ss:$0 sm:$0xff] }
  0x89   : > { %v3332_v23 = vsel %vm553_vm0, %v2646_v18, %v552_v22  ;;  %v3413_v22 = vld [vmem:[%s3292_s8 + $0xd] ss:$0 sm:$0xff] }
  0x8a   : > { %538 = vadd.xlane.f32.xlu1 %v525_v16 }
  0x8b   : > { %536 = vadd.xlane.f32.xlu0 %v524_v15 }
  0xed   : > { %v545_v24 = vpop.xlane.xlu2 %544  ;;  %v533_v27 = vpop.xlane.xlu1 %532 }
  0xee   : > { %v541_v25 = vpop.xlane.xlu0 %540  ;;  %v555_v28 = vmul.f32 %v3332_v23, %v533_v27  ;;  %v561_v39 = vmul.f32 %v3332_v23, %v545_v24  ;;  %v1158_v24 = vld [vmem:[#allocation3 + $0x52] sm:$0xff] }
  0xef   : > { %v559_v26 = vmul.f32 %v3332_v23, %v541_v25  ;;  %v3416_v25 = vld [vmem:[%s3292_s8 + $0xe] ss:$0 sm:$0xff]  ;;  %v3419_v27 = vld [vmem:[#allocation3 + $0x18] sm:$0xff] }
  0xf0   : > { %v3338_v30 = vsub.f32 %v522_v11, %v555_v28  ;;  %v3360_v46 = vsub.f32 %v528_v9, %v561_v39  ;;  %v1021_v9 = vmul.f32 %v3386_v2, %v1012_v63  ;;  %v1064_v11 = vld [vmem:[#allocation3 + $0x55] sm:$0xff]  ;;  %4493 = vst [vmem:[#allocation35_spill] sm:$0xff] %v3419_v27 }
  0xf1   : > { %v3336_v29 = vsub.f32 %v526_v10, %v559_v26  ;;  %v3395_v10 = vld [vmem:[%s3292_s8 + $0xa] ss:$0 sm:$0xff]  ;;  %v3421_v28 = vld [vmem:[#allocation3 + $0x17] sm:$0xff] }
  0xf2   : > { %v571_v32 = vmul.f32 %v3338_v30, %v3338_v30  ;;  %4489 = vst [vmem:[#allocation31_spill] sm:$0xff] %v3360_v46  ;;  %v577_v51 = vmul.f32 %v3360_v46, %v3360_v46  ;;  %v1047_v20 = vmul.f32 %v3395_v10, %v1038_v5  ;;  %v1110_v39 = vld [vmem:[#allocation3 + $0x14] sm:$0xff] }
  0xf3   : > { %v575_v31 = vmul.f32 %v3336_v29, %v3336_v29  ;;  %4494 = vst [vmem:[#allocation36_spill] sm:$0xff] %v3421_v28 }
  0xf4   : > { %579 = vadd.xlane.f32.xlu1 %v571_v32 }
  0xf5   : > { %587 = vadd.xlane.f32.xlu2 %v575_v31  ;;  %v547_v33 = vpop.xlane.xlu2 %546  ;;  %v535_v37 = vpop.xlane.xlu1 %534 }
  0xf6   : > { %v543_v34 = vpop.xlane.xlu0 %542  ;;  %v562_v35 = vmul.f32 %v3332_v23, %v547_v33  ;;  %v556_v38 = vmul.f32 %v3332_v23, %v535_v37  ;;  %v1029_v33 = vadd.f32 %v1021_v9, %v1003_v8  ;;  %v1167_v37 = vmul.f32 %v3416_v25, %v1158_v24 }
  0xf7   : > { %v560_v36 = vmul.f32 %v3332_v23, %v543_v34 }
  0xf8   : > { %v3348_v40 = vsub.f32 %v529_v12, %v562_v35  ;;  %v3352_v42 = vsub.f32 %v523_v14, %v556_v38  ;;  %v1055_v24 = vadd.f32 %v1047_v20, %v1029_v33  ;;  %v3497_v33 = vld [vmem:[#allocation3 + $0x15] sm:$0xff] }
  0xf9   : > { %v3350_v41 = vsub.f32 %v527_v13, %v560_v36  ;;  %v1141_v36 = vmul.f32 %v3413_v22, %v1132_v17  ;;  %4499 = vst [vmem:[#allocation40_spill] sm:$0xff] %v3497_v33 }
  0xfa   : > { %4488 = vst [vmem:[#allocation30_spill] sm:$0xff] %v3348_v40  ;;  %v578_v44 = vmul.f32 %v3348_v40, %v3348_v40  ;;  %v572_v45 = vmul.f32 %v3352_v42, %v3352_v42 }
  0xfb   : > { %v576_v43 = vmul.f32 %v3350_v41, %v3350_v41 }
  0xfc   : > { %593 = vadd.xlane.f32.xlu1 %v578_v44 }
  0xfd   : > { %589 = vadd.xlane.f32.xlu0 %v576_v43  ;;  %581 = vadd.xlane.f32.xlu2 %v572_v45  ;;  %v539_v49 = vpop.xlane.xlu1 %538  ;;  %v1128_v43 = vld [vmem:[#allocation3 + $0x13] sm:$0xff] }
  0xfe   : > { %v537_v47 = vpop.xlane.xlu0 %536  ;;  %v558_v52 = vmul.f32 %v3332_v23, %v539_v49 }
  0xff   : > { %v557_v48 = vmul.f32 %v3332_v23, %v537_v47  ;;  %v999_v47 = vmul.f32 %v3383_v1, %v3419_v27 }
 0x100   : > { %v3370_v54 = vsub.f32 %v525_v16, %v558_v52  ;;  %v1114_v16 = vld [vmem:[#allocation3 + $0x54] sm:$0xff] }
 0x101   : > { %v3363_v50 = vsub.f32 %v524_v15, %v557_v48  ;;  %v3402_v15 = vld [vmem:[%s3292_s8 + $0xb] ss:$0 sm:$0xff]  ;;  %v1123_v35 = vmul.f32 %v3410_v21, %v1114_v16  ;;  %v1017_v48 = vmul.f32 %v3386_v2, %v3421_v28 }
 0x102   : > { %4491 = vst [vmem:[#allocation33_spill] sm:$0xff] %v3370_v54  ;;  %v574_v55 = vmul.f32 %v3370_v54, %v3370_v54  ;;  %v3428_v34 = vmul.f32 %v3402_v15, %v1064_v11 }
 0x103   : > { %4490 = vst [vmem:[#allocation32_spill] sm:$0xff] %v3363_v50  ;;  %v573_v53 = vmul.f32 %v3363_v50, %v3363_v50  ;;  %v1025_v5 = vadd.f32 %v1017_v48, %v999_v47 }
 0x105   : > { %591 = vadd.xlane.f32.xlu0 %v577_v51  ;;  %583 = vadd.xlane.f32.xlu2 %v573_v53 }
 0x10d   : > { %585 = vadd.xlane.f32.xlu0 %v574_v55 }
 0x167   : > { %v580_v58 = vpop.xlane.xlu1 %579 }
 0x168   : > { %v588_v56 = vpop.xlane.xlu2 %587  ;;  %v595_v59 = vmul.f32 %v580_v58, %v3332_v23  ;;  %v1137_v58 = vmul.f32 %v3413_v22, %v1128_v43 }
 0x169   : > { %v599_v57 = vmul.f32 %v588_v56, %v3332_v23  ;;  %v3444_v56 = vld [vmem:[#allocation3 + $0x16] sm:$0xff] }
 0x16a   : > { %v3378_v61 = vadd.f32 1e-05, %v595_v59  ;;  %4495 = vst [vmem:[#allocation37_spill] sm:$0xff] %v3444_v56  ;;  %v1043_v16 = vmul.f32 %v3395_v10, %v3444_v56 }
 0x16b   : > { %v3376_v60 = vadd.f32 1e-05, %v599_v57  ;;  %v1119_v57 = vmul.f32 %v3410_v21, %v1110_v39 }
 0x16c   : > { %vm617_vm3 = vweird.f32 %v3378_v61  ;;  %v1051_v48 = vadd.f32 %v1043_v16, %v1025_v5 }
 0x16d   : > { %2647 = vrsqrt.f32 %v3376_v60  ;;  %vm657_vm1 = vweird.f32 %v3376_v60 }
 0x16e   : > { %2649 = vrsqrt.f32 %v3378_v61 }
 0x16f   : > { %v594_v13 = vpop.xlane.xlu1 %593 }
 0x170   : > { %v590_v0 = vpop.xlane.xlu0 %589  ;;  %v582_v4 = vpop.xlane.xlu2 %581  ;;  %v602_v32 = vmul.f32 %v594_v13, %v3332_v23 }
 0x171   : > { %v600_v3 = vmul.f32 %v590_v0, %v3332_v23  ;;  %v596_v6 = vmul.f32 %v582_v4, %v3332_v23  ;;  %v1149_v4 = vadd.f32 %v1141_v36, %v1123_v35  ;;  %v3491_v35 = vld [vmem:[%s3292_s8 + $0xf] ss:$0 sm:$0xff]  ;;  %v1145_v36 = vadd.f32 %v1137_v58, %v1119_v57 }
 0x172   : > { %v3441_v53 = vadd.f32 1e-05, %v602_v32 }
 0x173   : > { %v3390_v7 = vpop.eup %2647  ;;  %v3397_v12 = vadd.f32 1e-05, %v600_v3  ;;  %v3406_v19 = vadd.f32 1e-05, %v596_v6  ;;  %v3460_v3 = vld [vmem:[%s492_s18] ss:$0 sm:$0xff] }
 0x174   : > { %v3399_v14 = vpop.eup %2649  ;;  %v652_v18 = vmul.f32 %v3390_v7, %v3376_v60  ;;  %vm658_vm2 = vweird.f32 %v3390_v7  ;;  %v1154_v6 = vld [vmem:[#allocation3 + $0x12] sm:$0xff]  ;;  %v3480_v60 = vld [vmem:[%s409_s21] ss:$0 sm:$0xff]  ;;  %vm687_vm13 = vweird.f32 %v3441_v53 }
 0x175   : > { %v612_v31 = vmul.f32 %v3399_v14, %v3378_v61  ;;  %2651 = vrsqrt.f32 %v3397_v12  ;;  %vm618_vm4 = vweird.f32 %v3399_v14  ;;  %vm659_vm5 = vmor %vm657_vm1, %vm658_vm2  ;;  %vm667_vm7 = vweird.f32 %v3397_v12 }
 0x176   : > { %v653_v26 = vmul.f32 %v3390_v7, %v652_v18  ;;  %2653 = vrsqrt.f32 %v3406_v19  ;;  %vm619_vm6 = vmor %vm617_vm3, %vm618_vm4  ;;  %vm627_vm9 = vweird.f32 %v3406_v19 }
 0x177   : > { %v613_v44 = vmul.f32 %v3399_v14, %v612_v31  ;;  %2655 = vrsqrt.f32 %v3441_v53 }
 0x178   : > { %v654_v38 = vmul.f32 0.5, %v653_v26  ;;  %v592_v45 = vpop.xlane.xlu0 %591  ;;  %v584_v49 = vpop.xlane.xlu2 %583  ;;  %v1184_v26 = vld [vmem:[#allocation3 + $0x51] sm:$0xff] }
 0x179   : > { %v614_v52 = vmul.f32 0.5, %v613_v44  ;;  %v601_v55 = vmul.f32 %v592_v45, %v3332_v23  ;;  %v597_v59 = vmul.f32 %v584_v49, %v3332_v23  ;;  %v1175_v45 = vadd.f32 %v1167_v37, %v1149_v4  ;;  %v1180_v49 = vld [vmem:[#allocation3 + $0x11] sm:$0xff] }
 0x17a   : > { %v655_v51 = vsub.f32 1.5, %v654_v38  ;;  %v1163_v38 = vmul.f32 %v3416_v25, %v1154_v6  ;;  %v1193_v47 = vmul.f32 %v3491_v35, %v1184_v26  ;;  %v1189_v58 = vmul.f32 %v3491_v35, %v1180_v49  ;;  %v3587_v49 = vld [vmem:[%s3292_s8 + $0x7] ss:$0 sm:$0xff] }
 0x17b   : > { %v3450_v62 = vpop.eup %2651  ;;  %v615_v0 = vsub.f32 1.5, %v614_v52  ;;  %v3468_v9 = vadd.f32 1e-05, %v601_v55  ;;  %v3476_v18 = vadd.f32 1e-05, %v597_v59 }
 0x17c   : > { %v656_v63 = vmul.f32 %v3390_v7, %v655_v51  ;;  %v662_v8 = vmul.f32 %v3450_v62, %v3397_v12  ;;  %v3470_v11 = vpop.eup %2653  ;;  %vm668_vm8 = vweird.f32 %v3450_v62  ;;  %v1171_v57 = vadd.f32 %v1163_v38, %v1145_v36  ;;  %v3547_v12 = vld [vmem:[%s3292_s8 + $0x1] ss:$0 sm:$0xff] }
 0x17d   : > { %4497 = vst [vmem:[#allocation38_spill] sm:$0xff] %v3468_v9  ;;  %v616_v17 = vmul.f32 %v3399_v14, %v615_v0  ;;  %v622_v32 = vmul.f32 %v3470_v11, %v3406_v19  ;;  %2657 = vrsqrt.f32 %v3468_v9  ;;  %v3501_v44 = vpop.eup %2655  ;;  %v3523_v0 = vld [vmem:[%s489_s1] ss:$0 sm:$0xff]  ;;  %vm628_vm10 = vweird.f32 %v3470_v11  ;;  %vm669_vm11 = vmor %vm667_vm7, %vm668_vm8 }
 0x17e   : > { %v660_v13 = vsel %vm659_vm5, %v3390_v7, %v656_v63  ;;  %4498 = vst [vmem:[#allocation39_spill] sm:$0xff] %v3476_v18  ;;  %v663_v7 = vmul.f32 %v3450_v62, %v662_v8  ;;  %2659 = vrsqrt.f32 %v3476_v18  ;;  %v682_v37 = vmul.f32 %v3501_v44, %v3441_v53  ;;  %v3529_v8 = vld [vmem:[%s3292_s8] ss:$0 sm:$0xff]  ;;  %vm3554_vm12 = vmor %vm627_vm9, %vm628_vm10 }
 0x17f   : > { %v695_v31 = vmul.f32 %v660_v13, %v3336_v29  ;;  %v620_v20 = vsel %vm619_vm6, %v3399_v14, %v616_v17  ;;  %v623_v43 = vmul.f32 %v3470_v11, %v622_v32  ;;  %4502 = vst [vmem:[#allocation42_spill] sm:$0xff] %v3529_v8  ;;  %v3540_v17 = vadd.f32 %v3428_v34, %v1055_v24 }
 0x180   : > { %v691_v61 = vmul.f32 %v620_v20, %v3338_v30  ;;  %v664_v39 = vmul.f32 0.5, %v663_v7  ;;  %v1069_v30 = vmul.f32 %v3402_v15, %v3497_v33  ;;  %v683_v6 = vmul.f32 %v3501_v44, %v682_v37  ;;  %4504 = vst [vmem:[#allocation44_spill] sm:$0xff] %v3547_v12  ;;  %v586_v38 = vpop.xlane.xlu0 %585  ;;  %v3562_v20 = vld [vmem:[%s3292_s8 + $0x2] ss:$0 sm:$0xff] }
 0x181   : > { %v706_v29 = vmul.f32 %v3460_v3, %v695_v31  ;;  %v624_v55 = vmul.f32 0.5, %v623_v43  ;;  %v3549_v32 = vadd.f32 %v1193_v47, %v1175_v45  ;;  %v3581_v45 = vld [vmem:[%s3292_s8 + $0x3] ss:$0 sm:$0xff]  ;;  %v3584_v47 = vld [vmem:[%s3292_s8 + $0x6] ss:$0 sm:$0xff]  ;;  %vm688_vm14 = vweird.f32 %v3501_v44 }
 0x182   : > { %v702_v51 = vmul.f32 %v3460_v3, %v691_v61  ;;  %v665_v52 = vsub.f32 1.5, %v664_v39  ;;  %v3544_v7 = vmul.f32 0.5, %v683_v6  ;;  %v3568_v61 = vld [vmem:[%s3292_s8 + $0x5] ss:$0 sm:$0xff]  ;;  %v3573_v19 = vadd.f32 %v1069_v30, %v1051_v48  ;;  %vm3645_vm15 = vmor %vm687_vm13, %vm688_vm14 }
 0x183   : > { %v717_v14 = vadd.f32 %v3480_v60, %v706_v29  ;;  %v3516_v63 = vpop.eup %2657  ;;  %v625_v5 = vsub.f32 1.5, %v624_v55  ;;  %4505 = vst [vmem:[#allocation45_spill] sm:$0xff] %v3549_v32  ;;  %v3565_v29 = vld [vmem:[%s3292_s8 + $0x4] ss:$0 sm:$0xff]  ;;  %v3575_v39 = vadd.f32 %v1189_v58, %v1171_v57 }
 0x184   : > { %v713_v59 = vadd.f32 %v3480_v60, %v702_v51  ;;  %4500 = vst [vmem:[#allocation41_spill] sm:$0xff] %v3516_v63  ;;  %v666_v4 = vmul.f32 %v3450_v62, %v665_v52  ;;  %v672_v13 = vmul.f32 %v3516_v63, %v3468_v9  ;;  %v3537_v16 = vpop.eup %2659 }
 0x185   : > { %725 = vst [vmem:[#allocation3 + $0x60] sm:$0xff] %v717_v14  ;;  %v626_v31 = vmul.f32 %v3470_v11, %v625_v5  ;;  %v632_v24 = vmul.f32 %v3537_v16, %v3476_v18  ;;  %v763_v51 = vmul.f32 %v3529_v8, %v717_v14  ;;  %v1004_v55 = vmul.f32 %v3383_v1, %v717_v14 }
 0x186   : > { %721 = vst [vmem:[#allocation3 + $0x20] sm:$0xff] %v713_v59  ;;  %v670_v26 = vsel %vm669_vm11, %v3450_v62, %v666_v4  ;;  %v673_v62 = vmul.f32 %v3516_v63, %v672_v13  ;;  %v3591_v52 = vmul.f32 %v3523_v0, %v713_v59  ;;  %v759_v48 = vmul.f32 %v3529_v8, %v713_v59 }
 0x187   : > { %4503 = vst [vmem:[#allocation43_spill] sm:$0xff] %v3537_v16  ;;  %v696_v36 = vmul.f32 %v670_v26, %v3350_v41  ;;  %v3571_v41 = vmul.f32 %v3523_v0, %v717_v14  ;;  %v630_v43 = vsel %vm3554_vm12, %v3470_v11, %v626_v31  ;;  %v3597_v58 = vmul.f32 %v3383_v1, %v713_v59 }
 0x188   : > { %4508 = vst [vmem:[#allocation46_spill] sm:$0xff] %v3565_v29  ;;  %v685_v4 = vsub.f32 1.5, %v3544_v7  ;;  %v598_v5 = vmul.f32 %v586_v38, %v3332_v23  ;;  %v692_v34 = vmul.f32 %v630_v43, %v3352_v42  ;;  %v3603_v14 = vmul.f32 0.5, %v673_v62 }
 0x189   : > { %4509 = vst [vmem:[#allocation47_spill] sm:$0xff] %v3568_v61  ;;  %v707_v11 = vmul.f32 %v3460_v3, %v696_v36  ;;  %v3606_v33 = vmul.f32 %v3537_v16, %v632_v24 }
 0x18a   : > { %4510 = vst [vmem:[#allocation48_spill] sm:$0xff] %v3575_v39 }
 0x18b   : > { %4511 = vst [vmem:[#allocation49_spill] sm:$0xff] %v3603_v14 }
 0x18c   : > { %v772_v30 = vld [vmem:[#allocation3 + $0x5f] sm:$0xff]  ;;  %4512 = vst [vmem:[#allocation50_spill] sm:$0xff] %v3606_v33 }
 0x18d   : > { %v798_v37 = vld [vmem:[#allocation3 + $0x5e] sm:$0xff]  ;;  %v781_v6 = vmul.f32 %v3547_v12, %v772_v30  ;;  %v1022_v56 = vmul.f32 %v3386_v2, %v772_v30 }
 0x18e   : > { %v824_v57 = vld [vmem:[#allocation3 + $0x5d] sm:$0xff]  ;;  %v807_v36 = vmul.f32 %v3562_v20, %v798_v37 }
 0x18f   : > { %v874_v13 = vld [vmem:[#allocation3 + $0x5c] sm:$0xff]  ;;  %v789_v42 = vadd.f32 %v781_v6, %v763_v51  ;;  %v833_v62 = vmul.f32 %v3581_v45, %v824_v57  ;;  %v1030_v32 = vadd.f32 %v1022_v56, %v1004_v55 }
 0x190   : > { %v892_v26 = vld [vmem:[#allocation3 + $0x5b] sm:$0xff]  ;;  %v883_v59 = vmul.f32 %v3565_v29, %v874_v13  ;;  %v1124_v40 = vmul.f32 %v3410_v21, %v874_v13 }
 0x191   : > { %v918_v31 = vld [vmem:[#allocation3 + $0x5a] sm:$0xff]  ;;  %v901_v7 = vmul.f32 %v3568_v61, %v892_v26  ;;  %v815_v33 = vadd.f32 %v807_v36, %v789_v42  ;;  %v686_v42 = vmul.f32 %v3501_v44, %v685_v4  ;;  %v1074_v4 = vmul.f32 %v3402_v15, %v824_v57 }
 0x192   : > { %v944_v54 = vld [vmem:[#allocation3 + $0x59] sm:$0xff]  ;;  %v927_v24 = vmul.f32 %v3584_v47, %v918_v31  ;;  %v1168_v56 = vmul.f32 %v3416_v25, %v918_v31 }
 0x193   : > { %v768_v23 = vld [vmem:[#allocation3 + $0x1f] sm:$0xff]  ;;  %v909_v46 = vadd.f32 %v901_v7, %v883_v59  ;;  %v953_v16 = vmul.f32 %v3587_v49, %v944_v54  ;;  %v841_v59 = vadd.f32 %v833_v62, %v815_v33  ;;  %v718_v33 = vadd.f32 %v3480_v60, %v707_v11 }
 0x194   : > { %v794_v38 = vld [vmem:[#allocation3 + $0x1e] sm:$0xff]  ;;  %v777_v43 = vmul.f32 %v3547_v12, %v768_v23  ;;  %v4516_v62 = vld [vmem:[#allocation30_spill] sm:$0xff] }
 0x195   : > { %v820_v28 = vld [vmem:[#allocation3 + $0x1d] sm:$0xff]  ;;  %v803_v51 = vmul.f32 %v3562_v20, %v794_v38  ;;  %v935_v1 = vadd.f32 %v927_v24, %v909_v46  ;;  %726 = vst [vmem:[#allocation3 + $0x68] sm:$0xff] %v718_v33  ;;  %v3653_v11 = vmul.f32 %v3523_v0, %v718_v33 }
 0x196   : > { %v870_v27 = vld [vmem:[#allocation3 + $0x1c] sm:$0xff]  ;;  %v785_v63 = vadd.f32 %v777_v43, %v759_v48  ;;  %v829_v6 = vmul.f32 %v3581_v45, %v820_v28  ;;  %v1048_v48 = vmul.f32 %v3395_v10, %v798_v37  ;;  %v857_v43 = vadd.f32 %v841_v59, %v3571_v41 }
 0x197   : > { %v888_v50 = vld [vmem:[#allocation3 + $0x1b] sm:$0xff]  ;;  %v879_v18 = vmul.f32 %v3565_v29, %v870_v27  ;;  %v1142_v29 = vmul.f32 %v3413_v22, %v892_v26  ;;  %v961_v46 = vadd.f32 %v953_v16, %v935_v1  ;;  %v1018_v37 = vmul.f32 %v3386_v2, %v768_v23 }
 0x198   : > { %v897_v30 = vmul.f32 %v3568_v61, %v888_v50  ;;  %v914_v9 = vld [vmem:[#allocation3 + $0x1a] sm:$0xff]  ;;  %v811_v7 = vadd.f32 %v803_v51, %v785_v63  ;;  %v703_v63 = vmul.f32 %v3460_v3, %v692_v34  ;;  %v1044_v41 = vmul.f32 %v3395_v10, %v794_v38 }
 0x199   : > { %v940_v14 = vld [vmem:[#allocation3 + $0x19] sm:$0xff]  ;;  %v923_v39 = vmul.f32 %v3584_v47, %v914_v9  ;;  %v1150_v24 = vadd.f32 %v1142_v29, %v1124_v40  ;;  %v977_v55 = vadd.f32 %v961_v46, %v857_v43  ;;  %v3636_v40 = vadd.f32 1e-05, %v598_v5 }
 0x19a   : > { %v905_v12 = vadd.f32 %v897_v30, %v879_v18  ;;  %v949_v36 = vmul.f32 %v3587_v49, %v940_v14  ;;  %v837_v18 = vadd.f32 %v829_v6, %v811_v7  ;;  %v1056_v30 = vadd.f32 %v1048_v48, %v1030_v32  ;;  %v4517_v6 = vld [vmem:[#allocation45_spill] sm:$0xff]  ;;  %v4519_v59 = vld [vmem:[#allocation48_spill] sm:$0xff]  ;;  %v4521_v48 = vld [vmem:[#allocation34_spill] sm:$0xff] }
 0x19b   : > { %v1176_v13 = vadd.f32 %v1168_v56, %v1150_v24  ;;  %v714_v1 = vadd.f32 %v3480_v60, %v703_v63  ;;  %v1194_v32 = vmul.f32 %v3491_v35, %v944_v54  ;;  %v1026_v29 = vadd.f32 %v1018_v37, %v3597_v58  ;;  %v4522_v24 = vld [vmem:[#allocation49_spill] sm:$0xff]  ;;  %v4524_v63 = vld [vmem:[#allocation44_spill] sm:$0xff]  ;;  %v4525_v37 = vld [vmem:[#allocation50_spill] sm:$0xff] }
 0x19c   : > { %v931_v61 = vadd.f32 %v923_v39, %v905_v12  ;;  %v853_v12 = vadd.f32 %v837_v18, %v3591_v52  ;;  %v1097_v52 = vadd.f32 %v3540_v17, %v977_v55  ;;  %v3650_v57 = vadd.f32 %v1074_v4, %v1056_v30  ;;  %v773_v46 = vld [vmem:[#allocation3 + $0x67] sm:$0xff]  ;;  %v4523_v30 = vld [vmem:[#allocation41_spill] sm:$0xff] }
 0x19d   : > { %722 = vst [vmem:[#allocation3 + $0x28] sm:$0xff] %v714_v1  ;;  %v1120_v54 = vmul.f32 %v3410_v21, %v870_v27  ;;  %v764_v5 = vmul.f32 %v3529_v8, %v718_v33  ;;  %v1052_v26 = vadd.f32 %v1044_v41, %v1026_v29  ;;  %v1138_v53 = vmul.f32 %v3413_v22, %v888_v50  ;;  %v799_v18 = vld [vmem:[#allocation3 + $0x66] sm:$0xff]  ;;  %v4527_v29 = vld [vmem:[#allocation47_spill] sm:$0xff] }
 0x19e   : > { %v957_v39 = vadd.f32 %v949_v36, %v931_v61  ;;  %v3659_v31 = vadd.f32 %v1194_v32, %v1176_v13  ;;  %v3662_v34 = vmul.f32 %v3523_v0, %v714_v1  ;;  %v760_v17 = vmul.f32 %v3529_v8, %v714_v1 }
 0x19f   : > { %v690_v23 = vsel %vm3645_vm15, %v3501_v44, %v686_v42  ;;  %v1070_v27 = vmul.f32 %v3402_v15, %v820_v28  ;;  %v1146_v38 = vadd.f32 %v1138_v53, %v1120_v54  ;;  %v3672_v50 = vadd.f32 %v4517_v6, %v1097_v52  ;;  %v825_v44 = vld [vmem:[#allocation3 + $0x65] sm:$0xff] }
 0x1a0   : > { %v973_v16 = vadd.f32 %v957_v39, %v853_v12  ;;  %4515 = vst [vmem:[#allocation51_spill] sm:$0xff] %v3659_v31  ;;  %v698_v51 = vmul.f32 %v690_v23, %v4516_v62  ;;  %v1190_v36 = vmul.f32 %v3491_v35, %v940_v14  ;;  %v1005_v43 = vmul.f32 %v4521_v48, %v718_v33  ;;  %v875_v12 = vld [vmem:[#allocation3 + $0x64] sm:$0xff] }
 0x1a1   : > { %4518 = vst [vmem:[#allocation30_spill] sm:$0xff] %v3672_v50  ;;  %v3679_v42 = vadd.f32 %v1070_v27, %v1052_v26  ;;  %vm678_vm0 = vweird.f32 %v4523_v30  ;;  %v3684_v56 = vmul.f32 %v4521_v48, %v714_v1  ;;  %v782_v55 = vmul.f32 %v4524_v63, %v773_v46  ;;  %v893_v39 = vld [vmem:[#allocation3 + $0x63] sm:$0xff]  ;;  %v4530_v26 = vld [vmem:[#allocation43_spill] sm:$0xff] }
 0x1a2   : > { %v1093_v58 = vadd.f32 %v3573_v19, %v973_v16  ;;  %v1164_v19 = vmul.f32 %v3416_v25, %v914_v9  ;;  %v675_v9 = vsub.f32 1.5, %v4522_v24  ;;  %v919_v14 = vld [vmem:[#allocation3 + $0x62] sm:$0xff]  ;;  %v709_v33 = vmul.f32 %v3460_v3, %v698_v51 }
 0x1a3   : > { %v3689_v4 = vmul.f32 0.5, %v4525_v37  ;;  %2661 = vrsqrt.f32 %v3636_v40  ;;  %v808_v13 = vmul.f32 %v3562_v20, %v799_v18  ;;  %v4526_v16 = vld [vmem:[#allocation46_spill] sm:$0xff]  ;;  %v902_v41 = vmul.f32 %v4527_v29, %v893_v39 }
 0x1a4   : > { %v3675_v7 = vadd.f32 %v4519_v59, %v1093_v58  ;;  %v1172_v28 = vadd.f32 %v1164_v19, %v1146_v38  ;;  %v884_v32 = vmul.f32 %v4526_v16, %v875_v12  ;;  %v769_v1 = vld [vmem:[#allocation3 + $0x27] sm:$0xff]  ;;  %v1023_v52 = vmul.f32 %v3386_v2, %v773_v46 }
 0x1a5   : > { %v795_v61 = vld [vmem:[#allocation3 + $0x26] sm:$0xff]  ;;  %v4529_v58 = vld [vmem:[#allocation39_spill] sm:$0xff]  ;;  %vm638_vm3 = vweird.f32 %v4530_v26  ;;  %v790_v53 = vadd.f32 %v782_v55, %v764_v5  ;;  %v834_v23 = vmul.f32 %v3581_v45, %v825_v44  ;;  %v928_v27 = vmul.f32 %v3584_v47, %v919_v14 }
 0x1a6   : > { %4520 = vst [vmem:[#allocation45_spill] sm:$0xff] %v3675_v7  ;;  %v4528_v54 = vld [vmem:[#allocation38_spill] sm:$0xff]  ;;  %vm637_vm2 = vweird.f32 %v4529_v58  ;;  %v778_v38 = vmul.f32 %v4524_v63, %v769_v1  ;;  %v910_v51 = vadd.f32 %v902_v41, %v884_v32  ;;  %v3706_v50 = vadd.f32 %v1190_v36, %v1172_v28 }
 0x1a7   : > { %vm677_vm1 = vweird.f32 %v4528_v54  ;;  %v871_v19 = vld [vmem:[#allocation3 + $0x24] sm:$0xff]  ;;  %v816_v5 = vadd.f32 %v808_v13, %v790_v53  ;;  %v804_v7 = vmul.f32 %v3562_v20, %v795_v61  ;;  %v720_v8 = vadd.f32 %v3480_v60, %v709_v33  ;;  %vm3744_vm5 = vmor %vm637_vm2, %vm638_vm3 }
 0x1a8   : > { %v889_v62 = vld [vmem:[#allocation3 + $0x23] sm:$0xff]  ;;  %v880_v46 = vmul.f32 %v4526_v16, %v871_v19  ;;  %v786_v55 = vadd.f32 %v778_v38, %v760_v17  ;;  %v936_v32 = vadd.f32 %v928_v27, %v910_v51  ;;  %v1031_v16 = vadd.f32 %v1023_v52, %v1005_v43  ;;  %vm679_vm4 = vmor %vm677_vm1, %vm678_vm0 }
 0x1a9   : > { %v945_v6 = vld [vmem:[#allocation3 + $0x61] sm:$0xff]  ;;  %v898_v24 = vmul.f32 %v4527_v29, %v889_v62  ;;  %v3714_v31 = vpop.eup %2661  ;;  %v842_v29 = vadd.f32 %v834_v23, %v816_v5  ;;  %728 = vst [vmem:[#allocation3 + $0x78] sm:$0xff] %v720_v8  ;;  %v1049_v38 = vmul.f32 %v3395_v10, %v799_v18  ;;  %v1125_v27 = vmul.f32 %v3410_v21, %v875_v12 }
 0x1aa   : > { %v821_v59 = vld [vmem:[#allocation3 + $0x25] sm:$0xff]  ;;  %v954_v36 = vmul.f32 %v3587_v49, %v945_v6  ;;  %v812_v28 = vadd.f32 %v804_v7, %v786_v55  ;;  %v1143_v23 = vmul.f32 %v3413_v22, %v893_v39  ;;  %v1075_v7 = vmul.f32 %v3402_v15, %v825_v44 }
 0x1ab   : > { %v3704_v37 = vld [vmem:[#allocation3 + $0x22] sm:$0xff]  ;;  %v906_v41 = vadd.f32 %v898_v24, %v880_v46  ;;  %v830_v17 = vmul.f32 %v3581_v45, %v821_v59  ;;  %v858_v33 = vadd.f32 %v842_v29, %v3653_v11  ;;  %v1057_v46 = vadd.f32 %v1049_v38, %v1031_v16  ;;  %v4532_v29 = vld [vmem:[#allocation31_spill] sm:$0xff]  ;;  %v4538_v38 = vld [vmem:[#allocation32_spill] sm:$0xff] }
 0x1ac   : > { %v924_v63 = vmul.f32 %v3584_v47, %v3704_v37  ;;  %v3711_v48 = vld [vmem:[#allocation3 + $0x21] sm:$0xff]  ;;  %v962_v43 = vadd.f32 %v954_v36, %v936_v32  ;;  %v1151_v55 = vadd.f32 %v1143_v23, %v1125_v27  ;;  %v1169_v18 = vmul.f32 %v3416_v25, %v919_v14 }
 0x1ad   : > { %v950_v53 = vmul.f32 %v3587_v49, %v3711_v48  ;;  %v838_v52 = vadd.f32 %v830_v17, %v812_v28  ;;  %v3733_v11 = vmul.f32 %v3523_v0, %v720_v8  ;;  %v635_v44 = vsub.f32 1.5, %v3689_v4  ;;  %v2423_v28 = vld [vmem:[%s3300_s16 + $0x70] sm:$0xf]  ;;  %v2463_v17 = vld [vmem:[%s3300_s16 + $0x74] sm:$0xf0] }
 0x1ae   : > { %v932_v13 = vadd.f32 %v924_v63, %v906_v41  ;;  %v676_v63 = vmul.f32 %v4523_v30, %v675_v9  ;;  %v978_v24 = vadd.f32 %v962_v43, %v858_v33  ;;  %v1019_v9 = vmul.f32 %v3386_v2, %v769_v1  ;;  %v2462_v33 = vld [vmem:[%s3300_s16 + $0x74] sm:$0xf]  ;;  %v3807_v8 = vld [vmem:[#allocation3 + $0xe] sm:$0xff] }
 0x1af   : > { %v854_v5 = vadd.f32 %v838_v52, %v3662_v34  ;;  %4531 = vst [vmem:[#allocation48_spill] sm:$0xff] %v3733_v11  ;;  %v1177_v16 = vadd.f32 %v1169_v18, %v1151_v55  ;;  %v1121_v1 = vmul.f32 %v3410_v21, %v871_v19  ;;  %vm647_vm6 = vweird.f32 %v3636_v40  ;;  %v3774_v43 = vld [vmem:[#allocation3 + $0x10] sm:$0xff] }
 0x1b0   : > { %v958_v51 = vadd.f32 %v950_v53, %v932_v13  ;;  %v680_v12 = vsel %vm679_vm4, %v4523_v30, %v676_v63  ;;  %v1098_v39 = vadd.f32 %v3650_v57, %v978_v24  ;;  %v636_v30 = vmul.f32 %v4530_v26, %v635_v44  ;;  %v4535_v13 = vld [vmem:[#allocation51_spill] sm:$0xff]  ;;  %v2461_v44 = vld [vmem:[%s3300_s16 + $0x64] sm:$0xf0] }
 0x1b1   : > { %v697_v14 = vmul.f32 %v680_v12, %v4532_v29  ;;  %v1027_v4 = vadd.f32 %v1019_v9, %v3684_v56  ;;  %v1045_v57 = vmul.f32 %v3395_v10, %v795_v61  ;;  %v3754_v58 = vadd.f32 %v1075_v7, %v1057_v46  ;;  %v3791_v24 = vld [vmem:[#allocation3 + $0xf] sm:$0xff]  ;;  %v2415_v12 = vld [vmem:[%s3300_s16 + $0x60] sm:$0xf]  ;;  %v2460_v9 = vld [vmem:[%s3300_s16 + $0x64] sm:$0xf] }
 0x1b2   : > { %v974_v34 = vadd.f32 %v958_v51, %v854_v5  ;;  %v1195_v32 = vmul.f32 %v3491_v35, %v945_v6  ;;  %v640_v56 = vsel %vm3744_vm5, %v4530_v26, %v636_v30  ;;  %v1071_v61 = vmul.f32 %v3402_v15, %v821_v59  ;;  %v2425_v26 = vld [vmem:[%s3300_s16 + $0x78] sm:$0xf0]  ;;  %v3784_v51 = vld [vmem:[%s3292_s8 + $0x10] ss:$0 sm:$0xff]  ;;  %v3794_v5 = vld [vmem:[%s3292_s8 + $0x11] ss:$0 sm:$0xff] }
 0x1b3   : > { %v708_v41 = vmul.f32 %v3460_v3, %v697_v14  ;;  %v1053_v36 = vadd.f32 %v1045_v57, %v1027_v4  ;;  %v1139_v19 = vmul.f32 %v3413_v22, %v889_v62  ;;  %v693_v27 = vmul.f32 %v640_v56, %v4538_v38  ;;  %4539 = vst [vmem:[#allocation50_spill] sm:$0xff] %v3794_v5  ;;  %v4540_v29 = vld [vmem:[#allocation35_spill] sm:$0xff] }
 0x1b4   : > { %v1094_v54 = vadd.f32 %v3679_v42, %v974_v34  ;;  %v3766_v42 = vadd.f32 %v4535_v13, %v1098_v39  ;;  %v3768_v53 = vadd.f32 %v1195_v32, %v1177_v16  ;;  %v1165_v52 = vmul.f32 %v3416_v25, %v3704_v37  ;;  %v2417_v16 = vld [vmem:[%s3300_s16 + $0x68] sm:$0xf0]  ;;  %v4542_v32 = vld [vmem:[#allocation42_spill] sm:$0xff]  ;;  %v2407_v38 = vld [vmem:[%s3300_s16 + $0x50] sm:$0xf] }
 0x1b5   : > { %v719_v6 = vadd.f32 %v3480_v60, %v708_v41  ;;  %v1147_v62 = vadd.f32 %v1139_v19, %v1121_v1  ;;  %v642_v23 = vmul.f32 %v3714_v31, %v3636_v40  ;;  %v704_v46 = vmul.f32 %v3460_v3, %v693_v27  ;;  %v2459_v27 = vld [vmem:[%s3300_s16 + $0x54] sm:$0xf0] }
 0x1b6   : > { %4536 = vst [vmem:[#allocation49_spill] sm:$0xff] %v3766_v42  ;;  %v3777_v59 = vadd.f32 %v3706_v50, %v1094_v54  ;;  %v3787_v7 = vadd.f32 %v1071_v61, %v1053_v36  ;;  %v1191_v50 = vmul.f32 %v3491_v35, %v3711_v48  ;;  %v2424_v63 = vor.u32 %v2463_v17, %v2423_v28  ;;  %v3815_v54 = vld [vmem:[%s3292_s8 + $0x12] ss:$0 sm:$0xff]  ;;  %v4543_v61 = vld [vmem:[#allocation36_spill] sm:$0xff]  ;;  %v3826_v28 = vld [vmem:[%s3292_s8 + $0x13] ss:$0 sm:$0xff] }
 0x1b7   : > { %4537 = vst [vmem:[#allocation41_spill] sm:$0xff] %v3768_v53  ;;  %v1173_v37 = vadd.f32 %v1165_v52, %v1147_v62  ;;  %v643_v55 = vmul.f32 %v3714_v31, %v642_v23  ;;  %v2428_v18 = vor.u32 %v2462_v33, %v2425_v26  ;;  %v1239_v39 = vmul.f32 %v3784_v51, %v3774_v43  ;;  %v3835_v26 = vld [vmem:[#allocation3 + $0xd] sm:$0xff]  ;;  %v2458_v23 = vld [vmem:[%s3300_s16 + $0x54] sm:$0xf] }
 0x1b8   : > { %727 = vst [vmem:[#allocation3 + $0x70] sm:$0xff] %v719_v6  ;;  %v715_v34 = vadd.f32 %v3480_v60, %v704_v46  ;;  %vm648_vm7 = vweird.f32 %v3714_v31  ;;  %1895 = vmatpush.bf16.msra.mxu0 %v2424_v63  ;;  %2466 = vmatpush.bf16.msra.mxu2 %v2424_v63  ;;  %v2416_v48 = vor.u32 %v2461_v44, %v2415_v12  ;;  %v2409_v46 = vld [vmem:[%s3300_s16 + $0x58] sm:$0xf0]  ;;  %v4547_v44 = vld [vmem:[#allocation34_spill] sm:$0xff] }
 0x1b9   : > { %v1240_v14 = vmul.f32 %v3784_v51, %v4540_v29  ;;  %v3810_v30 = vmul.f32 %v3523_v0, %v719_v6  ;;  %v644_v4 = vmul.f32 0.5, %v643_v55  ;;  %1924 = vmatpush.bf16.msra.mxu1 %v2428_v18  ;;  %2474 = vmatpush.bf16.msra.mxu3 %v2428_v18  ;;  %v2420_v57 = vor.u32 %v2460_v9, %v2417_v16  ;;  %vm3841_vm8 = vmor %vm647_vm6, %vm648_vm7  ;;  %v4546_v63 = vld [vmem:[#allocation37_spill] sm:$0xff] }
 0x1ba   : > { %v1257_v1 = vmul.f32 %v3794_v5, %v3791_v24  ;;  %4541 = vst [vmem:[#allocation38_spill] sm:$0xff] %v3815_v54  ;;  %v765_v41 = vmul.f32 %v4542_v32, %v719_v6  ;;  %v3819_v56 = vmul.f32 %v3523_v0, %v715_v34  ;;  %v3821_v36 = vadd.f32 %v1191_v50, %v1173_v37 }
 0x1bb   : > { %723 = vst [vmem:[#allocation3 + $0x30] sm:$0xff] %v715_v34  ;;  %v1258_v19 = vmul.f32 %v3794_v5, %v4543_v61  ;;  %v3829_v17 = vmul.f32 %v4542_v32, %v715_v34  ;;  %v645_v13 = vsub.f32 1.5, %v644_v4  ;;  %v1283_v33 = vmul.f32 %v3815_v54, %v3807_v8 }
 0x1bc   : > { %v1265_v6 = vadd.f32 %v1257_v1, %v1239_v39  ;;  %1896 = vmatpush.bf16.msra.mxu0 %v2416_v48  ;;  %2467 = vmatpush.bf16.msra.mxu2 %v2416_v48  ;;  %v2408_v52 = vor.u32 %v2459_v27, %v2407_v38  ;;  %v1284_v37 = vmul.f32 %v3815_v54, %v4546_v63  ;;  %v4548_v48 = vld [vmem:[#allocation44_spill] sm:$0xff]  ;;  %v4550_v38 = vld [vmem:[#allocation47_spill] sm:$0xff]  ;;  %v2399_v63 = vld [vmem:[%s3300_s16 + $0x40] sm:$0xf] }
 0x1bd   : > { %v1266_v50 = vadd.f32 %v1258_v19, %v1240_v14  ;;  %v1002_v9 = vmul.f32 %v4547_v44, %v715_v34  ;;  %v646_v40 = vmul.f32 %v3714_v31, %v645_v13  ;;  %1925 = vmatpush.bf16.msra.mxu1 %v2420_v57  ;;  %2475 = vmatpush.bf16.msra.mxu3 %v2420_v57  ;;  %v4549_v13 = vld [vmem:[#allocation46_spill] sm:$0xff]  ;;  %v2401_v44 = vld [vmem:[%s3300_s16 + $0x48] sm:$0xf0] }
 0x1be   : > { %v2412_v39 = vor.u32 %v2458_v23, %v2409_v46  ;;  %v3853_v61 = vadd.f32 %v1283_v33, %v1265_v6  ;;  %v3857_v34 = vmul.f32 %v3826_v28, %v3835_v26  ;;  %v2456_v33 = vld [vmem:[%s3300_s16 + $0x44] sm:$0xf] }
 0x1bf   : > { %v774_v55 = vld [vmem:[#allocation3 + $0x6f] sm:$0xff]  ;;  %v650_v46 = vsel %vm3841_vm8, %v3714_v31, %v646_v40  ;;  %v3870_v11 = vadd.f32 %v1284_v37, %v1266_v50  ;;  %v2404_v5 = vor.u32 %v2456_v33, %v2401_v44 }
 0x1c0   : > { %v800_v18 = vld [vmem:[#allocation3 + $0x6e] sm:$0xff]  ;;  %v783_v16 = vmul.f32 %v4548_v48, %v774_v55  ;;  %v2457_v55 = vld [vmem:[%s3300_s16 + $0x44] sm:$0xf0]  ;;  %1897 = vmatpush.bf16.msra.mxu0 %v2408_v52  ;;  %2468 = vmatpush.bf16.msra.mxu2 %v2408_v52  ;;  %v4551_v52 = vld [vmem:[#allocation33_spill] sm:$0xff] }
 0x1c1   : > { %v826_v12 = vld [vmem:[#allocation3 + $0x6d] sm:$0xff]  ;;  %v809_v29 = vmul.f32 %v3562_v20, %v800_v18  ;;  %1926 = vmatpush.bf16.msra.mxu1 %v2412_v39  ;;  %2476 = vmatpush.bf16.msra.mxu3 %v2412_v39  ;;  %v2400_v31 = vor.u32 %v2457_v55, %v2399_v63  ;;  %v694_v54 = vmul.f32 %v650_v46, %v4551_v52 }
 0x1c2   : > { %v876_v14 = vld [vmem:[#allocation3 + $0x6c] sm:$0xff]  ;;  %v835_v19 = vmul.f32 %v3581_v45, %v826_v12  ;;  %v791_v18 = vadd.f32 %v783_v16, %v765_v41 }
 0x1c3   : > { %v894_v4 = vld [vmem:[#allocation3 + $0x6b] sm:$0xff]  ;;  %v885_v57 = vmul.f32 %v4549_v13, %v876_v14 }
 0x1c4   : > { %v920_v1 = vld [vmem:[#allocation3 + $0x6a] sm:$0xff]  ;;  %v903_v27 = vmul.f32 %v4550_v38, %v894_v4  ;;  %v817_v62 = vadd.f32 %v809_v29, %v791_v18  ;;  %1898 = vmatpush.bf16.msra.mxu0 %v2400_v31  ;;  %2469 = vmatpush.bf16.msra.mxu2 %v2400_v31  ;;  %v2391_v44 = vld [vmem:[%s3300_s16 + $0x30] sm:$0xf] }
 0x1c5   : > { %v946_v23 = vld [vmem:[#allocation3 + $0x69] sm:$0xff]  ;;  %v929_v6 = vmul.f32 %v3584_v47, %v920_v1  ;;  %1927 = vmatpush.bf16.msra.mxu1 %v2404_v5  ;;  %2477 = vmatpush.bf16.msra.mxu3 %v2404_v5 }
 0x1c6   : > { %v911_v12 = vadd.f32 %v903_v27, %v885_v57  ;;  %v955_v14 = vmul.f32 %v3587_v49, %v946_v23  ;;  %v770_v4 = vld [vmem:[#allocation3 + $0x2f] sm:$0xff]  ;;  %v843_v23 = vadd.f32 %v835_v19, %v817_v62 }
 0x1c7   : > { %v796_v53 = vld [vmem:[#allocation3 + $0x2e] sm:$0xff]  ;;  %v779_v41 = vmul.f32 %v4548_v48, %v770_v4  ;;  %v1020_v46 = vmul.f32 %v3386_v2, %v770_v4  ;;  %v2454_v2 = vld [vmem:[%s3300_s16 + $0x34] sm:$0xf]  ;;  %v2393_v4 = vld [vmem:[%s3300_s16 + $0x38] sm:$0xf0] }
 0x1c8   : > { %v822_v42 = vld [vmem:[#allocation3 + $0x2d] sm:$0xff]  ;;  %v937_v50 = vadd.f32 %v929_v6, %v911_v12  ;;  %v805_v37 = vmul.f32 %v3562_v20, %v796_v53  ;;  %v1046_v33 = vmul.f32 %v3395_v10, %v796_v53  ;;  %v859_v19 = vadd.f32 %v843_v23, %v3810_v30 }
 0x1c9   : > { %v872_v40 = vld [vmem:[#allocation3 + $0x2c] sm:$0xff]  ;;  %v787_v39 = vadd.f32 %v779_v41, %v3829_v17  ;;  %v831_v29 = vmul.f32 %v3581_v45, %v822_v42  ;;  %v1028_v12 = vadd.f32 %v1020_v46, %v1002_v9  ;;  %v2455_v41 = vld [vmem:[%s3300_s16 + $0x34] sm:$0xf0]  ;;  %v1072_v10 = vmul.f32 %v3402_v15, %v822_v42  ;;  %v2452_v15 = vld [vmem:[%s3300_s16 + $0x24] sm:$0xf] }
 0x1ca   : > { %v890_v16 = vld [vmem:[#allocation3 + $0x2b] sm:$0xff]  ;;  %v881_v57 = vmul.f32 %v4549_v13, %v872_v40  ;;  %v963_v55 = vadd.f32 %v955_v14, %v937_v50  ;;  %v1122_v62 = vmul.f32 %v3410_v21, %v872_v40  ;;  %v705_v21 = vmul.f32 %v3460_v3, %v694_v54  ;;  %v2383_v40 = vld [vmem:[%s3300_s16 + $0x20] sm:$0xf] }
 0x1cb   : > { %v916_v1 = vld [vmem:[#allocation3 + $0x2a] sm:$0xff]  ;;  %v899_v27 = vmul.f32 %v4550_v38, %v890_v16  ;;  %v813_v17 = vadd.f32 %v805_v37, %v787_v39  ;;  %v1140_v53 = vmul.f32 %v3413_v22, %v890_v16  ;;  %v1054_v31 = vadd.f32 %v1046_v33, %v1028_v12  ;;  %v2375_v54 = vld [vmem:[%s3300_s16 + $0x10] sm:$0xf]  ;;  %v2451_v39 = vld [vmem:[%s3300_s16 + $0x14] sm:$0xf0] }
 0x1cc   : > { %v942_v63 = vld [vmem:[#allocation3 + $0x29] sm:$0xff]  ;;  %v925_v6 = vmul.f32 %v3584_v47, %v916_v1  ;;  %v979_v30 = vadd.f32 %v963_v55, %v859_v19  ;;  %v2396_v23 = vor.u32 %v2454_v2, %v2393_v4  ;;  %v716_v3 = vadd.f32 %v3480_v60, %v705_v21  ;;  %v2377_v55 = vld [vmem:[%s3300_s16 + $0x18] sm:$0xf0] }
 0x1cd   : > { %v907_v18 = vadd.f32 %v899_v27, %v881_v57  ;;  %v951_v52 = vmul.f32 %v3587_v49, %v942_v63  ;;  %v839_v9 = vadd.f32 %v831_v29, %v813_v17  ;;  %v2453_v50 = vld [vmem:[%s3300_s16 + $0x24] sm:$0xf0]  ;;  %v1148_v37 = vadd.f32 %v1140_v53, %v1122_v62  ;;  %v2385_v22 = vld [vmem:[%s3300_s16 + $0x28] sm:$0xf0]  ;;  %v2450_v29 = vld [vmem:[%s3300_s16 + $0x14] sm:$0xf] }
 0x1ce   : > { %v1166_v57 = vmul.f32 %v3416_v25, %v916_v1  ;;  %v2392_v27 = vor.u32 %v2455_v41, %v2391_v44  ;;  %v3899_v42 = vadd.f32 %v3754_v58, %v979_v30  ;;  %v1192_v1 = vmul.f32 %v3491_v35, %v942_v63  ;;  %v3911_v58 = vld [vmem:[%s3292_s8 + $0x14] ss:$0 sm:$0xff]  ;;  %724 = vst [vmem:[#allocation3 + $0x38] sm:$0xff] %v716_v3  ;;  %v3918_v35 = vld [vmem:[#allocation3 + $0xc] sm:$0xff]  ;;  %v2448_v41 = vld [vmem:[%s3300_s16 + $0x4] sm:$0xf] }
 0x1cf   : > { %v933_v14 = vadd.f32 %v925_v6, %v907_v18  ;;  %v855_v5 = vadd.f32 %v839_v9, %v3819_v56  ;;  %v2384_v46 = vor.u32 %v2453_v50, %v2383_v40  ;;  %v2367_v18 = vld [vmem:[%s3300_s16] sm:$0xf]  ;;  %v2449_v6 = vld [vmem:[%s3300_s16 + $0x4] sm:$0xf0]  ;;  %v3913_v33 = vadd.f32 %v1072_v10, %v1054_v31  ;;  %v3920_v63 = vld [vmem:[#allocation3 + $0x14] sm:$0xff]  ;;  %1928 = vmatpush.bf16.msra.mxu1 %v2396_v23 }
 0x1d0   : > { %v1174_v25 = vadd.f32 %v1166_v57, %v1148_v37  ;;  %1899 = vmatpush.bf16.msra.mxu0 %v2392_v27  ;;  %2470 = vmatpush.bf16.msra.mxu2 %v2392_v27  ;;  %v3916_v60 = vmul.f32 %v3523_v0, %v716_v3  ;;  %v2388_v44 = vor.u32 %v2452_v15, %v2385_v22  ;;  %v3922_v19 = vld [vmem:[#allocation3 + $0xb] sm:$0xff]  ;;  %v3929_v0 = vld [vmem:[#allocation3 + $0x13] sm:$0xff]  ;;  %v4553_v22 = vld [vmem:[#allocation45_spill] sm:$0xff] }
 0x1d1   : > { %v959_v16 = vadd.f32 %v951_v52, %v933_v14  ;;  %v762_v12 = vmul.f32 %v4542_v32, %v716_v3  ;;  %2478 = vmatpush.bf16.msra.mxu3 %v2396_v23  ;;  %v2376_v62 = vor.u32 %v2451_v39, %v2375_v54  ;;  %v2369_v2 = vld [vmem:[%s3300_s16 + $0x8] sm:$0xf0]  ;;  %v2380_v14 = vor.u32 %v2450_v29, %v2377_v55  ;;  %v4552_v10 = vld [vmem:[#allocation40_spill] sm:$0xff]  ;;  %v3937_v30 = vld [vmem:[%s3292_s8 + $0x15] ss:$0 sm:$0xff] }
 0x1d2   : > { %v3924_v17 = vadd.f32 %v1192_v1, %v1174_v25  ;;  %v2368_v52 = vor.u32 %v2449_v6, %v2367_v18  ;;  %v1310_v53 = vmul.f32 %v3826_v28, %v4552_v10  ;;  %v3939_v32 = vld [vmem:[#allocation3 + $0xa] sm:$0xff]  ;;  %v3941_v9 = vld [vmem:[#allocation3 + $0x12] sm:$0xff]  ;;  %v1317_v31 = vadd.f32 %v3857_v34, %v3853_v61 }
 0x1d3   : > { %v975_v56 = vadd.f32 %v959_v16, %v855_v5  ;;  %v1360_v21 = vmul.f32 %v3911_v58, %v3920_v63  ;;  %v3950_v40 = vld [vmem:[%s3292_s8 + $0x16] ss:$0 sm:$0xff]  ;;  %v3952_v50 = vld [vmem:[#allocation3 + $0x9] sm:$0xff]  ;;  %v2372_v37 = vor.u32 %v2448_v41, %v2369_v2  ;;  %v1377_v27 = vmul.f32 %v3937_v30, %v3922_v19  ;;  %v3962_v23 = vld [vmem:[%s3292_s8 + $0x17] ss:$0 sm:$0xff]  ;;  %1929 = vmatpush.bf16.msra.mxu1 %v2388_v44 }
 0x1d4   : > { %1900 = vmatpush.bf16.msra.mxu0 %v2384_v46  ;;  %2471 = vmatpush.bf16.msra.mxu2 %v2384_v46  ;;  %v1318_v57 = vadd.f32 %v1310_v53, %v3870_v11  ;;  %v1378_v61 = vmul.f32 %v3937_v30, %v3929_v0  ;;  %v3959_v34 = vld [vmem:[#allocation3 + $0x11] sm:$0xff]  ;;  %v1470_v15 = vld [vmem:[#allocation3 + $0x8] sm:$0xff]  ;;  %v1333_v5 = vadd.f32 %v1317_v31, %v4553_v22  ;;  %v3991_v22 = vld [vmem:[%s3292_s8 + $0x1a] ss:$0 sm:$0xff] }
 0x1d5   : > { %v3932_v4 = vadd.f32 %v3787_v7, %v975_v56  ;;  %v1359_v7 = vmul.f32 %v3911_v58, %v3918_v35  ;;  %2479 = vmatpush.bf16.msra.mxu3 %v2388_v44  ;;  %v1403_v16 = vmul.f32 %v3950_v40, %v3939_v32  ;;  %v1404_v11 = vmul.f32 %v3950_v40, %v3941_v9  ;;  %v3970_v3 = vld [vmem:[%s3292_s8 + $0x18] ss:$0 sm:$0xff]  ;;  %v1488_v1 = vld [vmem:[#allocation3 + $0x7] sm:$0xff] }
 0x1d6   : > { %v1334_v54 = vadd.f32 %v1318_v57, %v3777_v59  ;;  %v1386_v29 = vadd.f32 %v1378_v61, %v1360_v21  ;;  %v1429_v25 = vmul.f32 %v3962_v23, %v3952_v50  ;;  %v771_v46 = vld [vmem:[#allocation3 + $0x37] sm:$0xff]  ;;  %v1430_v6 = vmul.f32 %v3962_v23, %v3959_v34 }
 0x1d7   : > { %v1385_v39 = vadd.f32 %v1377_v27, %v1359_v7  ;;  %v797_v55 = vld [vmem:[#allocation3 + $0x36] sm:$0xff]  ;;  %v1479_v56 = vmul.f32 %v3970_v3, %v1470_v15  ;;  %v1480_v59 = vmul.f32 %v3970_v3, %v3774_v43  ;;  %v780_v44 = vmul.f32 %v4548_v48, %v771_v46  ;;  %1930 = vmatpush.bf16.msra.mxu1 %v2380_v14  ;;  %v1514_v48 = vld [vmem:[#allocation3 + $0x6] sm:$0xff] }
 0x1d8   : > { %v823_v18 = vld [vmem:[#allocation3 + $0x35] sm:$0xff]  ;;  %1901 = vmatpush.bf16.msra.mxu0 %v2376_v62  ;;  %2472 = vmatpush.bf16.msra.mxu2 %v2376_v62  ;;  %v806_v41 = vmul.f32 %v3562_v20, %v797_v55  ;;  %v1412_v61 = vadd.f32 %v1404_v11, %v1386_v29  ;;  %v1590_v29 = vld [vmem:[#allocation3 + $0x4] sm:$0xff] }
 0x1d9   : > { %v832_v2 = vmul.f32 %v3581_v45, %v823_v18  ;;  %v873_v10 = vld [vmem:[#allocation3 + $0x34] sm:$0xff]  ;;  %v1411_v62 = vadd.f32 %v1403_v16, %v1385_v39  ;;  %2480 = vmatpush.bf16.msra.mxu3 %v2380_v14  ;;  %v788_v20 = vadd.f32 %v780_v44, %v762_v12  ;;  %v1608_v55 = vld [vmem:[#allocation3 + $0x3] sm:$0xff]  ;;  %v4007_v44 = vld [vmem:[%s3292_s8 + $0x1d] ss:$0 sm:$0xff] }
 0x1da   : > { %v891_v53 = vld [vmem:[#allocation3 + $0x33] sm:$0xff]  ;;  %v882_v7 = vmul.f32 %v4549_v13, %v873_v10  ;;  %v1438_v39 = vadd.f32 %v1430_v6, %v1412_v61  ;;  %v3998_v11 = vld [vmem:[%s3292_s8 + $0x1b] ss:$0 sm:$0xff] }
 0x1db   : > { %v917_v31 = vld [vmem:[#allocation3 + $0x32] sm:$0xff]  ;;  %v900_v21 = vmul.f32 %v4550_v38, %v891_v53  ;;  %v1437_v15 = vadd.f32 %v1429_v25, %v1411_v62  ;;  %v1540_v38 = vld [vmem:[#allocation3 + $0x5] sm:$0xff]  ;;  %v814_v14 = vadd.f32 %v806_v41, %v788_v20  ;;  %1931 = vmatpush.bf16.msra.mxu1 %v2372_v37  ;;  %v1617_v62 = vmul.f32 %v4007_v44, %v1608_v55 }
 0x1dc   : > { %v926_v57 = vmul.f32 %v3584_v47, %v917_v31  ;;  %v943_v27 = vld [vmem:[#allocation3 + $0x31] sm:$0xff]  ;;  %v3987_v43 = vld [vmem:[%s3292_s8 + $0x19] ss:$0 sm:$0xff]  ;;  %1902 = vmatpush.bf16.msra.mxu0 %v2368_v52  ;;  %2473 = vmatpush.bf16.msra.mxu2 %v2368_v52  ;;  %v1454_v18 = vadd.f32 %v1438_v39, %v1334_v54  ;;  %v1549_v6 = vmul.f32 %v3998_v11, %v1540_v38  ;;  %v1634_v41 = vld [vmem:[#allocation3 + $0x2] sm:$0xff] }
 0x1dd   : > { %v952_v45 = vmul.f32 %v3587_v49, %v943_v27  ;;  %v908_v16 = vadd.f32 %v900_v21, %v882_v7  ;;  %v1497_v47 = vmul.f32 %v3987_v43, %v1488_v1  ;;  %v1498_v13 = vmul.f32 %v3987_v43, %v3791_v24  ;;  %2481 = vmatpush.bf16.msra.mxu3 %v2372_v37  ;;  %v4001_v1 = vld [vmem:[%s3292_s8 + $0x1c] ss:$0 sm:$0xff]  ;;  %v4020_v7 = vld [vmem:[%s3292_s8 + $0x1f] ss:$0 sm:$0xff]  ;;  %v4022_v21 = vld [vmem:[#allocation3 + $0x50] sm:$0xff] }
 0x1de   : > { %v1453_v12 = vadd.f32 %v1437_v15, %v1333_v5  ;;  %v1523_v49 = vmul.f32 %v3991_v22, %v1514_v48  ;;  %v840_v24 = vadd.f32 %v832_v2, %v814_v14  ;;  %v1524_v5 = vmul.f32 %v3991_v22, %v3807_v8  ;;  %v1660_v2 = vld [vmem:[#allocation3 + $0x1] sm:$0xff]  ;;  %v4032_v15 = vld [vmem:[#allocation3 + $0x4f] sm:$0xff] }
 0x1df   : > { %v934_v25 = vadd.f32 %v926_v57, %v908_v16  ;;  %v1505_v52 = vadd.f32 %v1497_v47, %v1479_v56  ;;  %v1506_v46 = vadd.f32 %v1498_v13, %v1480_v59  ;;  %v1550_v37 = vmul.f32 %v3998_v11, %v3835_v26  ;;  %v4013_v59 = vld [vmem:[%s3292_s8 + $0x1e] ss:$0 sm:$0xff]  ;;  %v4036_v47 = vld [vmem:[#allocation3 + $0x4e] sm:$0xff]  ;;  %v4046_v14 = vld [vmem:[#allocation3 + $0x56] sm:$0xff] }
 0x1e0   : > { %v1599_v56 = vmul.f32 %v4001_v1, %v1590_v29  ;;  %v856_v54 = vadd.f32 %v840_v24, %v3916_v60  ;;  %v1600_v8 = vmul.f32 %v4001_v1, %v3918_v35  ;;  %v1618_v26 = vmul.f32 %v4007_v44, %v3922_v19  ;;  %v4029_v60 = vld [vmem:[#allocation3 + $0x58] sm:$0xff]  ;;  %v4048_v39 = vld [vmem:[#allocation3 + $0x4d] sm:$0xff] }
 0x1e1   : > { %v960_v10 = vadd.f32 %v952_v45, %v934_v25  ;;  %v1531_v53 = vadd.f32 %v1523_v49, %v1505_v52  ;;  %v1532_v31 = vadd.f32 %v1524_v5, %v1506_v46  ;;  %v1643_v27 = vmul.f32 %v4013_v59, %v1634_v41  ;;  %v4034_v16 = vld [vmem:[#allocation3 + $0x57] sm:$0xff]  ;;  %v4555_v24 = vld [vmem:[#allocation38_spill] sm:$0xff] }
 0x1e2   : > { %v1644_v48 = vmul.f32 %v4013_v59, %v3939_v32  ;;  %v1625_v35 = vadd.f32 %v1617_v62, %v1599_v56  ;;  %v1669_v61 = vmul.f32 %v4020_v7, %v1660_v2  ;;  %v4040_v19 = vadd.f32 %v3821_v36, %v3932_v4  ;;  %v4052_v46 = vld [vmem:[#allocation3 + $0x55] sm:$0xff]  ;;  %v4554_v4 = vld [vmem:[#allocation50_spill] sm:$0xff] }
 0x1e3   : > { %v1557_v57 = vadd.f32 %v1549_v6, %v1531_v53  ;;  %v976_v20 = vadd.f32 %v960_v10, %v856_v54  ;;  %v1558_v45 = vadd.f32 %v1550_v37, %v1532_v31  ;;  %v1626_v13 = vadd.f32 %v1618_v26, %v1600_v8  ;;  %v4060_v6 = vld [vmem:[#allocation3 + $0x4c] sm:$0xff] }
 0x1e4   : > { %v1670_v32 = vmul.f32 %v4020_v7, %v3952_v50  ;;  %v1243_v38 = vmul.f32 %v3784_v51, %v4022_v21  ;;  %v1651_v25 = vadd.f32 %v1643_v27, %v1625_v35  ;;  %v1244_v52 = vmul.f32 %v3784_v51, %v4029_v60  ;;  %v4071_v56 = vld [vmem:[#allocation3 + $0x53] sm:$0xff]  ;;  %v4075_v62 = vld [vmem:[#allocation3 + $0x4a] sm:$0xff] }
 0x1e5   : > { %v1573_v49 = vadd.f32 %v1557_v57, %v1453_v12  ;;  %v1574_v29 = vadd.f32 %v1558_v45, %v1454_v18  ;;  %v1652_v36 = vadd.f32 %v1644_v48, %v1626_v13  ;;  %v1261_v55 = vmul.f32 %v4554_v4, %v4032_v15  ;;  %v4062_v12 = vld [vmem:[#allocation3 + $0x54] sm:$0xff]  ;;  %v4064_v18 = vld [vmem:[#allocation3 + $0x4b] sm:$0xff]  ;;  %4556 = vst [vmem:[#allocation39_spill] sm:$0xff] %v4071_v56 }
 0x1e6   : > { %v1262_v50 = vmul.f32 %v4554_v4, %v4034_v16  ;;  %v1287_v5 = vmul.f32 %v4555_v24, %v4036_v47  ;;  %v1096_v41 = vadd.f32 %v3913_v33, %v976_v20  ;;  %v1677_v10 = vadd.f32 %v1669_v61, %v1651_v25  ;;  %v4087_v61 = vld [vmem:[#allocation3 + $0x52] sm:$0xff]  ;;  %v4094_v25 = vld [vmem:[#allocation3 + $0x49] sm:$0xff] }
 0x1e7   : > { %v1288_v53 = vmul.f32 %v4555_v24, %v4046_v14  ;;  %v1313_v37 = vmul.f32 %v3826_v28, %v4048_v39  ;;  %v1678_v2 = vadd.f32 %v1670_v32, %v1652_v36  ;;  %v1269_v54 = vadd.f32 %v1261_v55, %v1243_v38 }
 0x1e8   : > { %v1270_v31 = vadd.f32 %v1262_v50, %v1244_v52  ;;  %v1314_v8 = vmul.f32 %v3826_v28, %v4052_v46  ;;  %v1693_v57 = vadd.f32 %v1677_v10, %v1573_v49  ;;  %v1363_v33 = vmul.f32 %v3911_v58, %v4060_v6  ;;  %v4099_v50 = vld [vmem:[#allocation3 + $0x51] sm:$0xff] }
 0x1e9   : > { %v1364_v26 = vmul.f32 %v3911_v58, %v4062_v12  ;;  %v1381_v27 = vmul.f32 %v3937_v30, %v4064_v18  ;;  %v4083_v48 = vadd.f32 %v1678_v2, %v1574_v29  ;;  %v1295_v20 = vadd.f32 %v1287_v5, %v1269_v54  ;;  %4557 = vst [vmem:[#allocation43_spill] sm:$0xff] %v4099_v50  ;;  %v1474_v5 = vld [vmem:[#allocation3 + $0x48] sm:$0xff] }
 0x1ea   : > { %v1296_v45 = vadd.f32 %v1288_v53, %v1270_v31  ;;  %v1382_v35 = vmul.f32 %v3937_v30, %v4071_v56  ;;  %v4090_v13 = vadd.f32 %v3924_v17, %v1096_v41  ;;  %v1725_v32 = vmul.f32 0.044715, %v1693_v57  ;;  %v1492_v2 = vld [vmem:[#allocation3 + $0x47] sm:$0xff] }
 0x1eb   : > { %v1389_v38 = vadd.f32 %v1381_v27, %v1363_v33  ;;  %v1407_v49 = vmul.f32 %v3950_v40, %v4075_v62  ;;  %v4096_v52 = vmul.f32 0.5, %v1693_v57  ;;  %v1726_v29 = vmul.f32 0.044715, %v4083_v48  ;;  %v4558_v31 = vld [vmem:[#allocation30_spill] sm:$0xff]  ;;  %v4559_v27 = vld [vmem:[#allocation49_spill] sm:$0xff] }
 0x1ec   : > { %v1321_v36 = vadd.f32 %v1313_v37, %v1295_v20  ;;  %v1322_v55 = vadd.f32 %v1314_v8, %v1296_v45  ;;  %v1733_v10 = vmul.f32 %v1725_v32, %v1693_v57  ;;  %v1390_v53 = vadd.f32 %v1382_v35, %v1364_v26  ;;  %v1518_v8 = vld [vmem:[#allocation3 + $0x46] sm:$0xff] }
 0x1ed   : > { %v1408_v17 = vmul.f32 %v3950_v40, %v4087_v61  ;;  %v1415_v41 = vadd.f32 %v1407_v49, %v1389_v38  ;;  %v1734_v54 = vmul.f32 %v1726_v29, %v4083_v48  ;;  %v1433_v37 = vmul.f32 %v3962_v23, %v4094_v25 }
 0x1ee   : > { %v1337_v33 = vadd.f32 %v1321_v36, %v4558_v31  ;;  %v1338_v56 = vadd.f32 %v1322_v55, %v4559_v27  ;;  %v1741_v20 = vmul.f32 %v1733_v10, %v1693_v57  ;;  %v1434_v26 = vmul.f32 %v3962_v23, %v4099_v50  ;;  %v1544_v36 = vld [vmem:[#allocation3 + $0x45] sm:$0xff] }
 0x1ef   : > { %v1416_v45 = vadd.f32 %v1408_v17, %v1390_v53  ;;  %v1483_v35 = vmul.f32 %v3970_v3, %v1474_v5  ;;  %v1742_v32 = vmul.f32 %v1734_v54, %v4083_v48  ;;  %v1441_v38 = vadd.f32 %v1433_v37, %v1415_v41  ;;  %v1594_v17 = vld [vmem:[#allocation3 + $0x44] sm:$0xff] }
 0x1f0   : > { %v1484_v49 = vmul.f32 %v3970_v3, %v4022_v21  ;;  %v1501_v29 = vmul.f32 %v3987_v43, %v1492_v2  ;;  %v1749_v55 = vadd.f32 %v1741_v20, %v1693_v57  ;;  %v1502_v10 = vmul.f32 %v3987_v43, %v4032_v15  ;;  %v1612_v54 = vld [vmem:[#allocation3 + $0x43] sm:$0xff] }
 0x1f1   : > { %v1442_v31 = vadd.f32 %v1434_v26, %v1416_v45  ;;  %v1527_v53 = vmul.f32 %v3991_v22, %v1518_v8  ;;  %v1750_v27 = vadd.f32 %v1742_v32, %v4083_v48  ;;  %v1457_v5 = vadd.f32 %v1441_v38, %v1337_v33  ;;  %v1638_v20 = vld [vmem:[#allocation3 + $0x42] sm:$0xff] }
 0x1f2   : > { %v1509_v50 = vadd.f32 %v1501_v29, %v1483_v35  ;;  %v1528_v41 = vmul.f32 %v3991_v22, %v4036_v47  ;;  %v1757_v21 = vmul.f32 0.7978846, %v1749_v55  ;;  %v1510_v2 = vadd.f32 %v1502_v10, %v1484_v49  ;;  %v1664_v32 = vld [vmem:[#allocation3 + $0x41] sm:$0xff] }
 0x1f3   : > { %v1458_v37 = vadd.f32 %v1442_v31, %v1338_v56  ;;  %v1553_v57 = vmul.f32 %v3998_v11, %v1544_v36  ;;  %v1758_v45 = vmul.f32 0.7978846, %v1750_v27  ;;  %v1554_v15 = vmul.f32 %v3998_v11, %v4048_v39  ;;  %v4128_v56 = vld [vmem:[#allocation3 + $0x20] sm:$0xff]  ;;  %v1233_v39 = vld [vmem:[#allocation3 + $0x28] sm:$0xff] }
 0x1f4   : > { %v1535_v26 = vadd.f32 %v1527_v53, %v1509_v50  ;;  %v1603_v8 = vmul.f32 %v4001_v1, %v1594_v17  ;;  %2663 = vtanh.f32 %v1757_v21  ;;  %v1536_v33 = vadd.f32 %v1528_v41, %v1510_v2  ;;  %v4133_v29 = vld [vmem:[#allocation3 + $0x1f] sm:$0xff]  ;;  %v1251_v10 = vld [vmem:[#allocation3 + $0x27] sm:$0xff] }
 0x1f5   : > { %v1604_v47 = vmul.f32 %v4001_v1, %v4060_v6  ;;  %v1621_v35 = vmul.f32 %v4007_v44, %v1612_v54  ;;  %2665 = vtanh.f32 %v1758_v45  ;;  %v1622_v50 = vmul.f32 %v4007_v44, %v4064_v18  ;;  %v4138_v53 = vld [vmem:[#allocation3 + $0x1e] sm:$0xff]  ;;  %v1277_v54 = vld [vmem:[#allocation3 + $0x26] sm:$0xff] }
 0x1f6   : > { %v1561_v38 = vadd.f32 %v1553_v57, %v1535_v26  ;;  %v1647_v49 = vmul.f32 %v4013_v59, %v1638_v20  ;;  %v1562_v36 = vadd.f32 %v1554_v15, %v1536_v33  ;;  %v1648_v31 = vmul.f32 %v4013_v59, %v4075_v62  ;;  %v4145_v21 = vld [vmem:[#allocation3 + $0x1d] sm:$0xff]  ;;  %v1303_v45 = vld [vmem:[#allocation3 + $0x25] sm:$0xff] }
 0x1f7   : > { %v1629_v55 = vadd.f32 %v1621_v35, %v1603_v8  ;;  %v1673_v6 = vmul.f32 %v4020_v7, %v1664_v32  ;;  %v1718_v17 = vmul.f32 0.5, %v4083_v48  ;;  %v1630_v27 = vadd.f32 %v1622_v50, %v1604_v47  ;;  %v4153_v8 = vld [vmem:[#allocation3 + $0x1c] sm:$0xff]  ;;  %v1353_v35 = vld [vmem:[#allocation3 + $0x24] sm:$0xff] }
 0x1f8   : > { %v1674_v18 = vmul.f32 %v4020_v7, %v4094_v25  ;;  %v1241_v41 = vmul.f32 %v3784_v51, %v4128_v56  ;;  %v1577_v2 = vadd.f32 %v1561_v38, %v1457_v5  ;;  %v1242_v62 = vmul.f32 %v3784_v51, %v1233_v39  ;;  %v4158_v38 = vld [vmem:[#allocation3 + $0x1b] sm:$0xff] }
 0x1f9   : > { %v1655_v57 = vadd.f32 %v1647_v49, %v1629_v55  ;;  %v1259_v20 = vmul.f32 %v4554_v4, %v4133_v29  ;;  %v1578_v26 = vadd.f32 %v1562_v36, %v1458_v37  ;;  %v1656_v48 = vadd.f32 %v1648_v31, %v1630_v27 }
 0x1fa   : > { %v1260_v15 = vmul.f32 %v4554_v4, %v1251_v10  ;;  %v1285_v25 = vmul.f32 %v4555_v24, %v4138_v53  ;;  %v2664_v32 = vpop.eup %2663  ;;  %v1286_v5 = vmul.f32 %v4555_v24, %v1277_v54  ;;  %v1311_v51 = vmul.f32 %v3826_v28, %v4145_v21  ;;  %v1371_v10 = vld [vmem:[#allocation3 + $0x23] sm:$0xff] }
 0x1fb   : > { %v1681_v33 = vadd.f32 %v1673_v6, %v1655_v57  ;;  %v1267_v47 = vadd.f32 %v1259_v20, %v1241_v41  ;;  %v2666_v37 = vpop.eup %2665  ;;  %v1773_v50 = vadd.f32 1.0, %v2664_v32  ;;  %v1682_v49 = vadd.f32 %v1674_v18, %v1656_v48  ;;  %v4169_v20 = vld [vmem:[#allocation3 + $0x1a] sm:$0xff] }
 0x1fc   : > { %v1268_v4 = vadd.f32 %v1260_v15, %v1242_v62  ;;  %v1312_v39 = vmul.f32 %v3826_v28, %v1303_v45  ;;  %v1774_v36 = vadd.f32 1.0, %v2666_v37  ;;  %v1361_v6 = vmul.f32 %v3911_v58, %v4153_v8  ;;  %v4177_v32 = vld [vmem:[#allocation3 + $0x19] sm:$0xff] }
 0x1fd   : > { %v1697_v55 = vadd.f32 %v1681_v33, %v1577_v2  ;;  %v1293_v31 = vadd.f32 %v1285_v25, %v1267_v47  ;;  %v4163_v24 = vadd.f32 %v1682_v49, %v1578_v26  ;;  %v1362_v41 = vmul.f32 %v3911_v58, %v1353_v35  ;;  %v4560_v2 = vld [vmem:[#allocation41_spill] sm:$0xff] }
 0x1fe   : > { %v1294_v27 = vadd.f32 %v1286_v5, %v1268_v4  ;;  %v1379_v54 = vmul.f32 %v3937_v30, %v4158_v38  ;;  %v1781_v18 = vmul.f32 %v1773_v50, %v4096_v52  ;;  %v1782_v57 = vmul.f32 %v1774_v36, %v1718_v17  ;;  %v1397_v25 = vld [vmem:[#allocation3 + $0x22] sm:$0xff]  ;;  %v1490_v49 = vld [vmem:[#allocation3 + $0x17] sm:$0xff] }
 0x1ff   : > { %v1729_v62 = vmul.f32 0.044715, %v1697_v55  ;;  %v1319_v28 = vadd.f32 %v1311_v51, %v1293_v31  ;;  %v4173_v45 = vadd.f32 %v4560_v2, %v3899_v42  ;;  %v1730_v26 = vmul.f32 0.044715, %v4163_v24  ;;  %v1423_v5 = vld [vmem:[#allocation3 + $0x21] sm:$0xff]  ;;  %v1472_v51 = vld [vmem:[#allocation3 + $0x18] sm:$0xff] }
 0x200   : > { %v1320_v48 = vadd.f32 %v1312_v39, %v1294_v27  ;;  %v1380_v15 = vmul.f32 %v3937_v30, %v1371_v10  ;;  %v1789_v33 = vpack.c.bf16 %v1782_v57, %v1781_v18  ;;  %v1387_v17 = vadd.f32 %v1379_v54, %v1361_v6  ;;  %v1516_v31 = vld [vmem:[#allocation3 + $0x16] sm:$0xff] }
 0x201   : > { %v1737_v47 = vmul.f32 %v1729_v62, %v1697_v55  ;;  %v1335_v52 = vadd.f32 %v1319_v28, %v4040_v19  ;;  %v1738_v35 = vmul.f32 %v1730_v26, %v4163_v24  ;;  %v1405_v50 = vmul.f32 %v3950_v40, %v4169_v20  ;;  %v1542_v62 = vld [vmem:[#allocation3 + $0x15] sm:$0xff] }
 0x202   : > { %v1336_v42 = vadd.f32 %v1320_v48, %v4090_v13  ;;  %v1388_v37 = vadd.f32 %v1380_v15, %v1362_v41  ;;  %1903 = vmatmul.bf16.vlgmr.msra.gmra.mxu0 %v1789_v33  ;;  %v4184_v4 = vmul.f32 0.5, %v1697_v55  ;;  %1932 = vmatmul.bf16.vlgmr.msra.gmra.mxu1 %v1789_v33  ;;  %v1406_v36 = vmul.f32 %v3950_v40, %v1397_v25 }
 0x203   : > { %v1745_v39 = vmul.f32 %v1737_v47, %v1697_v55  ;;  %v1431_v19 = vmul.f32 %v3962_v23, %v4177_v32  ;;  %v1746_v6 = vmul.f32 %v1738_v35, %v4163_v24  ;;  %v1413_v10 = vadd.f32 %v1405_v50, %v1387_v17 }
 0x204   : > { %v1432_v13 = vmul.f32 %v3962_v23, %v1423_v5  ;;  %v1481_v27 = vmul.f32 %v3970_v3, %v1472_v51  ;;  %v1414_v54 = vadd.f32 %v1406_v36, %v1388_v37  ;;  %v1482_v18 = vmul.f32 %v3970_v3, %v4128_v56  ;;  %v757_v36 = vld [vmem:[#allocation3 + $0x78] sm:$0xff] }
 0x205   : > { %v1753_v41 = vadd.f32 %v1745_v39, %v1697_v55  ;;  %v1499_v57 = vmul.f32 %v3987_v43, %v1490_v49  ;;  %v1754_v28 = vadd.f32 %v1746_v6, %v4163_v24  ;;  %v1439_v2 = vadd.f32 %v1431_v19, %v1413_v10  ;;  %v801_v19 = vld [vmem:[#allocation3 + $0x76] sm:$0xff] }
 0x206   : > { %v1500_v26 = vmul.f32 %v3987_v43, %v4133_v29  ;;  %v1525_v48 = vmul.f32 %v3991_v22, %v1516_v31  ;;  %v1440_v25 = vadd.f32 %v1432_v13, %v1414_v54  ;;  %v1526_v55 = vmul.f32 %v3991_v22, %v4138_v53  ;;  %v877_v6 = vld [vmem:[#allocation3 + $0x74] sm:$0xff] }
 0x207   : > { %v1761_v15 = vmul.f32 0.7978846, %v1753_v41  ;;  %v1507_v33 = vadd.f32 %v1499_v57, %v1481_v27  ;;  %v1762_v47 = vmul.f32 0.7978846, %v1754_v28  ;;  %v1455_v17 = vadd.f32 %v1439_v2, %v1335_v52  ;;  %v827_v41 = vld [vmem:[#allocation3 + $0x75] sm:$0xff] }
 0x208   : > { %v1508_v56 = vadd.f32 %v1500_v26, %v1482_v18  ;;  %v1551_v5 = vmul.f32 %v3998_v11, %v1542_v62  ;;  %v1456_v51 = vadd.f32 %v1440_v25, %v1336_v42  ;;  %v1552_v37 = vmul.f32 %v3998_v11, %v4145_v21  ;;  %v775_v21 = vld [vmem:[#allocation3 + $0x77] sm:$0xff]  ;;  %v2711_v18 = vld [vmem:[%s3292_s8] ss:$0 sm:$0xff]  ;;  %v2712_v62 = vld [vmem:[%s3292_s8 + $0x1] ss:$0 sm:$0xff] }
 0x209   : > { %2667 = vtanh.f32 %v1761_v15  ;;  %v1533_v35 = vadd.f32 %v1525_v48, %v1507_v33  ;;  %v1601_v50 = vmul.f32 %v4001_v1, %v3920_v63  ;;  %v1602_v49 = vmul.f32 %v4001_v1, %v4153_v8  ;;  %v2713_v28 = vld [vmem:[%s3292_s8 + $0x2] ss:$0 sm:$0xff]  ;;  %v2714_v15 = vld [vmem:[%s3292_s8 + $0x4] ss:$0 sm:$0xff]  ;;  %v2715_v33 = vld [vmem:[%s3292_s8 + $0x5] ss:$0 sm:$0xff] }
 0x20a   : > { %2669 = vtanh.f32 %v1762_v47  ;;  %v1534_v29 = vadd.f32 %v1526_v55, %v1508_v56  ;;  %v1619_v52 = vmul.f32 %v4007_v44, %v3929_v0  ;;  %v1620_v39 = vmul.f32 %v4007_v44, %v4158_v38  ;;  %v895_v38 = vld [vmem:[#allocation3 + $0x73] sm:$0xff] }
 0x20b   : > { %v1559_v53 = vadd.f32 %v1551_v5, %v1533_v35  ;;  %v1645_v42 = vmul.f32 %v4013_v59, %v3941_v9  ;;  %v1722_v63 = vmul.f32 0.5, %v4163_v24  ;;  %v1646_v8 = vmul.f32 %v4013_v59, %v4169_v20  ;;  %v921_v24 = vld [vmem:[#allocation3 + $0x72] sm:$0xff] }
 0x20c   : > { %v1560_v31 = vadd.f32 %v1552_v37, %v1534_v29  ;;  %v1671_v0 = vmul.f32 %v4020_v7, %v3959_v34  ;;  %v1627_v9 = vadd.f32 %v1619_v52, %v1601_v50  ;;  %v1628_v13 = vadd.f32 %v1620_v39, %v1602_v49  ;;  %v997_v47 = vld [vmem:[#allocation3 + $0x70] sm:$0xff]  ;;  %v2717_v37 = vld [vmem:[%s3292_s8 + $0x6] ss:$0 sm:$0xff] }
 0x20d   : > { %v1575_v10 = vadd.f32 %v1559_v53, %v1455_v17  ;;  %v1672_v27 = vmul.f32 %v4020_v7, %v4177_v32  ;;  %v766_v57 = vmul.f32 %v2711_v18, %v757_v36  ;;  %v784_v20 = vmul.f32 %v2712_v62, %v775_v21  ;;  %v1015_v32 = vld [vmem:[#allocation3 + $0x6f] sm:$0xff]  ;;  %v2721_v62 = vld [vmem:[%s3292_s8 + $0xa] ss:$0 sm:$0xff] }
 0x20e   : > { %v1576_v54 = vadd.f32 %v1560_v31, %v1456_v51  ;;  %v810_v34 = vmul.f32 %v2713_v28, %v801_v19  ;;  %v1653_v26 = vadd.f32 %v1645_v42, %v1627_v9  ;;  %v1654_v48 = vadd.f32 %v1646_v8, %v1628_v13  ;;  %v2716_v51 = vld [vmem:[%s3292_s8 + $0x3] ss:$0 sm:$0xff]  ;;  %v947_v39 = vld [vmem:[#allocation3 + $0x71] sm:$0xff]  ;;  %v2718_v19 = vld [vmem:[%s3292_s8 + $0x8] ss:$0 sm:$0xff] }
 0x20f   : > { %v2668_v2 = vpop.eup %2667  ;;  %v886_v25 = vmul.f32 %v2714_v15, %v877_v6  ;;  %v904_v55 = vmul.f32 %v2715_v33, %v895_v38  ;;  %v792_v5 = vadd.f32 %v784_v20, %v766_v57  ;;  %v836_v35 = vmul.f32 %v2716_v51, %v827_v41  ;;  %v1041_v42 = vld [vmem:[#allocation3 + $0x6e] sm:$0xff]  ;;  %v2719_v8 = vld [vmem:[%s3292_s8 + $0x9] ss:$0 sm:$0xff] }
 0x210   : > { %v2670_v17 = vpop.eup %2669  ;;  %v1777_v56 = vadd.f32 1.0, %v2668_v2  ;;  %v930_v29 = vmul.f32 %v2717_v37, %v921_v24  ;;  %v1679_v49 = vadd.f32 %v1671_v0, %v1653_v26  ;;  %v1680_v53 = vadd.f32 %v1672_v27, %v1654_v48  ;;  %v1067_v38 = vld [vmem:[#allocation3 + $0x6d] sm:$0xff]  ;;  %v2720_v27 = vld [vmem:[%s3292_s8 + $0x7] ss:$0 sm:$0xff]  ;;  %v2722_v48 = vld [vmem:[%s3292_s8 + $0xb] ss:$0 sm:$0xff] }
 0x211   : > { %v1778_v50 = vadd.f32 1.0, %v2670_v17  ;;  %v912_v52 = vadd.f32 %v904_v55, %v886_v25  ;;  %v818_v21 = vadd.f32 %v810_v34, %v792_v5  ;;  %v1006_v31 = vmul.f32 %v2718_v19, %v997_v47  ;;  %v1117_v28 = vld [vmem:[#allocation3 + $0x6c] sm:$0xff] }
 0x212   : > { %v1785_v36 = vmul.f32 %v1777_v56, %v4184_v4  ;;  %v1024_v6 = vmul.f32 %v2719_v8, %v1015_v32  ;;  %v1695_v13 = vadd.f32 %v1679_v49, %v1575_v10  ;;  %v1696_v41 = vadd.f32 %v1680_v53, %v1576_v54  ;;  %v1135_v2 = vld [vmem:[#allocation3 + $0x6b] sm:$0xff]  ;;  %v4561_v54 = vld [vmem:[#allocation48_spill] sm:$0xff]  ;;  %v4237_v32 = vld [vmem:[#allocation3 + $0x60] sm:$0xff] }
 0x213   : > { %v1786_v9 = vmul.f32 %v1778_v50, %v1722_v63  ;;  %v938_v24 = vadd.f32 %v930_v29, %v912_v52  ;;  %v844_v0 = vadd.f32 %v836_v35, %v818_v21  ;;  %v956_v18 = vmul.f32 %v2720_v27, %v947_v39  ;;  %v1161_v63 = vld [vmem:[#allocation3 + $0x6a] sm:$0xff]  ;;  %v4243_v50 = vld [vmem:[#allocation3 + $0x5f] sm:$0xff] }
 0x214   : > { %v1032_v57 = vadd.f32 %v1024_v6, %v1006_v31  ;;  %v1050_v20 = vmul.f32 %v2721_v62, %v1041_v42  ;;  %v4233_v34 = vmul.f32 0.5, %v1695_v13  ;;  %v1727_v26 = vmul.f32 0.044715, %v1695_v13  ;;  %v1187_v47 = vld [vmem:[#allocation3 + $0x69] sm:$0xff]  ;;  %v4246_v21 = vld [vmem:[#allocation3 + $0x5e] sm:$0xff] }
 0x215   : > { %v1791_v4 = vpack.c.bf16 %v1786_v9, %v1785_v36  ;;  %v1076_v15 = vmul.f32 %v2722_v48, %v1067_v38  ;;  %v1728_v10 = vmul.f32 0.044715, %v1696_v41  ;;  %v860_v25 = vadd.f32 %v844_v0, %v4561_v54  ;;  %v2723_v5 = vld [vmem:[%s3292_s8 + $0xc] ss:$0 sm:$0xff]  ;;  %v2724_v35 = vld [vmem:[%s3292_s8 + $0xd] ss:$0 sm:$0xff] }
 0x216   : > { %v964_v33 = vadd.f32 %v956_v18, %v938_v24  ;;  %v1058_v55 = vadd.f32 %v1050_v20, %v1032_v57  ;;  %v4239_v17 = vmul.f32 0.5, %v1696_v41  ;;  %v1735_v56 = vmul.f32 %v1727_v26, %v1695_v13  ;;  %v1237_v29 = vld [vmem:[#allocation3 + $0x68] sm:$0xff]  ;;  %v2727_v38 = vld [vmem:[%s3292_s8 + $0x10] ss:$0 sm:$0xff]  ;;  %v1306_v0 = vld [vmem:[#allocation3 + $0x5d] sm:$0xff] }
 0x217   : > { %1913 = vmatmul.bf16.vlgmr.msra.gmra.mxu2 %v1791_v4  ;;  %1942 = vmatmul.bf16.vlgmr.msra.gmra.mxu3 %v1791_v4  ;;  %v1126_v51 = vmul.f32 %v2723_v5, %v1117_v28  ;;  %v1144_v37 = vmul.f32 %v2724_v35, %v1135_v2  ;;  %v1736_v49 = vmul.f32 %v1728_v10, %v1696_v41  ;;  %v2725_v39 = vld [vmem:[%s3292_s8 + $0xe] ss:$0 sm:$0xff]  ;;  %v2726_v8 = vld [vmem:[%s3292_s8 + $0xf] ss:$0 sm:$0xff]  ;;  %v1281_v24 = vld [vmem:[#allocation3 + $0x66] sm:$0xff] }
 0x218   : > { %v980_v53 = vadd.f32 %v964_v33, %v860_v25  ;;  %v1084_v52 = vadd.f32 %v1076_v15, %v1058_v55  ;;  %v1170_v42 = vmul.f32 %v2725_v39, %v1161_v63  ;;  %v1255_v36 = vld [vmem:[#allocation3 + $0x67] sm:$0xff]  ;;  %v1743_v19 = vmul.f32 %v1735_v56, %v1695_v13  ;;  %v2728_v62 = vld [vmem:[%s3292_s8 + $0x11] ss:$0 sm:$0xff]  ;;  %v2729_v48 = vld [vmem:[%s3292_s8 + $0x12] ss:$0 sm:$0xff] }
 0x219   : > { %v1152_v31 = vadd.f32 %v1144_v37, %v1126_v51  ;;  %v1196_v6 = vmul.f32 %v2726_v8, %v1187_v47  ;;  %v1245_v9 = vmul.f32 %v2727_v38, %v4237_v32  ;;  %v1744_v27 = vmul.f32 %v1736_v49, %v1696_v41  ;;  %v1307_v28 = vld [vmem:[#allocation3 + $0x65] sm:$0xff]  ;;  %v1356_v63 = vld [vmem:[#allocation3 + $0x5c] sm:$0xff]  ;;  %v2730_v55 = vld [vmem:[%s3292_s8 + $0x13] ss:$0 sm:$0xff]  ;;  %s4564_s8 = sld [smem:[#allocation22_spill]] }
 0x21a   : > { %v1100_v18 = vadd.f32 %v1084_v52, %v980_v53  ;;  %v1246_v57 = vmul.f32 %v2727_v38, %v1237_v29  ;;  %v1263_v20 = vmul.f32 %v2728_v62, %v4243_v50  ;;  %v1751_v2 = vadd.f32 %v1743_v19, %v1695_v13  ;;  %v1357_v10 = vld [vmem:[#allocation3 + $0x64] sm:$0xff]  ;;  %v1374_v56 = vld [vmem:[#allocation3 + $0x5b] sm:$0xff] }
 0x21b   : > { %v1178_v4 = vadd.f32 %v1170_v42, %v1152_v31  ;;  %v1264_v26 = vmul.f32 %v2728_v62, %v1255_v36  ;;  %v1289_v15 = vmul.f32 %v2729_v48, %v4246_v21  ;;  %v1752_v54 = vadd.f32 %v1744_v27, %v1696_v41  ;;  %v1375_v29 = vld [vmem:[#allocation3 + $0x63] sm:$0xff]  ;;  %v1400_v49 = vld [vmem:[#allocation3 + $0x5a] sm:$0xff] }
 0x21c   : > { %v1271_v25 = vadd.f32 %v1263_v20, %v1245_v9  ;;  %v1290_v33 = vmul.f32 %v2729_v48, %v1281_v24  ;;  %v1315_v47 = vmul.f32 %v2730_v55, %v1306_v0  ;;  %v1759_v5 = vmul.f32 0.7978846, %v1751_v2  ;;  %v1401_v42 = vld [vmem:[#allocation3 + $0x62] sm:$0xff]  ;;  %v1426_v36 = vld [vmem:[#allocation3 + $0x59] sm:$0xff] }
 0x21d   : > { %v1204_v51 = vadd.f32 %v1196_v6, %v1178_v4  ;;  %v1272_v35 = vadd.f32 %v1264_v26, %v1246_v57  ;;  %v1316_v37 = vmul.f32 %v2730_v55, %v1307_v28  ;;  %v1760_v13 = vmul.f32 0.7978846, %v1752_v54  ;;  %v1427_v8 = vld [vmem:[#allocation3 + $0x61] sm:$0xff] }
 0x21e   : > { %v1297_v53 = vadd.f32 %v1289_v15, %v1271_v25  ;;  %v1365_v52 = vmul.f32 %v3911_v58, %v1356_v63  ;;  %v1366_v39 = vmul.f32 %v3911_v58, %v1357_v10  ;;  %2671 = vtanh.f32 %v1759_v5 }
 0x21f   : > { %v1220_v41 = vadd.f32 %v1204_v51, %v1100_v18  ;;  %v1298_v19 = vadd.f32 %v1290_v33, %v1272_v35  ;;  %v1383_v31 = vmul.f32 %v3937_v30, %v1374_v56  ;;  %2673 = vtanh.f32 %v1760_v13  ;;  %v4562_v51 = vld [vmem:[#allocation39_spill] sm:$0xff]  ;;  %p2437_p10 = scmp.ne.s32.totalorder %s4564_s8, 1 }
 0x220   : > { %v1323_v6 = vadd.f32 %v1315_v47, %v1297_v53  ;;  %v1384_v38 = vmul.f32 %v3937_v30, %v1375_v29  ;;  %v1409_v9 = vmul.f32 %v3950_v40, %v1400_v49  ;;  %v1410_v57 = vmul.f32 %v3950_v40, %v1401_v42  ;;  %v4563_v29 = vld [vmem:[#allocation43_spill] sm:$0xff] }
 0x221   : > { %v1324_v24 = vadd.f32 %v1316_v37, %v1298_v19  ;;  %v1391_v27 = vadd.f32 %v1383_v31, %v1365_v52  ;;  %v1435_v58 = vmul.f32 %v3962_v23, %v1426_v36  ;;  %v1436_v18 = vmul.f32 %v3962_v23, %v1427_v8 }
 0x222   : > { %v1339_v62 = vadd.f32 %v1323_v6, %v4173_v45  ;;  %v1392_v20 = vadd.f32 %v1384_v38, %v1366_v39  ;;  %v1485_v28 = vmul.f32 %v3970_v3, %v4029_v60  ;;  %v1486_v30 = vmul.f32 %v3970_v3, %v4237_v32 }
 0x223   : > { %v1340_v2 = vadd.f32 %v1324_v24, %v1220_v41  ;;  %v1417_v4 = vadd.f32 %v1409_v9, %v1391_v27  ;;  %v1503_v26 = vmul.f32 %v3987_v43, %v4034_v16  ;;  %v1504_v40 = vmul.f32 %v3987_v43, %v4243_v50 }
 0x224   : > { %v1418_v48 = vadd.f32 %v1410_v57, %v1392_v20  ;;  %v1529_v45 = vmul.f32 %v3991_v22, %v4046_v14  ;;  %v1530_v23 = vmul.f32 %v3991_v22, %v4246_v21  ;;  %v2672_v15 = vpop.eup %2671  ;;  %v1555_v54 = vmul.f32 %v3998_v11, %v4052_v46 }
 0x225   : > { %v1443_v60 = vadd.f32 %v1435_v58, %v1417_v4  ;;  %v1511_v10 = vadd.f32 %v1503_v26, %v1485_v28  ;;  %v1556_v3 = vmul.f32 %v3998_v11, %v1306_v0  ;;  %v2674_v32 = vpop.eup %2673  ;;  %v1775_v16 = vadd.f32 1.0, %v2672_v15 }
 0x226   : > { %v1444_v25 = vadd.f32 %v1436_v18, %v1418_v48  ;;  %v1512_v33 = vadd.f32 %v1504_v40, %v1486_v30  ;;  %v1605_v43 = vmul.f32 %v4001_v1, %v4062_v12  ;;  %v1776_v50 = vadd.f32 1.0, %v2674_v32  ;;  %v1809_v30 = vld [vmem:[%s3319_s22] sm:$0x3] }
 0x227   : > { %v1459_v14 = vadd.f32 %v1443_v60, %v1339_v62  ;;  %v1537_v55 = vadd.f32 %v1529_v45, %v1511_v10  ;;  %v1606_v22 = vmul.f32 %v4001_v1, %v1356_v63  ;;  %v1783_v21 = vmul.f32 %v1775_v16, %v4233_v34 }
 0x228   : > { %v1460_v47 = vadd.f32 %v1444_v25, %v1340_v2  ;;  %v1538_v5 = vadd.f32 %v1530_v23, %v1512_v33  ;;  %v1623_v46 = vmul.f32 %v4007_v44, %v4562_v51  ;;  %v1784_v11 = vmul.f32 %v1776_v50, %v4239_v17 }
 0x229   : > { %v1563_v0 = vadd.f32 %v1555_v54, %v1537_v55  ;;  %v1624_v35 = vmul.f32 %v4007_v44, %v1374_v56  ;;  %v1649_v12 = vmul.f32 %v4013_v59, %v4087_v61  ;;  %v1675_v13 = vmul.f32 %v4020_v7, %v4563_v29 }
 0x22a   : > { %v1631_v37 = vadd.f32 %v1623_v46, %v1605_v43  ;;  %v1790_v1 = vpack.c.bf16 %v1784_v11, %v1783_v21  ;;  %v1564_v63 = vadd.f32 %v1556_v3, %v1538_v5  ;;  %v1650_v53 = vmul.f32 %v4013_v59, %v1400_v49 }
 0x22b   : > { %v1632_v34 = vadd.f32 %v1624_v35, %v1606_v22  ;;  %v1579_v52 = vadd.f32 %v1563_v0, %v1459_v14  ;;  %v1676_v41 = vmul.f32 %v4020_v7, %v1426_v36  ;;  %v4295_v26 = vperm.slane %v1809_v30, 1  ;;  %v2731_v35 = vld [vmem:[#allocation2 + $0x30] sm:$0xff] }
 0x22c   : > { %v1657_v39 = vadd.f32 %v1649_v12, %v1631_v37  ;;  %1908 = vmatmul.bf16.gmra.mxu0 %v1790_v1  ;;  %v1580_v42 = vadd.f32 %v1564_v63, %v1460_v47  ;;  %1937 = vmatmul.bf16.gmra.mxu1 %v1790_v1  ;;  %v4298_v32 = vperm.slane %v1809_v30, 0 }
 0x22d   : > { %v1658_v17 = vadd.f32 %v1650_v53, %v1632_v34 }
 0x22e   : > { %v1683_v44 = vadd.f32 %v1675_v13, %v1657_v39 }
 0x22f   : > { %v1684_v56 = vadd.f32 %v1676_v41, %v1658_v17 }
 0x230   : > { %v1699_v61 = vadd.f32 %v1683_v44, %v1579_v52 }
 0x231   : > { %v1700_v19 = vadd.f32 %v1684_v56, %v1580_v42 }
 0x232   : > { %v1731_v31 = vmul.f32 0.044715, %v1699_v61  ;;  %v1723_v36 = vmul.f32 0.5, %v1699_v61 }
 0x233   : > { %v1732_v8 = vmul.f32 0.044715, %v1700_v19  ;;  %v1724_v20 = vmul.f32 0.5, %v1700_v19 }
 0x234   : > { %v1739_v6 = vmul.f32 %v1731_v31, %v1699_v61 }
 0x235   : > { %v1740_v38 = vmul.f32 %v1732_v8, %v1700_v19 }
 0x236   : > { %v1747_v9 = vmul.f32 %v1739_v6, %v1699_v61 }
 0x237   : > { %v1748_v24 = vmul.f32 %v1740_v38, %v1700_v19 }
 0x238   : > { %v1755_v27 = vadd.f32 %v1747_v9, %v1699_v61 }
 0x239   : > { %v1756_v59 = vadd.f32 %v1748_v24, %v1700_v19 }
 0x23a   : > { %v1763_v49 = vmul.f32 0.7978846, %v1755_v27 }
 0x23b   : > { %v1764_v57 = vmul.f32 0.7978846, %v1756_v59 }
 0x23c   : > { %2675 = vtanh.f32 %v1763_v49 }
 0x23d   : > { %2677 = vtanh.f32 %v1764_v57 }
 0x242   : > { %v2676_v58 = vpop.eup %2675 }
 0x243   : > { %v2678_v7 = vpop.eup %2677  ;;  %v1779_v62 = vadd.f32 1.0, %v2676_v58 }
 0x244   : > { %v1780_v18 = vadd.f32 1.0, %v2678_v7 }
 0x245   : > { %v1787_v28 = vmul.f32 %v1779_v62, %v1723_v36 }
 0x246   : > { %v1788_v2 = vmul.f32 %v1780_v18, %v1724_v20 }
 0x248   : > { %v1792_v4 = vpack.c.bf16 %v1788_v2, %v1787_v28 }
 0x24a   : > { %1918 = vmatmul.bf16.gmra.mxu2 %v1792_v4  ;;  %1947 = vmatmul.bf16.gmra.mxu3 %v1792_v4 }
 0x27f   : > { %v1933_v48 = vpop.f32.mrf.mxu1  ;;  %v1904_v33 = vpop.f32.mrf.mxu0 }
 0x280   : > { %v1934_v40 = vadd.f32 %v1933_v48, %v4295_v26  ;;  %v1905_v22 = vadd.f32 %v1904_v33, %v4298_v32 }
 0x282   : > { %v2429_v45 = vmul.f32 -1.442695, %v1934_v40 }
 0x284   : > { %2679 = vpow2.f32 %v2429_v45 }
 0x287   : > { %v1935_v5 = vpop.f32.mrf.mxu1  ;;  %v1906_v24 = vpop.f32.mrf.mxu0 }
 0x288   : > { %v1936_v46 = vadd.f32 %v1935_v5, %v4295_v26  ;;  %v1907_v28 = vadd.f32 %v1906_v24, %v4298_v32 }
 0x28a   : > { %v2680_v23 = vpop.eup %2679  ;;  %v2430_v0 = vmul.f32 -1.442695, %v1936_v46 }
 0x28b   : > { %v1977_v15 = vadd.f32 1.0, %v2680_v23 }
 0x28d   : > { %2681 = vrcp.f32 %v1977_v15  ;;  %v1996_v3 = vand.u32 2147483648, %v1977_v15  ;;  %v1994_v25 = vand.u32 2147483647, %v1977_v15  ;;  %vm1990_vm10 = vweird.f32 %v1977_v15 }
 0x28f   : > { %v1997_v55 = vor.u32 1.1754944e-38, %v1996_v3  ;;  %vm1995_vm12 = vcmp.eq.f32.partialorder %v1994_v25, 8.507059e+37 }
 0x293   : > { %v2682_v60 = vpop.eup %2681 }
 0x294   : > { %v1986_v10 = vmul.f32 %v2682_v60, %v1977_v15  ;;  %vm1991_vm9 = vweird.f32 %v2682_v60 }
 0x295   : > { %vm1992_vm11 = vmor %vm1990_vm10, %vm1991_vm9 }
 0x296   : > { %v1987_v54 = vsub.f32 1.0, %v1986_v10 }
 0x298   : > { %v1988_v16 = vmul.f32 %v2682_v60, %v1987_v54  ;;  %v2732_v54 = vld [vmem:[#allocation2 + $0x8] sm:$0xff] }
 0x29a   : > { %v1943_v43 = vpop.f32.mrf.mxu3  ;;  %v1989_v50 = vadd.f32 %v2682_v60, %v1988_v16  ;;  %v1914_v31 = vpop.f32.mrf.mxu2 }
 0x29b   : > { %v1944_v14 = vadd.f32 %v1943_v43, %v4295_v26  ;;  %v1915_v7 = vadd.f32 %v1914_v31, %v4298_v32 }
 0x29c   : > { %v1993_v21 = vsel %vm1992_vm11, %v2682_v60, %v1989_v50 }
 0x29d   : > { %v2433_v47 = vmul.f32 -1.442695, %v1944_v14  ;;  %v1998_v51 = vsel %vm1995_vm12, %v1997_v55, %v1993_v21  ;;  %v2733_v14 = vld [vmem:[#allocation2] sm:$0xff] }
 0x29e   : > { %v2105_v11 = vmul.f32 %v1998_v51, %v1905_v22 }
 0x29f   : > { %2683 = vpow2.f32 %v2433_v47 }
 0x2a0   : > { %v4303_v12 = vadd.f32 %v2731_v35, %v2105_v11  ;;  %2685 = vpow2.f32 %v2430_v0  ;;  %v2734_v0 = vld [vmem:[#allocation2 + $0x20] sm:$0xff] }
 0x2a2   : > { %v1945_v37 = vpop.f32.mrf.mxu3  ;;  %2121 = vst [vmem:[#allocation2 + $0x30] sm:$0xff] %v4303_v12  ;;  %v1916_v43 = vpop.f32.mrf.mxu2 }
 0x2a3   : > { %v1946_v29 = vadd.f32 %v1945_v37, %v4295_v26  ;;  %v1917_v21 = vadd.f32 %v1916_v43, %v4298_v32 }
 0x2a5   : > { %v2684_v13 = vpop.eup %2683  ;;  %v2434_v1 = vmul.f32 -1.442695, %v1946_v29 }
 0x2a6   : > { %v1981_v63 = vadd.f32 1.0, %v2684_v13  ;;  %v2686_v34 = vpop.eup %2685 }
 0x2a7   : > { %2687 = vpow2.f32 %v2434_v1  ;;  %v1978_v53 = vadd.f32 1.0, %v2686_v34 }
 0x2a8   : > { %2689 = vrcp.f32 %v1981_v63  ;;  %v2056_v8 = vand.u32 2147483648, %v1981_v63  ;;  %v2054_v9 = vand.u32 2147483647, %v1981_v63  ;;  %vm2050_vm14 = vweird.f32 %v1981_v63 }
 0x2a9   : > { %v1938_v52 = vpop.f32.mrf.mxu1  ;;  %2691 = vrcp.f32 %v1978_v53  ;;  %v2009_v49 = vand.u32 2147483647, %v1978_v53  ;;  %v2011_v57 = vand.u32 2147483648, %v1978_v53  ;;  %vm2005_vm2 = vweird.f32 %v1978_v53 }
 0x2aa   : > { %v1939_v39 = vadd.f32 %v1938_v52, %v4295_v26  ;;  %v2057_v36 = vor.u32 1.1754944e-38, %v2056_v8  ;;  %vm2055_vm1 = vcmp.eq.f32.partialorder %v2054_v9, 8.507059e+37 }
 0x2ab   : > { %vm2010_vm4 = vcmp.eq.f32.partialorder %v2009_v49, 8.507059e+37  ;;  %v2012_v45 = vor.u32 1.1754944e-38, %v2011_v57 }
 0x2ac   : > { %v2431_v44 = vmul.f32 -1.442695, %v1939_v39 }
 0x2ad   : > { %v2688_v42 = vpop.eup %2687 }
 0x2ae   : > { %v2690_v17 = vpop.eup %2689  ;;  %v1982_v41 = vadd.f32 1.0, %v2688_v42 }
 0x2af   : > { %v2046_v56 = vmul.f32 %v2690_v17, %v1981_v63  ;;  %v2692_v61 = vpop.eup %2691  ;;  %vm2051_vm13 = vweird.f32 %v2690_v17  ;;  %v1909_v63 = vpop.f32.mrf.mxu0 }
 0x2b0   : > { %2693 = vrcp.f32 %v1982_v41  ;;  %v2001_v6 = vmul.f32 %v2692_v61, %v1978_v53  ;;  %vm2052_vm15 = vmor %vm2050_vm14, %vm2051_vm13  ;;  %vm2006_vm0 = vweird.f32 %v2692_v61  ;;  %v2069_v60 = vand.u32 2147483647, %v1982_v41 }
 0x2b1   : > { %v2047_v19 = vsub.f32 1.0, %v2046_v56  ;;  %2695 = vpow2.f32 %v2431_v44  ;;  %vm2007_vm3 = vmor %vm2005_vm2, %vm2006_vm0  ;;  %v2071_v10 = vand.u32 2147483648, %v1982_v41  ;;  %vm2065_vm6 = vweird.f32 %v1982_v41  ;;  %v1940_v31 = vpop.f32.mrf.mxu1 }
 0x2b2   : > { %v2002_v27 = vsub.f32 1.0, %v2001_v6  ;;  %vm2070_vm8 = vcmp.eq.f32.partialorder %v2069_v60, 8.507059e+37  ;;  %v1910_v52 = vadd.f32 %v1909_v63, %v4298_v32  ;;  %v1941_v8 = vadd.f32 %v1940_v31, %v4295_v26 }
 0x2b3   : > { %v2048_v38 = vmul.f32 %v2690_v17, %v2047_v19  ;;  %v2072_v22 = vor.u32 1.1754944e-38, %v2071_v10 }
 0x2b4   : > { %v2003_v62 = vmul.f32 %v2692_v61, %v2002_v27  ;;  %v2432_v6 = vmul.f32 -1.442695, %v1941_v8 }
 0x2b5   : > { %v2049_v59 = vadd.f32 %v2690_v17, %v2048_v38 }
 0x2b6   : > { %v2694_v58 = vpop.eup %2693  ;;  %v2004_v30 = vadd.f32 %v2692_v61, %v2003_v62 }
 0x2b7   : > { %v2696_v20 = vpop.eup %2695  ;;  %v2053_v18 = vsel %vm2052_vm15, %v2690_v17, %v2049_v59  ;;  %v2061_v2 = vmul.f32 %v2694_v58, %v1982_v41  ;;  %vm2066_vm5 = vweird.f32 %v2694_v58  ;;  %v2735_v41 = vld [vmem:[#allocation2 + $0x18] sm:$0xff]  ;;  %v1911_v60 = vpop.f32.mrf.mxu0 }
 0x2b8   : > { %v2058_v4 = vsel %vm2055_vm1, %v2057_v36, %v2053_v18  ;;  %v1979_v48 = vadd.f32 1.0, %v2696_v20  ;;  %v2008_v15 = vsel %vm2007_vm3, %v2692_v61, %v2004_v30  ;;  %vm2067_vm7 = vmor %vm2065_vm6, %vm2066_vm5 }
 0x2b9   : > { %v2109_v40 = vmul.f32 %v2058_v4, %v1915_v7  ;;  %v2062_v23 = vsub.f32 1.0, %v2061_v2  ;;  %v2013_v16 = vsel %vm2010_vm4, %v2012_v45, %v2008_v15 }
 0x2ba   : > { %2697 = vrcp.f32 %v1979_v48  ;;  %v2106_v33 = vmul.f32 %v2013_v16, %v1907_v28  ;;  %v2026_v29 = vand.u32 2147483648, %v1979_v48  ;;  %v2024_v1 = vand.u32 2147483647, %v1979_v48 }
 0x2bb   : > { %v4310_v3 = vadd.f32 %v2732_v54, %v2109_v40  ;;  %v2063_v25 = vmul.f32 %v2694_v58, %v2062_v23  ;;  %vm2020_vm10 = vweird.f32 %v1979_v48 }
 0x2bc   : > { %v4313_v55 = vadd.f32 %v2733_v14, %v2106_v33  ;;  %v2027_v53 = vor.u32 1.1754944e-38, %v2026_v29  ;;  %vm2025_vm12 = vcmp.eq.f32.partialorder %v2024_v1, 8.507059e+37 }
 0x2bd   : > { %2125 = vst [vmem:[#allocation2 + $0x8] sm:$0xff] %v4310_v3  ;;  %v2064_v50 = vadd.f32 %v2694_v58, %v2063_v25 }
 0x2be   : > { %2122 = vst [vmem:[#allocation2] sm:$0xff] %v4313_v55 }
 0x2bf   : > { %v2068_v47 = vsel %vm2067_vm7, %v2694_v58, %v2064_v50 }
 0x2c0   : > { %v2698_v5 = vpop.eup %2697  ;;  %v2073_v51 = vsel %vm2070_vm8, %v2072_v22, %v2068_v47  ;;  %v1912_v22 = vadd.f32 %v1911_v60, %v4298_v32 }
 0x2c1   : > { %v2110_v46 = vmul.f32 %v2073_v51, %v1917_v21  ;;  %v2016_v11 = vmul.f32 %v2698_v5, %v1979_v48  ;;  %vm2021_vm9 = vweird.f32 %v2698_v5 }
 0x2c2   : > { %vm2022_vm11 = vmor %vm2020_vm10, %vm2021_vm9 }
 0x2c3   : > { %v4317_v35 = vadd.f32 %v2734_v0, %v2110_v46  ;;  %v2017_v37 = vsub.f32 1.0, %v2016_v11  ;;  %v2736_v11 = vld [vmem:[#allocation2 + $0x28] sm:$0xff] }
 0x2c5   : > { %2126 = vst [vmem:[#allocation2 + $0x20] sm:$0xff] %v4317_v35  ;;  %v2018_v13 = vmul.f32 %v2698_v5, %v2017_v37 }
 0x2c7   : > { %v2019_v34 = vadd.f32 %v2698_v5, %v2018_v13 }
 0x2c9   : > { %v2023_v39 = vsel %vm2022_vm11, %v2698_v5, %v2019_v34  ;;  %v2737_v34 = vld [vmem:[#allocation2 + $0x10] sm:$0xff] }
 0x2ca   : > { %v2028_v42 = vsel %vm2025_vm12, %v2027_v53, %v2023_v39 }
 0x2cb   : > { %v2107_v17 = vmul.f32 %v2028_v42, %v1910_v52 }
 0x2cd   : > { %v4321_v44 = vadd.f32 %v2735_v41, %v2107_v17  ;;  %v1948_v56 = vpop.f32.mrf.mxu3  ;;  %v1919_v28 = vpop.f32.mrf.mxu2 }
 0x2ce   : > { %v1949_v61 = vadd.f32 %v1948_v56, %v4295_v26  ;;  %v1920_v16 = vadd.f32 %v1919_v28, %v4298_v32  ;;  %v2738_v56 = vld [vmem:[#allocation2 + $0x38] sm:$0xff] }
 0x2cf   : > { %2123 = vst [vmem:[#allocation2 + $0x18] sm:$0xff] %v4321_v44 }
 0x2d0   : > { %v2435_v19 = vmul.f32 -1.442695, %v1949_v61 }
 0x2d2   : > { %2699 = vpow2.f32 %v2435_v19 }
 0x2d3   : > { %2701 = vpow2.f32 %v2432_v6 }
 0x2d5   : > { %v1950_v38 = vpop.f32.mrf.mxu3  ;;  %v1921_v1 = vpop.f32.mrf.mxu2 }
 0x2d6   : > { %v1951_v9 = vadd.f32 %v1950_v38, %v4295_v26  ;;  %v1922_v39 = vadd.f32 %v1921_v1, %v4298_v32 }
 0x2d8   : > { %v2700_v24 = vpop.eup %2699  ;;  %v2436_v27 = vmul.f32 -1.442695, %v1951_v9 }
 0x2d9   : > { %v1983_v59 = vadd.f32 1.0, %v2700_v24  ;;  %v2702_v49 = vpop.eup %2701 }
 0x2da   : > { %2703 = vpow2.f32 %v2436_v27  ;;  %v1980_v57 = vadd.f32 1.0, %v2702_v49 }
 0x2db   : > { %2705 = vrcp.f32 %v1983_v59  ;;  %v2086_v2 = vand.u32 2147483648, %v1983_v59  ;;  %v2084_v26 = vand.u32 2147483647, %v1983_v59  ;;  %vm2080_vm14 = vweird.f32 %v1983_v59 }
 0x2dc   : > { %2707 = vrcp.f32 %v1980_v57  ;;  %v2041_v45 = vand.u32 2147483648, %v1980_v57  ;;  %v2039_v54 = vand.u32 2147483647, %v1980_v57  ;;  %vm2035_vm2 = vweird.f32 %v1980_v57 }
 0x2dd   : > { %v2087_v15 = vor.u32 1.1754944e-38, %v2086_v2  ;;  %vm2085_vm1 = vcmp.eq.f32.partialorder %v2084_v26, 8.507059e+37 }
 0x2de   : > { %v2042_v21 = vor.u32 1.1754944e-38, %v2041_v45  ;;  %vm2040_vm4 = vcmp.eq.f32.partialorder %v2039_v54, 8.507059e+37 }
 0x2e0   : > { %v2704_v58 = vpop.eup %2703 }
 0x2e1   : > { %v2706_v7 = vpop.eup %2705  ;;  %v1984_v36 = vadd.f32 1.0, %v2704_v58 }
 0x2e2   : > { %v2076_v62 = vmul.f32 %v2706_v7, %v1983_v59  ;;  %v2708_v20 = vpop.eup %2707  ;;  %vm2081_vm13 = vweird.f32 %v2706_v7 }
 0x2e3   : > { %2709 = vrcp.f32 %v1984_v36  ;;  %v2031_v4 = vmul.f32 %v2708_v20, %v1980_v57  ;;  %vm2082_vm15 = vmor %vm2080_vm14, %vm2081_vm13  ;;  %vm2036_vm0 = vweird.f32 %v2708_v20  ;;  %v2099_v51 = vand.u32 2147483647, %v1984_v36 }
 0x2e4   : > { %v2077_v18 = vsub.f32 1.0, %v2076_v62  ;;  %vm2037_vm3 = vmor %vm2035_vm2, %vm2036_vm0  ;;  %v2101_v46 = vand.u32 2147483648, %v1984_v36  ;;  %vm2095_vm6 = vweird.f32 %v1984_v36 }
 0x2e5   : > { %v2032_v48 = vsub.f32 1.0, %v2031_v4  ;;  %vm2100_vm8 = vcmp.eq.f32.partialorder %v2099_v51, 8.507059e+37 }
 0x2e6   : > { %v2078_v30 = vmul.f32 %v2706_v7, %v2077_v18  ;;  %v2102_v52 = vor.u32 1.1754944e-38, %v2101_v46 }
 0x2e7   : > { %v2033_v10 = vmul.f32 %v2708_v20, %v2032_v48 }
 0x2e8   : > { %v2079_v40 = vadd.f32 %v2706_v7, %v2078_v30 }
 0x2e9   : > { %v2710_v23 = vpop.eup %2709  ;;  %v2034_v50 = vadd.f32 %v2708_v20, %v2033_v10 }
 0x2ea   : > { %v2083_v25 = vsel %vm2082_vm15, %v2706_v7, %v2079_v40  ;;  %v2091_v33 = vmul.f32 %v2710_v23, %v1984_v36  ;;  %vm2096_vm5 = vweird.f32 %v2710_v23 }
 0x2eb   : > { %v2088_v43 = vsel %vm2085_vm1, %v2087_v15, %v2083_v25  ;;  %v2038_v5 = vsel %vm2037_vm3, %v2708_v20, %v2034_v50  ;;  %vm2097_vm7 = vmor %vm2095_vm6, %vm2096_vm5 }
 0x2ec   : > { %v2111_v14 = vmul.f32 %v2088_v43, %v1920_v16  ;;  %v2092_v47 = vsub.f32 1.0, %v2091_v33  ;;  %v2043_v37 = vsel %vm2040_vm4, %v2042_v21, %v2038_v5 }
 0x2ed   : > { %v2108_v13 = vmul.f32 %v2043_v37, %v1912_v22 }
 0x2ee   : > { %v2119_v0 = vadd.f32 %v2736_v11, %v2111_v14  ;;  %v2093_v29 = vmul.f32 %v2710_v23, %v2092_v47 }
 0x2ef   : > { %v2116_v53 = vadd.f32 %v2737_v34, %v2108_v13 }
 0x2f0   : > { %2127 = vst [vmem:[#allocation2 + $0x28] sm:$0xff] %v2119_v0  ;;  %v2094_v63 = vadd.f32 %v2710_v23, %v2093_v29 }
 0x2f1   : > { %2124 = vst [vmem:[#allocation2 + $0x10] sm:$0xff] %v2116_v53 }
 0x2f2   : > { %v2098_v42 = vsel %vm2097_vm7, %v2710_v23, %v2094_v63 }
 0x2f3   : > { %v2103_v17 = vsel %vm2100_vm8, %v2102_v52, %v2098_v42 }
 0x2f4   : > { %v2112_v41 = vmul.f32 %v2103_v17, %v1922_v39  ;;  %2132 = sbr.rel (%p2437_p10) target bundleno = 769 (0x301), region = 76 }
 0x2f6   : > { %v2120_v61 = vadd.f32 %v2738_v56, %v2112_v41 }
 0x2f8   : > { %2128 = vst [vmem:[#allocation2 + $0x38] sm:$0xff] %v2120_v61 }
 0x2f9   : > { %2133 = vst [vmem:[%s3321_s17] sm:$0xff] %v4303_v12 }
 0x2fa   : > { %2134 = vst [vmem:[%s3321_s17 + $0x8] sm:$0xff] %v4313_v55 }
 0x2fb   : > { %2135 = vst [vmem:[%s3321_s17 + $0x10] sm:$0xff] %v4321_v44 }
 0x2fc   : > { %2136 = vst [vmem:[%s3321_s17 + $0x18] sm:$0xff] %v2116_v53 }
 0x2fd   : > { %2137 = vst [vmem:[%s3321_s17 + $0x20] sm:$0xff] %v4310_v3 }
 0x2fe   : > { %2138 = vst [vmem:[%s3321_s17 + $0x28] sm:$0xff] %v4317_v35 }
 0x2ff   : > { %2139 = vst [vmem:[%s3321_s17 + $0x30] sm:$0xff] %v2119_v0 }
 0x300   : > { %2140 = vst [vmem:[%s3321_s17 + $0x38] sm:$0xff] %v2120_v61 }
 0x301 PF: > { %s4565_s13 = sld [smem:[#allocation23_spill]]  ;;  %s2155_s26 = sshll.u32 %s3321_s17, 4  ;;  %s2156_s26 = int_to_ptr.vmem [resolvable:$true] %s2155_s26 }
 0x302   : > { %s4566_s12 = sld [smem:[#allocation58_spill]]  ;;  %s2142_s30 = scalar_lea.sflag [#allocation7], %s3277_s10 }
 0x307   : > { %s2465_s21 = sshll.u32 %s4565_s13, 6 }
 0x308   : > { %s2154_s5 = scalar_lea.hbm %s4566_s12, %s2465_s21  ;;  %s2909_s29 = scalar_lea.hbm %s4566_s12, 256 }
 0x309   : > { %s2157_s23 = sshll.u32 %s2154_s5, 4  ;;  %s2158_s23 = int_to_ptr.hbm [resolvable:$true] %s2157_s23 }
 0x30a   : > { %s2903_s7 = sshra.s32 %s2158_s23, 4  ;;  %s2904_s7 = int_to_ptr.hbm [resolvable:$true] %s2903_s7 }
 0x30b   : > { %s2905_s1 = scalar_lea.hbm %s2904_s7, 64  ;;  %p2910_p6 = scmp.lt.s32.totalorder %s2904_s7, %s4566_s12 }
 0x30c   : > { %p2906_p12 = scmp.ne.s32.totalorder %s2904_s7, %s2905_s1  ;;  %p2911_p8 = scmp.lt.s32.totalorder %s2909_s29, %s2905_s1 }
 0x30e   : > { %p2907_p2 = pnand %p2906_p12, %p3232_p0  ;;  %p2912_p1 = por %p2911_p8, %p2910_p6 }
 0x310   : > { %p2908_p4 = pneg %p2907_p2 }
 0x312   : > { %p2913_p9 = pnand %p2912_p1, %p2908_p4 }
 0x314   : > { %2916 = shalt.err (!%p2913_p9)
}
 0x315   : > { %s3025_s10 = smov 128   ;;  %s3026_s17 = smov 8  }
 0x316   : > { %2492 = dma.vmem_to_hbm [thread:$0]  (%p3232_p0), %s2156_s26, 1024, %s2158_s23, %s2142_s30, %s3025_s10, %s3025_s10, %s3026_s17  }
 0x317 PF: > { %s4567_s19 = sld [smem:[#allocation20_spill]]  ;;  %p2515_p13 = scmp.ge.s32.totalorder %s3019_s11, 2 }
 0x319   : > { %p2511_p11 = pnand %p2515_p13, %p3244_p3 }
 0x31b   : > { %p2512_p5 = pneg %p2511_p11 }
 0x31d   : > { %s2172_s4 = sand.u32 1, %s4567_s19  }
 0x31e   : > { %s2173_s27 = scalar_lea.sflag [#allocation7], %s2172_s4 }
 0x31f   : > { %2974 = dma.done.wait (%p2512_p5), %s2173_s27, 1024  }
 0x320   : > { %2976 = vsyncadd (%p2512_p5), %s2173_s27, 4294966272  ;;  %s29_s11 = sadd.s32 1, %s3019_s11   ;;  %s4569_s14 = sld [smem:[#allocation19_spill]] }
 0x321   : > { %p26_p7 = scmp.ge.s32.totalorder %s29_s11, 10   ;;  %s4570_s26 = sld [smem:[#allocation26_spill]] }
 0x322   : > { %s4571_s20 = sld [smem:[#allocation21_spill]]  ;;  %s4576_s24 = smov %s2983_s25 }
 0x323   : > { %s4572_s29 = sld [smem:[#allocation28_spill]]  ;;  %s4578_s27 = smov %s2995_s28 }
 0x324   : > { %s4573_s8 = sld [smem:[#allocation24_spill]]  ;;  %s4580_s30 = smov %s3011_s9 }
 0x325   : > { %s4574_s15 = sld [smem:[#allocation25_spill]] }
 0x326   : > { %s4575_s10 = sld [smem:[#allocation27_spill]]  ;;  %s4577_s25 = smov %s4569_s14 }
 0x327   :  { %28 = sbr.rel (!%p26_p7) target bundleno = 21 (0x15), region = 155 }
 0x328   : > { %s4579_s28 = smov %s4571_s20 }
 0x32b   : > { %s4581_s9 = smov %s4574_s15 }
 0x32c   :  { %2179 = vsyncpa [#allocation6], 1 }
 0x32d   :  { %2181 = vsyncpa [#allocation6 + $0x1], 1 }
 0x32e   :  { %2182 = vsyncpa [#allocation9], 1 }
 0x32f   :  { %2184 = vsyncpa [#allocation9 + $0x1], 1 }
 0x330   :  { %2185 = vsyncpa [#allocation12], 1 }
 0x331   :  { %2187 = vsyncpa [#allocation12 + $0x1], 1 }
 0x332   :  { %2188 = vsyncpa [#allocation7], 1 }
 0x333   :  { %2190 = vsyncpa [#allocation7 + $0x1], 1 }

</bundles_post_ra>
